<compile_context>
chip_gen: v7x
topology: tpu7x:2x2x1
jax: 0.10.0
libtpu: 0.0.40
codegen_flags: <defaults>
</compile_context>

<pallas_src>
import jax
import jax.numpy as jnp
from jax import lax
from jax.experimental import pallas as pl
from jax.experimental.pallas import tpu as pltpu

# Fixed by the PyTorch module definition.
IC, OC = 5, 50
KH, KW = 13, 12
STRIDE = (3, 3)
PAD = (3, 5)
OUT_PAD = (1, 2)

OCP = 128            # OC padded to a full lane width -> unmasked vector stores
ROWS_PER_TILE = 14   # output image rows handled per grid step


def _matmul_bias_sigmoid_kernel(x_ref, w_ref, b_ref, o_ref):
    # x_ref: (1, TM, K)   bf16 im2col rows for this output tile
    # w_ref: (K, OCP)     bf16 flattened (flipped) conv kernel, OC padded to 128
    # b_ref: (1, OCP)     f32 bias
    # o_ref: (1, TM, OCP) output tile
    acc = jnp.dot(x_ref[0], w_ref[...], preferred_element_type=jnp.float32)
    acc = acc + b_ref[...]
    o_ref[0] = jax.nn.sigmoid(acc).astype(o_ref.dtype)


def conv_transpose_sigmoid(x_nchw, weight, bias):
    """weight: PyTorch ConvTranspose2d layout (IC, OC, KH, KW); bias: (OC,)."""
    N, c_in, H, W = x_nchw.shape
    assert c_in == IC
    sh, sw = STRIDE
    ph, pw = PAD
    oph, opw = OUT_PAD
    Ho = (H - 1) * sh - 2 * ph + KH + oph
    Wo = (W - 1) * sw - 2 * pw + KW + opw

    # ---- tiling ----
    TH = min(ROWS_PER_TILE, Ho)        # output rows per grid step
    T = (Ho + TH - 1) // TH            # row tiles
    Hop = T * TH                       # padded output rows (multiple of TH)
    Wop = ((Wo + 7) // 8) * 8          # padded output cols (sublane aligned)
    K = KH * KW * IC                   # contraction depth (= 780)
    TM = TH * Wop                      # matmul M per grid step

    # ---- host layout plumbing: NCHW -> NHWC, zero-dilate, pad, im2col ----
    x = jnp.transpose(x_nchw, (0, 2, 3, 1))
    Hd, Wd = (H - 1) * sh + 1, (W - 1) * sw + 1
    xd = jnp.zeros((N, Hd, Wd, IC), x.dtype).at[:, ::sh, ::sw, :].set(x)
    pt = KH - 1 - ph
    plft = KW - 1 - pw
    Hp = Hop + KH - 1
    Wp = Wo + KW - 1
    xp = jnp.pad(xd, ((0, 0), (pt, Hp - pt - Hd), (plft, Wp - plft - Wd), (0, 0)))

    # im2col with K = (kh, kw, ic) flattened into the last (lane) dim:
    #   X3[n, oh, ow, kh*KW*IC + kw*IC + ic] = xp[n, oh+kh, ow+kw, ic]
    x2 = jnp.stack([xp[:, :, kw:kw + Wo, :] for kw in range(KW)], axis=3)
    x2 = x2.reshape(N, Hp, Wo, KW * IC)
    x3 = jnp.stack([x2[:, kh:kh + Hop, :, :] for kh in range(KH)], axis=3)
    x3 = x3.reshape(N, Hop, Wo, K)
    x3 = jnp.pad(x3, ((0, 0), (0, 0), (0, Wop - Wo), (0, 0)))
    x3 = x3.reshape(N, Hop * Wop, K).astype(jnp.bfloat16)
    # TODO(synk): a stride-phase (3x3) decomposition would drop the 8/9
    # structural zeros baked into this im2col and cut FLOPs/footprint ~9x.

    # ConvTranspose weight (IC,OC,KH,KW) -> flipped conv kernel, flattened, OC-padded.
    wf = jnp.transpose(jnp.flip(weight, axis=(2, 3)), (2, 3, 0, 1))   # (KH,KW,IC,OC)
    wk = wf.reshape(K, OC)
    wk = jnp.pad(wk, ((0, 0), (0, OCP - OC))).astype(jnp.bfloat16)    # (K, OCP)
    b2 = jnp.pad(bias, (0, OCP - OC)).reshape(1, OCP).astype(jnp.float32)

    out_flat = pl.pallas_call(
        _matmul_bias_sigmoid_kernel,
        out_shape=jax.ShapeDtypeStruct((N, Hop * Wop, OCP), x_nchw.dtype),
        grid_spec=pltpu.PrefetchScalarGridSpec(
            num_scalar_prefetch=0,
            grid=(N, T),
            in_specs=[
                pl.BlockSpec((1, TM, K), lambda n, t: (n, t, 0)),
                pl.BlockSpec((K, OCP), lambda n, t: (0, 0)),
                pl.BlockSpec((1, OCP), lambda n, t: (0, 0)),
            ],
            out_specs=pl.BlockSpec((1, TM, OCP), lambda n, t: (n, t, 0)),
        ),
        compiler_params=pltpu.CompilerParams(
            dimension_semantics=("parallel", "parallel")),
    )(x3, wk, b2)

    y = out_flat.reshape(N, Hop, Wop, OCP)[:, :Ho, :Wo, :OC]
    return jnp.transpose(y, (0, 3, 1, 2))   # back to NCHW


def _reference(x_nchw, weight, bias):
    # Independent XLA reference: conv-transpose == dilated conv with flipped kernel.
    sh, sw = STRIDE
    ph, pw = PAD
    oph, opw = OUT_PAD
    w_oihw = jnp.transpose(jnp.flip(weight, axis=(2, 3)), (1, 0, 2, 3))
    y = lax.conv_general_dilated(
        x_nchw, w_oihw,
        window_strides=(1, 1),
        padding=((KH - 1 - ph, KH - 1 - ph + oph),
                 (KW - 1 - pw, KW - 1 - pw + opw)),
        lhs_dilation=(sh, sw),
        rhs_dilation=(1, 1),
        dimension_numbers=("NCHW", "OIHW", "NCHW"),
        precision=lax.Precision.HIGHEST)
    return jax.nn.sigmoid(y + bias[None, :, None, None])


if __name__ == "__main__":
    key = jax.random.PRNGKey(0)
    kx, kw_key, kb_key = jax.random.split(key, 3)

    # Small shapes consistent with the module (batch=2, C_in=5, 16x16 spatial).
    N, H, W = 2, 16, 16
    x = jax.random.normal(kx, (N, IC, H, W), jnp.float32)
    weight = jax.random.normal(kw_key, (IC, OC, KH, KW), jnp.float32) * 0.05
    bias = jax.random.normal(kb_key, (OC,), jnp.float32) * 0.05

    out = jax.block_until_ready(conv_transpose_sigmoid(x, weight, bias))

    ref = jax.block_until_ready(_reference(x, weight, bias))
    assert out.shape == ref.shape, (out.shape, ref.shape)
    max_err = float(jnp.max(jnp.abs(out - ref)))
    if max_err > 5e-3:
        raise AssertionError(f"Pallas kernel mismatch vs reference: {max_err}")

    print("KERNEL_OK")
</pallas_src>

<mosaic_0001>
module attributes {stable_mosaic.version = 11 : i64} {
  func.func @_matmul_bias_sigmoid_kernel(%arg0: i32, %arg1: i32, %arg2: memref<1x784x780xbf16, #tpu.memory_space<vmem>>, %arg3: memref<780x128xbf16, #tpu.memory_space<vmem>>, %arg4: memref<1x128xf32, #tpu.memory_space<vmem>>, %arg5: memref<1x784x128xf32, #tpu.memory_space<vmem>>) attributes {dimension_semantics = [#tpu.dimension_semantics<parallel>, #tpu.dimension_semantics<parallel>], iteration_bounds = array<i64: 2, 4>, scalar_prefetch = 0 : i64, scratch_operands = 0 : i64, tpu.core_type = #tpu.core_type<tc>, window_params = [{transform_indices = @transform_0, window_bounds = array<i64: 1, 784, 780>}, {pipeline_mode = #tpu.pipeline_mode<synchronous>, transform_indices = @transform_1, window_bounds = array<i64: 780, 128>}, {pipeline_mode = #tpu.pipeline_mode<synchronous>, transform_indices = @transform_2, window_bounds = array<i64: 1, 128>}, {transform_indices = @transform_3, window_bounds = array<i64: 1, 784, 128>}]} {
    %c0 = arith.constant 0 : index
    %c0_0 = arith.constant 0 : index
    %c0_1 = arith.constant 0 : index
    %0 = vector.load %arg2[%c0, %c0_0, %c0_1] : memref<1x784x780xbf16, #tpu.memory_space<vmem>>, vector<1x784x780xbf16>
    %1 = vector.shape_cast %0 : vector<1x784x780xbf16> to vector<784x780xbf16>
    %c0_2 = arith.constant 0 : index
    %c0_3 = arith.constant 0 : index
    %2 = vector.load %arg3[%c0_2, %c0_3] : memref<780x128xbf16, #tpu.memory_space<vmem>>, vector<780x128xbf16>
    %cst = arith.constant dense<0.000000e+00> : vector<784x128xf32>
    %3 = tpu.matmul %1, %2, %cst {dimension_numbers = #tpu.dot_dimension_numbers<[1], [0], [0], [1], [0, 0, 1, 1], [], []>} : vector<784x780xbf16>, vector<780x128xbf16>, vector<784x128xf32> -> vector<784x128xf32>
    %c0_4 = arith.constant 0 : index
    %c0_5 = arith.constant 0 : index
    %4 = vector.load %arg4[%c0_4, %c0_5] : memref<1x128xf32, #tpu.memory_space<vmem>>, vector<1x128xf32>
    %5 = vector.broadcast %4 : vector<1x128xf32> to vector<784x128xf32>
    %6 = arith.addf %3, %5 : vector<784x128xf32>
    %7 = arith.negf %6 : vector<784x128xf32>
    %8 = math.exp %7 : vector<784x128xf32>
    %cst_6 = arith.constant 1.000000e+00 : f32
    %9 = vector.broadcast %cst_6 : f32 to vector<784x128xf32>
    %10 = arith.addf %9, %8 : vector<784x128xf32>
    %11 = arith.divf %9, %10 : vector<784x128xf32>
    %c0_7 = arith.constant 0 : index
    %c0_8 = arith.constant 0 : index
    %c0_9 = arith.constant 0 : index
    %12 = vector.load %arg5[%c0_7, %c0_8, %c0_9] : memref<1x784x128xf32, #tpu.memory_space<vmem>>, vector<1x784x128xf32>
    %13 = vector.shape_cast %12 : vector<1x784x128xf32> to vector<784x128xf32>
    %14 = vector.shape_cast %11 : vector<784x128xf32> to vector<1x784x128xf32>
    tpu.vector_store %arg5[%c0_7, %c0_8, %c0_9], %14 {strides = array<i32>} : memref<1x784x128xf32, #tpu.memory_space<vmem>>, vector<1x784x128xf32>,
    return
  }
  func.func @transform_0(%arg0: i32, %arg1: i32) -> (i32, i32, i32) {
    %c0_i32 = arith.constant 0 : i32
    %c0_i32_0 = arith.constant 0 : i32
    return %arg0, %arg1, %c0_i32 : i32, i32, i32
  }
  func.func @transform_1(%arg0: i32, %arg1: i32) -> (i32, i32) {
    %c0_i32 = arith.constant 0 : i32
    %c0_i32_0 = arith.constant 0 : i32
    %c0_i32_1 = arith.constant 0 : i32
    return %c0_i32, %c0_i32_0 : i32, i32
  }
  func.func @transform_2(%arg0: i32, %arg1: i32) -> (i32, i32) {
    %c0_i32 = arith.constant 0 : i32
    %c0_i32_0 = arith.constant 0 : i32
    %c0_i32_1 = arith.constant 0 : i32
    return %c0_i32, %c0_i32_0 : i32, i32
  }
  func.func @transform_3(%arg0: i32, %arg1: i32) -> (i32, i32, i32) {
    %c0_i32 = arith.constant 0 : i32
    %c0_i32_0 = arith.constant 0 : i32
    return %arg0, %arg1, %c0_i32 : i32, i32, i32
  }
}

</mosaic_0001>

<bundles_post_ra>
// kernel: tpu_custom_call.1
= control target key start
LH: loop header
LB: loop body
LE: loop exit
PB: predicated region body
PF: predicated region fallthrough
CT: control target
= control target key end

     0   :  { %8 = vsyncpa [#allocation3], 0  ;;  %s8917_s0 = inlined_call_operand.vmem [shape: bf16[2,3136,780], index: 0, kind: input, shape index: {}]   ;;  %s8918_s1 = inlined_call_operand.vmem [shape: bf16[780,128], index: 1, kind: input, shape index: {}]   ;;  %s8919_s2 = inlined_call_operand.vmem [shape: f32[1,128], index: 2, kind: input, shape index: {}]   ;;  %s8920_s3 = inlined_call_operand.hbm [shape: f32[2,3136,128], index: 3, kind: output, shape index: {}]  }
   0x1   :  { %10 = vsyncpa [#allocation3 + $0x1], 0  ;;  %s7868_s12 = smov 0   ;;  %s7870_s13 = smov 0  }
   0x2   :  { %s7872_s14 = smov 0   ;;  %s7874_s15 = smov 0  }
   0x3   :  { %s7876_s16 = smov 0   ;;  %s7878_s17 = smov 0  }
   0x4   :  { %s7880_s18 = smov 0   ;;  %s7882_s19 = smov 0  }
   0x5 LB: > { %s5348_s20 = sadd.s32 4294967295, %s7840_s19   ;;  %s5349_s21 = sadd.s32 4294967294, %s7840_s19   ;;  %s7840_s19 = sphi %s7882_s19, %s16_s19   ;;  %s7836_s18 = sphi %s7880_s18, %s8929_s18   ;;  %s7832_s17 = sphi %s7878_s17, %s8928_s17   ;;  %s7828_s16 = sphi %s7876_s16, %s8927_s16   ;;  %s7824_s15 = sphi %s7874_s15, %s8926_s15   ;;  %s7820_s14 = sphi %s7872_s14, %s8925_s14   ;;  %s7816_s13 = sphi %s7870_s13, %s8924_s13   ;;  %s7812_s12 = sphi %s7868_s12, %s8923_s12  }
   0x6   : > { %s25_s22 = sadd.s32 1, %s7832_s17  ;;  %s28_s23 = sadd.s32 1, %s7836_s18 }
   0x7   : > { %p26_p0 = scmp.ge.s32.totalorder %s25_s22, 4  ;;  %p117_p1 = scmp.ne.s32.totalorder %s7820_s14, %s7816_s13 }
   0x8   : > { %p118_p2 = scmp.eq.s32.totalorder %s5348_s20, 7  ;;  %p123_p5 = scmp.ne.s32.totalorder %s7816_s13, %s7812_s12 }
   0x9   : > { %s8931_s22 = smov (%p26_p0, %s25_s22), 0  ;;  %s8933_s23 = smov (!%p26_p0, %s28_s23), %s7836_s18 }
   0xa   : > { %s103_s24 = ssub.s32 %s7832_s17, %s8931_s22  ;;  %p7919_p3 = por %p118_p2, %p117_p1 }
   0xb   : > { %p30_p4 = scmp.ge.s32.totalorder %s8933_s23, 2  ;;  %p124_p6 = scmp.eq.s32.totalorder %s5349_s21, 7 }
   0xc   : > { %p5352_p7 = scmp.ge.s32.totalorder %s7840_s19, 1  ;;  %p162_p9 = scmp.lt.s32.totalorder %s7840_s19, 9 }
   0xd   : > { %s8935_s23 = smov (%p30_p4, %s8933_s23), 0  ;;  %p7928_p8 = por %p124_p6, %p123_p5 }
   0xe   : > { %s102_s27 = ssub.s32 %s7836_s18, %s8935_s23  ;;  %s107_s28 = sadd.s32 1, %s7820_s14 }
   0xf   : > { %s104_s29 = sor.u32 %s103_s24, %s102_s27  ;;  %p163_p10 = pnand %p5352_p7, %p162_p9 }
  0x10   : > { %p105_p11 = scmp.eq.s32.totalorder %s104_s29, 0  ;;  %v6813_v0 = vld [vmem:[%s8918_s1] sm:$0xff] (!%p163_p10)   ;;  %v7842_v1 = vmov (!%p163_p10), 0   ;;  %v6815_v3 = vld [vmem:[%s8918_s1 + $0x8] sm:$0xff] (!%p163_p10)   ;;  %v6817_v5 = vld [vmem:[%s8918_s1 + $0x10] sm:$0xff] (!%p163_p10)   ;;  %p192_p12 = scmp.lt.s32.totalorder (!%p163_p10), %s7828_s16, 1 }
  0x11   : > { %166 = sbr.rel (%p163_p10) target bundleno = 1118 (0x45e), region = 32  ;;  %2861 = vmatprep.subr.bf16.mxu1 (!%p163_p10), %v7842_v1  ;;  %3711 = vmatprep.subr.bf16.mxu0 (!%p163_p10), %v7842_v1  ;;  %v6814_v2 = vld [vmem:[%s8918_s1 + $0x100] sm:$0xff] (!%p163_p10)   ;;  %v6816_v4 = vld [vmem:[%s8918_s1 + $0x108] sm:$0xff] (!%p163_p10)   ;;  %v6818_v6 = vld [vmem:[%s8918_s1 + $0x110] sm:$0xff] (!%p163_p10)   ;;  %vm2857_vm0 = vcmask (!%p163_p10), 1045504   ;;  %v7843_v40 = vmov (!%p163_p10), 0.0  }
  0x12   : > { %s7937_s30 = scalar_select %p105_p11, %s7820_s14, %s107_s28  }
  0x13   : > { %2862 = vmatpush1.bf16.msra.mxu1 (!%p163_p10), %v6813_v0  ;;  %3712 = vmatpush1.bf16.msra.mxu0 (!%p163_p10), %v6814_v2  ;;  %s7964_s28 = smul.u32 (!%p163_p10), 98, %s7824_s15  ;;  %v6819_v7 = vld [vmem:[%s8918_s1 + $0x18] sm:$0xff] (!%p163_p10)   ;;  %v6821_v9 = vld [vmem:[%s8918_s1 + $0x20] sm:$0xff] (!%p163_p10)   ;;  %v6823_v11 = vld [vmem:[%s8918_s1 + $0x28] sm:$0xff] (!%p163_p10)   ;;  %vm7844_vm1 = vmmov (!%p163_p10), 0   ;;  %vm2709_vm2 = vcmask (!%p163_p10), 97280  }
  0x14   : > { %2863 = vmatprep.subr.bf16.mxu1 (!%p163_p10), %v7842_v1  ;;  %3713 = vmatprep.subr.bf16.mxu0 (!%p163_p10), %v7842_v1  ;;  %v6820_v8 = vld [vmem:[%s8918_s1 + $0x118] sm:$0xff] (!%p163_p10)   ;;  %v6822_v10 = vld [vmem:[%s8918_s1 + $0x120] sm:$0xff] (!%p163_p10)   ;;  %v6824_v12 = vld [vmem:[%s8918_s1 + $0x128] sm:$0xff] (!%p163_p10)   ;;  %s188_s15 = sand.u32 (!%p163_p10), 1, %s7816_s13   ;;  %s6736_s20 = smul.u32 (!%p163_p10), 392, %s7828_s16 }
  0x15   : > { %p194_p13 = scmp.lt.s32.totalorder (!%p163_p10), %s7964_s28, 391  ;;  %v6825_v13 = vld [vmem:[%s8918_s1 + $0x30] sm:$0xff] (!%p163_p10)   ;;  %v6827_v15 = vld [vmem:[%s8918_s1 + $0x38] sm:$0xff] (!%p163_p10)   ;;  %v6829_v17 = vld [vmem:[%s8918_s1 + $0x40] sm:$0xff] (!%p163_p10)   ;;  %s6733_s7 = smul.u32 (!%p163_p10), 784, %s188_s15 }
  0x16   : > { %v6826_v14 = vld [vmem:[%s8918_s1 + $0x130] sm:$0xff] (!%p163_p10)   ;;  %v6828_v16 = vld [vmem:[%s8918_s1 + $0x138] sm:$0xff] (!%p163_p10)   ;;  %v6830_v18 = vld [vmem:[%s8918_s1 + $0x140] sm:$0xff] (!%p163_p10)  }
  0x17   : > { %2864 = vmatpush1.bf16.msra.mxu1 (!%p163_p10), %v6815_v3  ;;  %3714 = vmatpush1.bf16.msra.mxu0 (!%p163_p10), %v6816_v4  ;;  %v6831_v20 = vld [vmem:[%s8918_s1 + $0x48] sm:$0xff] (!%p163_p10)   ;;  %v6833_v23 = vld [vmem:[%s8918_s1 + $0x50] sm:$0xff] (!%p163_p10)   ;;  %v6835_v25 = vld [vmem:[%s8918_s1 + $0x58] sm:$0xff] (!%p163_p10)  }
  0x18   : > { %2865 = vmatprep.subr.bf16.mxu1 %v7842_v1  ;;  %3715 = vmatprep.subr.bf16.mxu0 %v7842_v1  ;;  %s193_s10 = scalar_select %p192_p12, %s7828_s16, 1  ;;  %v6832_v22 = vld [vmem:[%s8918_s1 + $0x148] sm:$0xff]   ;;  %v6834_v24 = vld [vmem:[%s8918_s1 + $0x150] sm:$0xff]   ;;  %v6836_v26 = vld [vmem:[%s8918_s1 + $0x158] sm:$0xff]  }
  0x19   : > { %s195_s11 = scalar_select %p194_p13, %s7964_s28, 391  ;;  %v6837_v27 = vld [vmem:[%s8918_s1 + $0x60] sm:$0xff]   ;;  %v6839_v29 = vld [vmem:[%s8918_s1 + $0x68] sm:$0xff]   ;;  %v6841_v31 = vld [vmem:[%s8918_s1 + $0x70] sm:$0xff]  }
  0x1a   : > { %s6735_s29 = smul.u32 2744, %s193_s10  ;;  %v6838_v28 = vld [vmem:[%s8918_s1 + $0x160] sm:$0xff]   ;;  %v6840_v30 = vld [vmem:[%s8918_s1 + $0x168] sm:$0xff]   ;;  %v6842_v32 = vld [vmem:[%s8918_s1 + $0x170] sm:$0xff]   ;;  %s8865_s16 = scalar_lea.sflag [#allocation3], %s188_s15 }
  0x1b   : > { %2866 = vmatpush1.bf16.msra.mxu1 %v6817_v5  ;;  %3716 = vmatpush1.bf16.msra.mxu0 %v6818_v6  ;;  %s6734_s4 = smul.u32 7, %s195_s11  ;;  %v6843_v33 = vld [vmem:[%s8918_s1 + $0x78] sm:$0xff]   ;;  %v6852_v35 = vld [vmem:[%s8918_s1 + $0x180] sm:$0x3f]   ;;  %v6871_v43 = vld [vmem:[%s8918_s1 + $0x88] sm:$0xff]  }
  0x1c   : > { %2867 = vmatprep.subr.bf16.mxu1 %v7842_v1  ;;  %3717 = vmatprep.subr.bf16.mxu0 %v7842_v1  ;;  %v6844_v34 = vld [vmem:[%s8918_s1 + $0x178] sm:$0xff]   ;;  %v6851_v38 = vld [vmem:[%s8918_s1 + $0x80] sm:$0xff]   ;;  %v2859_v41 = vsel %vm2857_vm0, %v6852_v35, 0  ;;  %v6890_v48 = vld [vmem:[%s8918_s1 + $0x90] sm:$0xff]  }
  0x1d   : > { %s198_s8 = sadd.s32 %s6735_s29, %s6734_s4  ;;  %v6909_v49 = vld [vmem:[%s8918_s1 + $0x98] sm:$0xff]   ;;  %v6928_v54 = vld [vmem:[%s8918_s1 + $0xa0] sm:$0xff]   ;;  %v6947_v55 = vld [vmem:[%s8918_s1 + $0xa8] sm:$0xff]  }
  0x1e   : > { %s5353_s21 = sshll.u32 %s198_s8, 2  ;;  %v6966_v60 = vld [vmem:[%s8918_s1 + $0xb0] sm:$0xff]   ;;  %v6985_v6 = vld [vmem:[%s8918_s1 + $0xb8] sm:$0xff]   ;;  %s8546_s8 = scalar_lea.vmem [#allocation2], %s6733_s7 }
  0x1f   : > { %2868 = vmatpush1.bf16.msra.mxu1 %v6819_v7  ;;  %3718 = vmatpush1.bf16.msra.mxu0 %v6820_v8  ;;  %s8016_s5 = scalar_lea.vmem %s8917_s0, %s5353_s21  ;;  %s5260_s21 = sadd.s32 %s6736_s20, %s7964_s28 }
  0x20   : > { %2869 = vmatprep.subr.bf16.mxu1 %v7842_v1  ;;  %3719 = vmatprep.subr.bf16.mxu0 %v7842_v1  ;;  %v6847_v19 = vld [vmem:[%s8016_s5 + $0x4] ss:$28 sps:$4 sm:$0xff]   ;;  %v6850_v21 = vld [vmem:[%s8016_s5 + $0x14] ss:$28 sps:$4 sm:$0xff]   ;;  %v6853_v39 = vld [vmem:[%s8016_s5 + $0x3c] ss:$28 sps:$4 sm:$0xff]  }
  0x21   : > { %2893 = vmatprep.mubr.bf16.mxu1 %v6847_v19  ;;  %3743 = vmatprep.mubr.bf16.mxu0 %v6850_v21  ;;  %v6845_v36 = vld [vmem:[%s8016_s5] ss:$28 sps:$4 sm:$0xff]   ;;  %v6848_v37 = vld [vmem:[%s8016_s5 + $0x10] ss:$28 sps:$4 sm:$0xff]   ;;  %v6857_v44 = vld [vmem:[%s8016_s5 + $0x38] ss:$28 sps:$4 sm:$0xff]  }
  0x22   : > { %v6855_v42 = vld [vmem:[%s8016_s5 + $0x4c] ss:$28 sps:$4 sm:$0xff]   ;;  %v6859_v46 = vld [vmem:[%s8016_s5 + $0x74] ss:$28 sps:$4 sm:$0xff]   ;;  %v6861_v47 = vld [vmem:[%s8016_s5 + $0x84] ss:$28 sps:$4 sm:$0xff]  }
  0x23   : > { %2870 = vmatpush1.bf16.msra.mxu1 %v6821_v9  ;;  %3720 = vmatpush1.bf16.msra.mxu0 %v6822_v10  ;;  %v6858_v45 = vld [vmem:[%s8016_s5 + $0x48] ss:$28 sps:$4 sm:$0xff]   ;;  %v6863_v50 = vld [vmem:[%s8016_s5 + $0x70] ss:$28 sps:$4 sm:$0xff]   ;;  %v6864_v51 = vld [vmem:[%s8016_s5 + $0x80] ss:$28 sps:$4 sm:$0xff]  }
  0x24   : > { %2871 = vmatprep.subr.bf16.mxu1 %v7842_v1  ;;  %3721 = vmatprep.subr.bf16.mxu0 %v7842_v1  ;;  %v6865_v52 = vld [vmem:[%s8016_s5 + $0xac] ss:$28 sps:$4 sm:$0xff]   ;;  %v6867_v53 = vld [vmem:[%s8016_s5 + $0xbc] ss:$28 sps:$4 sm:$0xff]   ;;  %v6872_v58 = vld [vmem:[%s8016_s5 + $0xe4] ss:$28 sps:$4 sm:$0xff]  }
  0x25   : > { %v6869_v56 = vld [vmem:[%s8016_s5 + $0xa8] ss:$28 sps:$4 sm:$0xff]   ;;  %v6870_v57 = vld [vmem:[%s8016_s5 + $0xb8] ss:$28 sps:$4 sm:$0xff]   ;;  %v6876_v61 = vld [vmem:[%s8016_s5 + $0xe0] ss:$28 sps:$4 sm:$0xff]  }
  0x26   : > { %v6874_v59 = vld [vmem:[%s8016_s5 + $0xf4] ss:$28 sps:$4 sm:$0xff]   ;;  %v6878_v63 = vld [vmem:[%s8016_s5 + $0x11c] ss:$28 sps:$4 sm:$0xff]   ;;  %v6880_v0 = vld [vmem:[%s8016_s5 + $0x12c] ss:$28 sps:$4 sm:$0xff]  }
  0x27   : > { %2872 = vmatpush1.bf16.msra.mxu1 %v6823_v11  ;;  %3722 = vmatpush1.bf16.msra.mxu0 %v6824_v12  ;;  %v6877_v62 = vld [vmem:[%s8016_s5 + $0xf0] ss:$28 sps:$4 sm:$0xff]   ;;  %v6882_v2 = vld [vmem:[%s8016_s5 + $0x118] ss:$28 sps:$4 sm:$0xff]   ;;  %v6883_v3 = vld [vmem:[%s8016_s5 + $0x128] ss:$28 sps:$4 sm:$0xff]  }
  0x28   : > { %2873 = vmatprep.subr.bf16.mxu1 %v7842_v1  ;;  %3723 = vmatprep.subr.bf16.mxu0 %v7842_v1  ;;  %v6884_v4 = vld [vmem:[%s8016_s5 + $0x154] ss:$28 sps:$4 sm:$0xff]   ;;  %v6886_v5 = vld [vmem:[%s8016_s5 + $0x164] ss:$28 sps:$4 sm:$0xff]   ;;  %v6891_v9 = vld [vmem:[%s8016_s5 + $0x18c] ss:$28 sps:$4 sm:$0xff]  }
  0x29   : > { %v6888_v7 = vld [vmem:[%s8016_s5 + $0x150] ss:$28 sps:$4 sm:$0xff]   ;;  %v6889_v8 = vld [vmem:[%s8016_s5 + $0x160] ss:$28 sps:$4 sm:$0xff]   ;;  %v6895_v11 = vld [vmem:[%s8016_s5 + $0x188] ss:$28 sps:$4 sm:$0xff]  }
  0x2a   : > { %v6893_v10 = vld [vmem:[%s8016_s5 + $0x19c] ss:$28 sps:$4 sm:$0xff]   ;;  %v7004_v19 = vld [vmem:[%s8918_s1 + $0xc0] sm:$0xff]   ;;  %s5894_s24 = sshll.u32 %s5260_s21, 7  ;;  %s5263_s27 = sshll.u32 %s8546_s8, 4  ;;  %s8859_s27 = int_to_ptr.vmem [resolvable:$true] %s5263_s27 }
  0x2b   : > { %2874 = vmatpush1.bf16.msra.mxu1 %v6825_v13  ;;  %3724 = vmatpush1.bf16.msra.mxu0 %v6826_v14  ;;  %v6896_v12 = vld [vmem:[%s8016_s5 + $0x198] ss:$28 sps:$4 sm:$0xff]   ;;  %v6897_v13 = vld [vmem:[%s8016_s5 + $0x1c4] ss:$28 sps:$4 sm:$0xff]   ;;  %s8857_s6 = scalar_lea.hbm %s8920_s3, %s5894_s24  ;;  %s7746_s28 = scalar_lea.vmem %s8859_s27, 12544 }
  0x2c   : > { %2875 = vmatprep.subr.bf16.mxu1 %v7842_v1  ;;  %3725 = vmatprep.subr.bf16.mxu0 %v7842_v1  ;;  %v6899_v14 = vld [vmem:[%s8016_s5 + $0x1d4] ss:$28 sps:$4 sm:$0xff]   ;;  %v6908_v21 = vld [vmem:[%s8016_s5 + $0x208] ss:$28 sps:$4 sm:$0xff]   ;;  %v6929_v35 = vld [vmem:[%s8016_s5 + $0x2dc] ss:$28 sps:$4 sm:$0xff]   ;;  %p7747_p0 = scmp.ne.s32.totalorder %s8859_s27, %s7746_s28 }
  0x2d   : > { %s7845_s7 = smov [#allocation2]  }
  0x2e   : > { %p7748_p1 = pnand %p7747_p0, %p7919_p3  ;;  %s7750_s9 = sshll.u32 %s7845_s7, 4  ;;  %s7751_s9 = int_to_ptr.vmem [resolvable:$false] %s7750_s9 }
  0x2f   : > { %2876 = vmatpush1.bf16.msra.mxu1 %v6827_v15  ;;  %3726 = vmatpush1.bf16.msra.mxu0 %v6828_v16  ;;  %v6901_v15 = vld [vmem:[%s8016_s5 + $0x1c0] ss:$28 sps:$4 sm:$0xff]   ;;  %v6902_v16 = vld [vmem:[%s8016_s5 + $0x1d0] ss:$28 sps:$4 sm:$0xff]   ;;  %s7752_s10 = scalar_lea.vmem %s7751_s9, 25088  ;;  %p7753_p4 = scmp.lt.s32.totalorder %s8859_s27, %s7751_s9 }
  0x30   : > { %2877 = vmatprep.subr.bf16.mxu1 %v7842_v1  ;;  %3727 = vmatprep.subr.bf16.mxu0 %v7842_v1  ;;  %p7749_p2 = pneg %p7748_p1  ;;  %p7754_p5 = scmp.lt.s32.totalorder %s7752_s10, %s7746_s28 }
  0x32   : > { %p7755_p6 = por %p7754_p5, %p7753_p4 }
  0x33   : > { %2878 = vmatpush1.bf16.msra.mxu1 %v6829_v17  ;;  %3728 = vmatpush1.bf16.msra.mxu0 %v6830_v18  ;;  %v6903_v17 = vld [vmem:[%s8016_s5 + $0x1fc] ss:$28 sps:$4 sm:$0xff]   ;;  %v6905_v18 = vld [vmem:[%s8016_s5 + $0x20c] ss:$28 sps:$4 sm:$0xff]  }
  0x34   : > { %2879 = vmatprep.subr.bf16.mxu1 %v7842_v1  ;;  %3729 = vmatprep.subr.bf16.mxu0 %v7842_v1  ;;  %p7756_p7 = pnand %p7755_p6, %p7749_p2 }
  0x37   : > { %2880 = vmatpush1.bf16.msra.mxu1 %v6831_v20  ;;  %3730 = vmatpush1.bf16.msra.mxu0 %v6832_v22  ;;  %v6907_v20 = vld [vmem:[%s8016_s5 + $0x1f8] ss:$28 sps:$4 sm:$0xff]  }
  0x38   : > { %2881 = vmatprep.subr.bf16.mxu1 %v7842_v1  ;;  %3731 = vmatprep.subr.bf16.mxu0 %v7842_v1  ;;  %v6910_v22 = vld [vmem:[%s8016_s5 + $0x234] ss:$28 sps:$4 sm:$0xff]  }
  0x3b   : > { %2882 = vmatpush1.bf16.msra.mxu1 %v6833_v23  ;;  %3732 = vmatpush1.bf16.msra.mxu0 %v6834_v24  ;;  %v6912_v23 = vld [vmem:[%s8016_s5 + $0x244] ss:$28 sps:$4 sm:$0xff]   ;;  %v6914_v24 = vld [vmem:[%s8016_s5 + $0x230] ss:$28 sps:$4 sm:$0xff]  }
  0x3c   : > { %2883 = vmatprep.subr.bf16.mxu1 %v7842_v1  ;;  %3733 = vmatprep.subr.bf16.mxu0 %v7842_v1 }
  0x3f   : > { %2884 = vmatpush1.bf16.msra.mxu1 %v6835_v25  ;;  %3734 = vmatpush1.bf16.msra.mxu0 %v6836_v26  ;;  %v6915_v25 = vld [vmem:[%s8016_s5 + $0x240] ss:$28 sps:$4 sm:$0xff]   ;;  %v6916_v26 = vld [vmem:[%s8016_s5 + $0x26c] ss:$28 sps:$4 sm:$0xff]  }
  0x40   : > { %2885 = vmatprep.subr.bf16.mxu1 %v7842_v1  ;;  %3735 = vmatprep.subr.bf16.mxu0 %v7842_v1 }
  0x43   : > { %2886 = vmatpush1.bf16.msra.mxu1 %v6837_v27  ;;  %3736 = vmatpush1.bf16.msra.mxu0 %v6838_v28  ;;  %v6918_v27 = vld [vmem:[%s8016_s5 + $0x27c] ss:$28 sps:$4 sm:$0xff]   ;;  %v6920_v28 = vld [vmem:[%s8016_s5 + $0x268] ss:$28 sps:$4 sm:$0xff]  }
  0x44   : > { %2887 = vmatprep.subr.bf16.mxu1 %v7842_v1  ;;  %3737 = vmatprep.subr.bf16.mxu0 %v7842_v1 }
  0x47   : > { %2888 = vmatpush1.bf16.msra.mxu1 %v6839_v29  ;;  %3738 = vmatpush1.bf16.msra.mxu0 %v6840_v30  ;;  %v6921_v29 = vld [vmem:[%s8016_s5 + $0x278] ss:$28 sps:$4 sm:$0xff]   ;;  %v6922_v30 = vld [vmem:[%s8016_s5 + $0x2a4] ss:$28 sps:$4 sm:$0xff]  }
  0x48   : > { %2889 = vmatprep.subr.bf16.mxu1 %v7842_v1  ;;  %3739 = vmatprep.subr.bf16.mxu0 %v7842_v1 }
  0x4b   : > { %2890 = vmatpush1.bf16.msra.mxu1 %v6841_v31  ;;  %3740 = vmatpush1.bf16.msra.mxu0 %v6842_v32  ;;  %v6924_v31 = vld [vmem:[%s8016_s5 + $0x2b4] ss:$28 sps:$4 sm:$0xff]   ;;  %v7023_v32 = vld [vmem:[%s8918_s1 + $0xc8] sm:$0xff]  }
  0x4c   : > { %2891 = vmatprep.subr.bf16.mxu1 %v7842_v1  ;;  %3741 = vmatprep.subr.bf16.mxu0 %v7842_v1 }
  0x4f   : > { %2892 = vmatpush1.bf16.msra.mxu1 %v6843_v33  ;;  %3742 = vmatpush1.bf16.msra.mxu0 %v6844_v34  ;;  %v6926_v33 = vld [vmem:[%s8016_s5 + $0x2a0] ss:$28 sps:$4 sm:$0xff]   ;;  %v6927_v34 = vld [vmem:[%s8016_s5 + $0x2b0] ss:$28 sps:$4 sm:$0xff]  }
  0x50   : > { %3286 = vmatprep.subr.bf16.mxu1 %v7842_v1  ;;  %5947 = vmatprep.subr.bf16.mxu0 %v7843_v40 }
  0x52   : > { %2894 = vmatmul.mubr.bf16.vlgmr.msra.gmra.mrb[0].mxu1 %v6845_v36  ;;  %3744 = vmatmul.mubr.bf16.vlgmr.msra.gmra.mrb[0].mxu0 %v6848_v37  ;;  %v6931_v36 = vld [vmem:[%s8016_s5 + $0x2ec] ss:$28 sps:$4 sm:$0xff]   ;;  %v6933_v37 = vld [vmem:[%s8016_s5 + $0x2d8] ss:$28 sps:$4 sm:$0xff]  }
  0x53   : > { %3287 = vmatpush1.bf16.msra.mxu1 %v6851_v38  ;;  %5948 = vmatpush3.bf16.msra.mxu0 %v2859_v41  ;;  %v6934_v38 = vld [vmem:[%s8016_s5 + $0x2e8] ss:$28 sps:$4 sm:$0xff]  }
  0x54   : > { %2901 = vmatprep.mubr.bf16.mxu1 %v6853_v39  ;;  %3751 = vmatprep.mubr.bf16.mxu0 %v6855_v42  ;;  %v6935_v39 = vld [vmem:[%s8016_s5 + $0x314] ss:$28 sps:$4 sm:$0xff]   ;;  %v6937_v41 = vld [vmem:[%s8016_s5 + $0x324] ss:$28 sps:$4 sm:$0xff]  }
  0x55   : > { %3288 = vmatprep.subr.bf16.mxu1 %v7842_v1  ;;  %v6939_v42 = vld [vmem:[%s8016_s5 + $0x310] ss:$28 sps:$4 sm:$0xff]  }
  0x57   : > { %3289 = vmatpush1.bf16.msra.mxu1 %v6871_v43  ;;  %v6940_v43 = vld [vmem:[%s8016_s5 + $0x320] ss:$28 sps:$4 sm:$0xff]  }
  0x58   : > { %3290 = vmatprep.subr.bf16.mxu1 %v7842_v1 }
  0x5a   : > { %2902 = vmatmul.mubr.bf16.gmra.mrb[4].mxu1 %v6857_v44  ;;  %3752 = vmatmul.mubr.bf16.gmra.mrb[4].mxu0 %v6858_v45  ;;  %v6941_v44 = vld [vmem:[%s8016_s5 + $0x34c] ss:$28 sps:$4 sm:$0xff]   ;;  %v6943_v45 = vld [vmem:[%s8016_s5 + $0x35c] ss:$28 sps:$4 sm:$0xff]  }
  0x5b   : > { %2909 = vmatprep.mubr.bf16.mxu1 %v6859_v46  ;;  %3759 = vmatprep.mubr.bf16.mxu0 %v6861_v47  ;;  %v7042_v46 = vld [vmem:[%s8918_s1 + $0xd0] sm:$0xff]   ;;  %v6945_v47 = vld [vmem:[%s8016_s5 + $0x348] ss:$28 sps:$4 sm:$0xff]  }
  0x5c   : > { %3291 = vmatpush1.bf16.msra.mxu1 %v6890_v48  ;;  %v6946_v48 = vld [vmem:[%s8016_s5 + $0x358] ss:$28 sps:$4 sm:$0xff]  }
  0x5d   : > { %3292 = vmatprep.subr.bf16.mxu1 %v7842_v1 }
  0x60   : > { %3293 = vmatpush1.bf16.msra.mxu1 %v6909_v49  ;;  %v6948_v49 = vld [vmem:[%s8016_s5 + $0x384] ss:$28 sps:$4 sm:$0xff]  }
  0x61   : > { %3294 = vmatprep.subr.bf16.mxu1 %v7842_v1 }
  0x62   : > { %2910 = vmatmul.mubr.bf16.gmra.mrb[8].mxu1 %v6863_v50  ;;  %3760 = vmatmul.mubr.bf16.gmra.mrb[8].mxu0 %v6864_v51  ;;  %v6950_v50 = vld [vmem:[%s8016_s5 + $0x394] ss:$28 sps:$4 sm:$0xff]   ;;  %v6952_v51 = vld [vmem:[%s8016_s5 + $0x380] ss:$28 sps:$4 sm:$0xff]  }
  0x63   : > { %2917 = vmatprep.mubr.bf16.mxu1 %v6865_v52  ;;  %3767 = vmatprep.mubr.bf16.mxu0 %v6867_v53  ;;  %v6953_v52 = vld [vmem:[%s8016_s5 + $0x390] ss:$28 sps:$4 sm:$0xff]   ;;  %v6954_v53 = vld [vmem:[%s8016_s5 + $0x3bc] ss:$28 sps:$4 sm:$0xff]  }
  0x64   : > { %3295 = vmatpush1.bf16.msra.mxu1 %v6928_v54  ;;  %v6956_v54 = vld [vmem:[%s8016_s5 + $0x3cc] ss:$28 sps:$4 sm:$0xff]  }
  0x65   : > { %3296 = vmatprep.subr.bf16.mxu1 %v7842_v1 }
  0x68   : > { %3297 = vmatpush1.bf16.msra.mxu1 %v6947_v55  ;;  %v6958_v55 = vld [vmem:[%s8016_s5 + $0x3b8] ss:$28 sps:$4 sm:$0xff]  }
  0x69   : > { %3298 = vmatprep.subr.bf16.mxu1 %v7842_v1 }
  0x6a   : > { %2918 = vmatmul.mubr.bf16.gmra.mrb[12].mxu1 %v6869_v56  ;;  %3768 = vmatmul.mubr.bf16.gmra.mrb[12].mxu0 %v6870_v57  ;;  %v6959_v56 = vld [vmem:[%s8016_s5 + $0x3c8] ss:$28 sps:$4 sm:$0xff]   ;;  %v6960_v57 = vld [vmem:[%s8016_s5 + $0x3f4] ss:$28 sps:$4 sm:$0xff]  }
  0x6b   : > { %2925 = vmatprep.mubr.bf16.mxu1 %v6872_v58  ;;  %3775 = vmatprep.mubr.bf16.mxu0 %v6874_v59  ;;  %v6962_v58 = vld [vmem:[%s8016_s5 + $0x404] ss:$28 sps:$4 sm:$0xff]   ;;  %v7063_v59 = vld [vmem:[%s8918_s1 + $0xd8] sm:$0xff]  }
  0x6c   : > { %3299 = vmatpush1.bf16.msra.mxu1 %v6966_v60  ;;  %v6964_v60 = vld [vmem:[%s8016_s5 + $0x3f0] ss:$28 sps:$4 sm:$0xff]  }
  0x6d   : > { %3300 = vmatprep.subr.bf16.mxu1 %v7842_v1 }
  0x70   : > { %3301 = vmatpush1.bf16.msra.mxu1 %v6985_v6  ;;  %v6978_v6 = vld [vmem:[%s8016_s5 + $0x470] ss:$28 sps:$4 sm:$0xff]  }
  0x71   : > { %3302 = vmatprep.subr.bf16.mxu1 %v7842_v1 }
  0x72   : > { %2926 = vmatmul.mubr.bf16.gmra.mrb[16].mxu1 %v6876_v61  ;;  %3776 = vmatmul.mubr.bf16.gmra.mrb[16].mxu0 %v6877_v62  ;;  %v6965_v61 = vld [vmem:[%s8016_s5 + $0x400] ss:$28 sps:$4 sm:$0xff]   ;;  %v6967_v62 = vld [vmem:[%s8016_s5 + $0x42c] ss:$28 sps:$4 sm:$0xff]  }
  0x73   : > { %2933 = vmatprep.mubr.bf16.mxu1 %v6878_v63  ;;  %3783 = vmatprep.mubr.bf16.mxu0 %v6880_v0  ;;  %v6969_v63 = vld [vmem:[%s8016_s5 + $0x43c] ss:$28 sps:$4 sm:$0xff]   ;;  %v6971_v0 = vld [vmem:[%s8016_s5 + $0x428] ss:$28 sps:$4 sm:$0xff]  }
  0x74   : > { %3303 = vmatpush1.bf16.msra.mxu1 %v7004_v19  ;;  %v6997_v19 = vld [vmem:[%s8016_s5 + $0x518] ss:$28 sps:$4 sm:$0xff]  }
  0x75   : > { %3304 = vmatprep.subr.bf16.mxu1 %v7842_v1 }
  0x78   : > { %3305 = vmatpush1.bf16.msra.mxu1 %v7023_v32  ;;  %v7016_v32 = vld [vmem:[%s8016_s5 + $0x5c0] ss:$28 sps:$4 sm:$0xff]  }
  0x79   : > { %3306 = vmatprep.subr.bf16.mxu1 %v7842_v1 }
  0x7a   : > { %2934 = vmatmul.mubr.bf16.gmra.mrb[20].mxu1 %v6882_v2  ;;  %3784 = vmatmul.mubr.bf16.gmra.mrb[20].mxu0 %v6883_v3  ;;  %v6972_v2 = vld [vmem:[%s8016_s5 + $0x438] ss:$28 sps:$4 sm:$0xff]   ;;  %v6973_v3 = vld [vmem:[%s8016_s5 + $0x464] ss:$28 sps:$4 sm:$0xff]  }
  0x7b   : > { %2941 = vmatprep.mubr.bf16.mxu1 %v6884_v4  ;;  %3791 = vmatprep.mubr.bf16.mxu0 %v6886_v5  ;;  %v6975_v4 = vld [vmem:[%s8016_s5 + $0x474] ss:$28 sps:$4 sm:$0xff]   ;;  %v6977_v5 = vld [vmem:[%s8016_s5 + $0x460] ss:$28 sps:$4 sm:$0xff]  }
  0x7c   : > { %3307 = vmatpush1.bf16.msra.mxu1 %v7042_v46  ;;  %v7035_v46 = vld [vmem:[%s8016_s5 + $0x668] ss:$28 sps:$4 sm:$0xff]  }
  0x7d   : > { %3308 = vmatprep.subr.bf16.mxu1 %v7842_v1 }
  0x80   : > { %3309 = vmatpush1.bf16.msra.mxu1 %v7063_v59  ;;  %v7055_v59 = vld [vmem:[%s8016_s5 + $0x73c] ss:$28 sps:$4 sm:$0xff]  }
  0x81   : > { %3310 = vmatprep.subr.bf16.mxu1 %v7842_v1 }
  0x82   : > { %2942 = vmatmul.mubr.bf16.gmra.mrb[24].mxu1 %v6888_v7  ;;  %3792 = vmatmul.mubr.bf16.gmra.mrb[24].mxu0 %v6889_v8  ;;  %v6979_v7 = vld [vmem:[%s8016_s5 + $0x49c] ss:$28 sps:$4 sm:$0xff]   ;;  %v6981_v8 = vld [vmem:[%s8016_s5 + $0x4ac] ss:$28 sps:$4 sm:$0xff]  }
  0x83   : > { %2949 = vmatprep.mubr.bf16.mxu1 %v6891_v9  ;;  %3799 = vmatprep.mubr.bf16.mxu0 %v6893_v10  ;;  %v7082_v9 = vld [vmem:[%s8918_s1 + $0xe0] sm:$0xff]   ;;  %v6983_v10 = vld [vmem:[%s8016_s5 + $0x498] ss:$28 sps:$4 sm:$0xff]  }
  0x84   : > { %3311 = vmatpush1.bf16.msra.mxu1 %v7082_v9  ;;  %v7076_v9 = vld [vmem:[%s8016_s5 + $0x7f4] ss:$28 sps:$4 sm:$0xff]  }
  0x85   : > { %3312 = vmatprep.subr.bf16.mxu1 %v7842_v1 }
  0x8a   : > { %2950 = vmatmul.mubr.bf16.gmra.mrb[28].mxu1 %v6895_v11  ;;  %3800 = vmatmul.mubr.bf16.gmra.mrb[28].mxu0 %v6896_v12  ;;  %v6984_v11 = vld [vmem:[%s8016_s5 + $0x4a8] ss:$28 sps:$4 sm:$0xff]   ;;  %v6986_v12 = vld [vmem:[%s8016_s5 + $0x4d4] ss:$28 sps:$4 sm:$0xff]  }
  0x8b   : > { %2957 = vmatprep.mubr.bf16.mxu1 %v6897_v13  ;;  %3807 = vmatprep.mubr.bf16.mxu0 %v6899_v14  ;;  %v6988_v13 = vld [vmem:[%s8016_s5 + $0x4e4] ss:$28 sps:$4 sm:$0xff]   ;;  %v6990_v14 = vld [vmem:[%s8016_s5 + $0x4d0] ss:$28 sps:$4 sm:$0xff]  }
  0x92   : > { %2958 = vmatmul.mubr.bf16.gmra.mrb[32].mxu1 %v6901_v15  ;;  %3808 = vmatmul.mubr.bf16.gmra.mrb[32].mxu0 %v6902_v16  ;;  %v6991_v15 = vld [vmem:[%s8016_s5 + $0x4e0] ss:$28 sps:$4 sm:$0xff]   ;;  %v6992_v16 = vld [vmem:[%s8016_s5 + $0x50c] ss:$28 sps:$4 sm:$0xff]  }
  0x93   : > { %2965 = vmatprep.mubr.bf16.mxu1 %v6903_v17  ;;  %3815 = vmatprep.mubr.bf16.mxu0 %v6905_v18  ;;  %v6994_v17 = vld [vmem:[%s8016_s5 + $0x51c] ss:$28 sps:$4 sm:$0xff]   ;;  %v6996_v18 = vld [vmem:[%s8016_s5 + $0x508] ss:$28 sps:$4 sm:$0xff]  }
  0x9a   : > { %2966 = vmatmul.mubr.bf16.gmra.mrb[36].mxu1 %v6907_v20  ;;  %3816 = vmatmul.mubr.bf16.gmra.mrb[36].mxu0 %v6908_v21  ;;  %v6998_v20 = vld [vmem:[%s8016_s5 + $0x544] ss:$28 sps:$4 sm:$0xff]   ;;  %v7000_v21 = vld [vmem:[%s8016_s5 + $0x554] ss:$28 sps:$4 sm:$0xff]  }
  0x9b   : > { %2973 = vmatprep.mubr.bf16.mxu1 %v6910_v22  ;;  %3823 = vmatprep.mubr.bf16.mxu0 %v6912_v23  ;;  %v7002_v22 = vld [vmem:[%s8016_s5 + $0x540] ss:$28 sps:$4 sm:$0xff]   ;;  %v7003_v23 = vld [vmem:[%s8016_s5 + $0x550] ss:$28 sps:$4 sm:$0xff]  }
  0xa2   : > { %2974 = vmatmul.mubr.bf16.gmra.mrb[40].mxu1 %v6914_v24  ;;  %3824 = vmatmul.mubr.bf16.gmra.mrb[40].mxu0 %v6915_v25  ;;  %v7005_v24 = vld [vmem:[%s8016_s5 + $0x57c] ss:$28 sps:$4 sm:$0xff]   ;;  %v7007_v25 = vld [vmem:[%s8016_s5 + $0x58c] ss:$28 sps:$4 sm:$0xff]  }
  0xa3   : > { %2981 = vmatprep.mubr.bf16.mxu1 %v6916_v26  ;;  %3831 = vmatprep.mubr.bf16.mxu0 %v6918_v27  ;;  %v7104_v26 = vld [vmem:[%s8918_s1 + $0xe8] sm:$0xff]   ;;  %v7009_v27 = vld [vmem:[%s8016_s5 + $0x578] ss:$28 sps:$4 sm:$0xff]  }
  0xa4   : > { %3313 = vmatpush1.bf16.msra.mxu1 %v7104_v26  ;;  %v7103_v26 = vld [vmem:[%s8016_s5 + $0x8c0] ss:$28 sps:$4 sm:$0xff]  }
  0xa5   : > { %3314 = vmatprep.subr.bf16.mxu1 %v7842_v1 }
  0xaa   : > { %2982 = vmatmul.mubr.bf16.gmra.mrb[44].mxu1 %v6920_v28  ;;  %3832 = vmatmul.mubr.bf16.gmra.mrb[44].mxu0 %v6921_v29  ;;  %v7010_v28 = vld [vmem:[%s8016_s5 + $0x588] ss:$28 sps:$4 sm:$0xff]   ;;  %v7011_v29 = vld [vmem:[%s8016_s5 + $0x5b4] ss:$28 sps:$4 sm:$0xff]  }
  0xab   : > { %2989 = vmatprep.mubr.bf16.mxu1 %v6922_v30  ;;  %3839 = vmatprep.mubr.bf16.mxu0 %v6924_v31  ;;  %v7013_v30 = vld [vmem:[%s8016_s5 + $0x5c4] ss:$28 sps:$4 sm:$0xff]   ;;  %v7015_v31 = vld [vmem:[%s8016_s5 + $0x5b0] ss:$28 sps:$4 sm:$0xff]  }
  0xb2   : > { %2990 = vmatmul.mubr.bf16.gmra.mrb[48].mxu1 %v6926_v33  ;;  %3840 = vmatmul.mubr.bf16.gmra.mrb[48].mxu0 %v6927_v34  ;;  %v7017_v33 = vld [vmem:[%s8016_s5 + $0x5ec] ss:$28 sps:$4 sm:$0xff]   ;;  %v7019_v34 = vld [vmem:[%s8016_s5 + $0x5fc] ss:$28 sps:$4 sm:$0xff]  }
  0xb3   : > { %2997 = vmatprep.mubr.bf16.mxu1 %v6929_v35  ;;  %3847 = vmatprep.mubr.bf16.mxu0 %v6931_v36  ;;  %v7021_v35 = vld [vmem:[%s8016_s5 + $0x5e8] ss:$28 sps:$4 sm:$0xff]   ;;  %v7022_v36 = vld [vmem:[%s8016_s5 + $0x5f8] ss:$28 sps:$4 sm:$0xff]  }
  0xba   : > { %2998 = vmatmul.mubr.bf16.gmra.mrb[52].mxu1 %v6933_v37  ;;  %3848 = vmatmul.mubr.bf16.gmra.mrb[52].mxu0 %v6934_v38  ;;  %v7024_v37 = vld [vmem:[%s8016_s5 + $0x624] ss:$28 sps:$4 sm:$0xff]   ;;  %v7026_v38 = vld [vmem:[%s8016_s5 + $0x634] ss:$28 sps:$4 sm:$0xff]  }
  0xbb   : > { %3005 = vmatprep.mubr.bf16.mxu1 %v6935_v39  ;;  %3855 = vmatprep.mubr.bf16.mxu0 %v6937_v41  ;;  %v7123_v39 = vld [vmem:[%s8918_s1 + $0xf0] sm:$0xff]   ;;  %v7028_v41 = vld [vmem:[%s8016_s5 + $0x620] ss:$28 sps:$4 sm:$0xff]  }
  0xbc   : > { %3315 = vmatpush1.bf16.msra.mxu1 %v7123_v39  ;;  %v7124_v39 = vld [vmem:[%s8016_s5 + $0x978] ss:$28 sps:$4 sm:$0xff]  }
  0xbd   : > { %3316 = vmatprep.subr.bf16.mxu1 %v7842_v1  ;;  %v7040_v1 = vld [vmem:[%s8016_s5 + $0x690] ss:$28 sps:$4 sm:$0xff]  }
  0xc2   : > { %3006 = vmatmul.mubr.bf16.gmra.mrb[56].mxu1 %v6939_v42  ;;  %3856 = vmatmul.mubr.bf16.gmra.mrb[56].mxu0 %v6940_v43  ;;  %v7029_v42 = vld [vmem:[%s8016_s5 + $0x630] ss:$28 sps:$4 sm:$0xff]   ;;  %v7030_v43 = vld [vmem:[%s8016_s5 + $0x65c] ss:$28 sps:$4 sm:$0xff]  }
  0xc3   : > { %3013 = vmatprep.mubr.bf16.mxu1 %v6941_v44  ;;  %3863 = vmatprep.mubr.bf16.mxu0 %v6943_v45  ;;  %v7032_v44 = vld [vmem:[%s8016_s5 + $0x66c] ss:$28 sps:$4 sm:$0xff]   ;;  %v7034_v45 = vld [vmem:[%s8016_s5 + $0x658] ss:$28 sps:$4 sm:$0xff]  }
  0xca   : > { %3014 = vmatmul.mubr.bf16.gmra.mrb[60].mxu1 %v6945_v47  ;;  %3864 = vmatmul.mubr.bf16.gmra.mrb[60].mxu0 %v6946_v48  ;;  %v7036_v47 = vld [vmem:[%s8016_s5 + $0x694] ss:$28 sps:$4 sm:$0xff]   ;;  %v7038_v48 = vld [vmem:[%s8016_s5 + $0x6a4] ss:$28 sps:$4 sm:$0xff]  }
  0xcb   : > { %3021 = vmatprep.mubr.bf16.mxu1 %v6948_v49  ;;  %3871 = vmatprep.mubr.bf16.mxu0 %v6950_v50  ;;  %v7041_v49 = vld [vmem:[%s8016_s5 + $0x6a0] ss:$28 sps:$4 sm:$0xff]   ;;  %v7043_v50 = vld [vmem:[%s8016_s5 + $0x6cc] ss:$28 sps:$4 sm:$0xff]  }
  0xd2   : > { %3022 = vmatmul.mubr.bf16.gmra.mrb[64].mxu1 %v6952_v51  ;;  %3872 = vmatmul.mubr.bf16.gmra.mrb[64].mxu0 %v6953_v52  ;;  %v7045_v51 = vld [vmem:[%s8016_s5 + $0x6dc] ss:$28 sps:$4 sm:$0xff]  }
  0xd3   : > { %3029 = vmatprep.mubr.bf16.mxu1 %v6954_v53  ;;  %3879 = vmatprep.mubr.bf16.mxu0 %v6956_v54  ;;  %v7143_v52 = vld [vmem:[%s8918_s1 + $0xf8] sm:$0xff]   ;;  %v7047_v53 = vld [vmem:[%s8016_s5 + $0x6c8] ss:$28 sps:$4 sm:$0xff]  }
  0xd4   : > { %3317 = vmatpush1.bf16.msra.mxu1 %v7143_v52  ;;  %v7048_v54 = vld [vmem:[%s8016_s5 + $0x6d8] ss:$28 sps:$4 sm:$0xff]   ;;  %v7144_v52 = vld [vmem:[%s8016_s5 + $0xa4c] ss:$28 sps:$4 sm:$0xff]  }
  0xda   : > { %3030 = vmatmul.mubr.bf16.gmra.mrb[68].mxu1 %v6958_v55  ;;  %3880 = vmatmul.mubr.bf16.gmra.mrb[68].mxu0 %v6959_v56  ;;  %v7049_v55 = vld [vmem:[%s8016_s5 + $0x704] ss:$28 sps:$4 sm:$0xff]   ;;  %v7051_v56 = vld [vmem:[%s8016_s5 + $0x714] ss:$28 sps:$4 sm:$0xff]  }
  0xdb   : > { %3037 = vmatprep.mubr.bf16.mxu1 %v6960_v57  ;;  %3887 = vmatprep.mubr.bf16.mxu0 %v6962_v58  ;;  %v7053_v57 = vld [vmem:[%s8016_s5 + $0x700] ss:$28 sps:$4 sm:$0xff]   ;;  %v7054_v58 = vld [vmem:[%s8016_s5 + $0x710] ss:$28 sps:$4 sm:$0xff]  }
  0xe2   : > { %3038 = vmatmul.mubr.bf16.gmra.mrb[72].mxu1 %v6964_v60  ;;  %3888 = vmatmul.mubr.bf16.gmra.mrb[72].mxu0 %v6965_v61  ;;  %v7057_v60 = vld [vmem:[%s8016_s5 + $0x74c] ss:$28 sps:$4 sm:$0xff]   ;;  %v7059_v61 = vld [vmem:[%s8016_s5 + $0x738] ss:$28 sps:$4 sm:$0xff]  }
  0xe3   : > { %3045 = vmatprep.mubr.bf16.mxu1 %v6967_v62  ;;  %3895 = vmatprep.mubr.bf16.mxu0 %v6969_v63  ;;  %v7060_v62 = vld [vmem:[%s8016_s5 + $0x748] ss:$28 sps:$4 sm:$0xff]   ;;  %v7061_v63 = vld [vmem:[%s8016_s5 + $0x774] ss:$28 sps:$4 sm:$0xff]  }
  0xea   : > { %3046 = vmatmul.mubr.bf16.gmra.mrb[76].mxu1 %v6971_v0  ;;  %3896 = vmatmul.mubr.bf16.gmra.mrb[76].mxu0 %v6972_v2  ;;  %v7064_v0 = vld [vmem:[%s8016_s5 + $0x784] ss:$28 sps:$4 sm:$0xff]   ;;  %v7066_v2 = vld [vmem:[%s8016_s5 + $0x770] ss:$28 sps:$4 sm:$0xff]  }
  0xeb   : > { %3053 = vmatprep.mubr.bf16.mxu1 %v6973_v3  ;;  %3903 = vmatprep.mubr.bf16.mxu0 %v6975_v4  ;;  %v7067_v3 = vld [vmem:[%s8016_s5 + $0x780] ss:$28 sps:$4 sm:$0xff]   ;;  %v7068_v4 = vld [vmem:[%s8016_s5 + $0x7ac] ss:$28 sps:$4 sm:$0xff]  }
  0xf2   : > { %3054 = vmatmul.mubr.bf16.gmra.mrb[80].mxu1 %v6977_v5  ;;  %3904 = vmatmul.mubr.bf16.gmra.mrb[80].mxu0 %v6978_v6  ;;  %v7070_v5 = vld [vmem:[%s8016_s5 + $0x7bc] ss:$28 sps:$4 sm:$0xff]   ;;  %v7072_v6 = vld [vmem:[%s8016_s5 + $0x7a8] ss:$28 sps:$4 sm:$0xff]  }
  0xf3   : > { %3061 = vmatprep.mubr.bf16.mxu1 %v6979_v7  ;;  %3911 = vmatprep.mubr.bf16.mxu0 %v6981_v8  ;;  %v7073_v7 = vld [vmem:[%s8016_s5 + $0x7b8] ss:$28 sps:$4 sm:$0xff]   ;;  %v7074_v8 = vld [vmem:[%s8016_s5 + $0x7e4] ss:$28 sps:$4 sm:$0xff]  }
  0xfa   : > { %3062 = vmatmul.mubr.bf16.gmra.mrb[84].mxu1 %v6983_v10  ;;  %3912 = vmatmul.mubr.bf16.gmra.mrb[84].mxu0 %v6984_v11  ;;  %v7078_v10 = vld [vmem:[%s8016_s5 + $0x7e0] ss:$28 sps:$4 sm:$0xff]   ;;  %v7079_v11 = vld [vmem:[%s8016_s5 + $0x7f0] ss:$28 sps:$4 sm:$0xff]  }
  0xfb   : > { %3069 = vmatprep.mubr.bf16.mxu1 %v6986_v12  ;;  %3919 = vmatprep.mubr.bf16.mxu0 %v6988_v13  ;;  %v7080_v12 = vld [vmem:[%s8016_s5 + $0x81c] ss:$28 sps:$4 sm:$0xff]   ;;  %v7083_v13 = vld [vmem:[%s8016_s5 + $0x82c] ss:$28 sps:$4 sm:$0xff]  }
 0x102   : > { %3070 = vmatmul.mubr.bf16.gmra.mrb[88].mxu1 %v6990_v14  ;;  %3920 = vmatmul.mubr.bf16.gmra.mrb[88].mxu0 %v6991_v15  ;;  %v7085_v14 = vld [vmem:[%s8016_s5 + $0x818] ss:$28 sps:$4 sm:$0xff]   ;;  %v7086_v15 = vld [vmem:[%s8016_s5 + $0x828] ss:$28 sps:$4 sm:$0xff]  }
 0x103   : > { %3077 = vmatprep.mubr.bf16.mxu1 %v6992_v16  ;;  %3927 = vmatprep.mubr.bf16.mxu0 %v6994_v17  ;;  %v7087_v16 = vld [vmem:[%s8016_s5 + $0x854] ss:$28 sps:$4 sm:$0xff]   ;;  %v7089_v17 = vld [vmem:[%s8016_s5 + $0x864] ss:$28 sps:$4 sm:$0xff]  }
 0x10a   : > { %3078 = vmatmul.mubr.bf16.gmra.mrb[92].mxu1 %v6996_v18  ;;  %3928 = vmatmul.mubr.bf16.gmra.mrb[92].mxu0 %v6997_v19  ;;  %v7091_v18 = vld [vmem:[%s8016_s5 + $0x850] ss:$28 sps:$4 sm:$0xff]   ;;  %v7092_v19 = vld [vmem:[%s8016_s5 + $0x860] ss:$28 sps:$4 sm:$0xff]  }
 0x10b   : > { %3085 = vmatprep.mubr.bf16.mxu1 %v6998_v20  ;;  %3935 = vmatprep.mubr.bf16.mxu0 %v7000_v21  ;;  %v7093_v20 = vld [vmem:[%s8016_s5 + $0x88c] ss:$28 sps:$4 sm:$0xff]   ;;  %v7095_v21 = vld [vmem:[%s8016_s5 + $0x89c] ss:$28 sps:$4 sm:$0xff]  }
 0x112   : > { %3086 = vmatmul.mubr.bf16.gmra.mrb[96].mxu1 %v7002_v22  ;;  %3936 = vmatmul.mubr.bf16.gmra.mrb[96].mxu0 %v7003_v23  ;;  %v7097_v22 = vld [vmem:[%s8016_s5 + $0x888] ss:$28 sps:$4 sm:$0xff]   ;;  %v7098_v23 = vld [vmem:[%s8016_s5 + $0x898] ss:$28 sps:$4 sm:$0xff]  }
 0x113   : > { %3093 = vmatprep.mubr.bf16.mxu1 %v7005_v24  ;;  %3943 = vmatprep.mubr.bf16.mxu0 %v7007_v25  ;;  %v7099_v24 = vld [vmem:[%s8016_s5 + $0x8c4] ss:$28 sps:$4 sm:$0xff]   ;;  %v7101_v25 = vld [vmem:[%s8016_s5 + $0x8d4] ss:$28 sps:$4 sm:$0xff]  }
 0x11a   : > { %3094 = vmatmul.mubr.bf16.gmra.mrb[100].mxu1 %v7009_v27  ;;  %3944 = vmatmul.mubr.bf16.gmra.mrb[100].mxu0 %v7010_v28  ;;  %v7105_v27 = vld [vmem:[%s8016_s5 + $0x8d0] ss:$28 sps:$4 sm:$0xff]   ;;  %v7106_v28 = vld [vmem:[%s8016_s5 + $0x8fc] ss:$28 sps:$4 sm:$0xff]  }
 0x11b   : > { %3101 = vmatprep.mubr.bf16.mxu1 %v7011_v29  ;;  %3951 = vmatprep.mubr.bf16.mxu0 %v7013_v30  ;;  %v7108_v29 = vld [vmem:[%s8016_s5 + $0x90c] ss:$28 sps:$4 sm:$0xff]   ;;  %v7110_v30 = vld [vmem:[%s8016_s5 + $0x8f8] ss:$28 sps:$4 sm:$0xff]  }
 0x122   : > { %3102 = vmatmul.mubr.bf16.gmra.mrb[104].mxu1 %v7015_v31  ;;  %3952 = vmatmul.mubr.bf16.gmra.mrb[104].mxu0 %v7016_v32  ;;  %v7111_v31 = vld [vmem:[%s8016_s5 + $0x908] ss:$28 sps:$4 sm:$0xff]   ;;  %v7112_v32 = vld [vmem:[%s8016_s5 + $0x934] ss:$28 sps:$4 sm:$0xff]  }
 0x123   : > { %3109 = vmatprep.mubr.bf16.mxu1 %v7017_v33  ;;  %3959 = vmatprep.mubr.bf16.mxu0 %v7019_v34  ;;  %v7114_v33 = vld [vmem:[%s8016_s5 + $0x944] ss:$28 sps:$4 sm:$0xff]   ;;  %v7116_v34 = vld [vmem:[%s8016_s5 + $0x930] ss:$28 sps:$4 sm:$0xff]  }
 0x12a   : > { %3110 = vmatmul.mubr.bf16.gmra.mrb[108].mxu1 %v7021_v35  ;;  %3960 = vmatmul.mubr.bf16.gmra.mrb[108].mxu0 %v7022_v36  ;;  %v7117_v35 = vld [vmem:[%s8016_s5 + $0x940] ss:$28 sps:$4 sm:$0xff]   ;;  %v7118_v36 = vld [vmem:[%s8016_s5 + $0x96c] ss:$28 sps:$4 sm:$0xff]  }
 0x12b   : > { %3117 = vmatprep.mubr.bf16.mxu1 %v7024_v37  ;;  %3967 = vmatprep.mubr.bf16.mxu0 %v7026_v38  ;;  %v7120_v37 = vld [vmem:[%s8016_s5 + $0x97c] ss:$28 sps:$4 sm:$0xff]   ;;  %v7122_v38 = vld [vmem:[%s8016_s5 + $0x968] ss:$28 sps:$4 sm:$0xff]  }
 0x132   : > { %3118 = vmatmul.mubr.bf16.gmra.mrb[112].mxu1 %v7028_v41  ;;  %3968 = vmatmul.mubr.bf16.gmra.mrb[112].mxu0 %v7029_v42  ;;  %v7125_v41 = vld [vmem:[%s8016_s5 + $0x9a4] ss:$28 sps:$4 sm:$0xff]   ;;  %v7127_v42 = vld [vmem:[%s8016_s5 + $0x9b4] ss:$28 sps:$4 sm:$0xff]  }
 0x133   : > { %3125 = vmatprep.mubr.bf16.mxu1 %v7030_v43  ;;  %3975 = vmatprep.mubr.bf16.mxu0 %v7032_v44  ;;  %v7129_v43 = vld [vmem:[%s8016_s5 + $0x9a0] ss:$28 sps:$4 sm:$0xff]   ;;  %v7130_v44 = vld [vmem:[%s8016_s5 + $0x9b0] ss:$28 sps:$4 sm:$0xff]  }
 0x13a   : > { %3126 = vmatmul.mubr.bf16.gmra.mrb[116].mxu1 %v7034_v45  ;;  %3976 = vmatmul.mubr.bf16.gmra.mrb[116].mxu0 %v7035_v46  ;;  %v7131_v45 = vld [vmem:[%s8016_s5 + $0x9dc] ss:$28 sps:$4 sm:$0xff]   ;;  %v7133_v46 = vld [vmem:[%s8016_s5 + $0x9ec] ss:$28 sps:$4 sm:$0xff]  }
 0x13b   : > { %3133 = vmatprep.mubr.bf16.mxu1 %v7036_v47  ;;  %3983 = vmatprep.mubr.bf16.mxu0 %v7038_v48  ;;  %v7135_v47 = vld [vmem:[%s8016_s5 + $0x9d8] ss:$28 sps:$4 sm:$0xff]   ;;  %v7136_v48 = vld [vmem:[%s8016_s5 + $0x9e8] ss:$28 sps:$4 sm:$0xff]  }
 0x142   : > { %3134 = vmatmul.mubr.bf16.gmra.mrb[120].mxu1 %v7040_v1  ;;  %3984 = vmatmul.mubr.bf16.gmra.mrb[120].mxu0 %v7041_v49  ;;  %v7137_v1 = vld [vmem:[%s8016_s5 + $0xa14] ss:$28 sps:$4 sm:$0xff]   ;;  %v7139_v49 = vld [vmem:[%s8016_s5 + $0xa24] ss:$28 sps:$4 sm:$0xff]  }
 0x143   : > { %3141 = vmatprep.mubr.bf16.mxu1 %v7043_v50  ;;  %3991 = vmatprep.mubr.bf16.mxu0 %v7045_v51  ;;  %v7141_v50 = vld [vmem:[%s8016_s5 + $0xa10] ss:$28 sps:$4 sm:$0xff]   ;;  %v7142_v51 = vld [vmem:[%s8016_s5 + $0xa20] ss:$28 sps:$4 sm:$0xff]  }
 0x14a   : > { %3142 = vmatmul.mubr.bf16.gmra.mrb[124].mxu1 %v7047_v53  ;;  %3992 = vmatmul.mubr.bf16.gmra.mrb[124].mxu0 %v7048_v54  ;;  %v7146_v53 = vld [vmem:[%s8016_s5 + $0xa5c] ss:$28 sps:$4 sm:$0xff]   ;;  %v7148_v54 = vld [vmem:[%s8016_s5 + $0xa48] ss:$28 sps:$4 sm:$0xff]  }
 0x14b   : > { %3149 = vmatprep.mubr.bf16.mxu1 %v7049_v55  ;;  %3999 = vmatprep.mubr.bf16.mxu0 %v7051_v56  ;;  %v7149_v55 = vld [vmem:[%s8016_s5 + $0xa58] ss:$28 sps:$4 sm:$0xff]   ;;  %v7150_v56 = vld [vmem:[%s8016_s5 + $0xa84] ss:$28 sps:$4 sm:$0xff]  }
 0x152   : > { %3150 = vmatmul.mubr.bf16.gmra.mrb[128].mxu1 %v7053_v57  ;;  %4000 = vmatmul.mubr.bf16.gmra.mrb[128].mxu0 %v7054_v58  ;;  %v7152_v57 = vld [vmem:[%s8016_s5 + $0xa94] ss:$28 sps:$4 sm:$0xff]   ;;  %v7154_v58 = vld [vmem:[%s8016_s5 + $0xa80] ss:$28 sps:$4 sm:$0xff]  }
 0x153   : > { %3157 = vmatprep.mubr.bf16.mxu1 %v7055_v59  ;;  %4007 = vmatprep.mubr.bf16.mxu0 %v7057_v60  ;;  %v7155_v59 = vld [vmem:[%s8016_s5 + $0xa90] ss:$28 sps:$4 sm:$0xff]  }
 0x154   : > { %v7158_v60 = vld [vmem:[%s8016_s5 + $0xc] ss:$28 sps:$4 sm:$0xff]  }
 0x15a   : > { %3158 = vmatmul.mubr.bf16.gmra.mrb[132].mxu1 %v7059_v61  ;;  %4008 = vmatmul.mubr.bf16.gmra.mrb[132].mxu0 %v7060_v62  ;;  %v7156_v61 = vld [vmem:[%s8016_s5 + $0x8] ss:$28 sps:$4 sm:$0xff]   ;;  %v7159_v62 = vld [vmem:[%s8016_s5 + $0x18] ss:$28 sps:$4 sm:$0xff]  }
 0x15b   : > { %3165 = vmatprep.mubr.bf16.mxu1 %v7061_v63  ;;  %4015 = vmatprep.mubr.bf16.mxu0 %v7064_v0  ;;  %v7160_v63 = vld [vmem:[%s8016_s5 + $0x44] ss:$28 sps:$4 sm:$0xff]  }
 0x15c   : > { %v7162_v0 = vld [vmem:[%s8016_s5 + $0x40] ss:$28 sps:$4 sm:$0xff]  }
 0x162   : > { %3166 = vmatmul.mubr.bf16.gmra.mrb[136].mxu1 %v7066_v2  ;;  %4016 = vmatmul.mubr.bf16.gmra.mrb[136].mxu0 %v7067_v3  ;;  %v7163_v2 = vld [vmem:[%s8016_s5 + $0x50] ss:$28 sps:$4 sm:$0xff]   ;;  %v7164_v3 = vld [vmem:[%s8016_s5 + $0x7c] ss:$28 sps:$4 sm:$0xff]  }
 0x163   : > { %3173 = vmatprep.mubr.bf16.mxu1 %v7068_v4  ;;  %4023 = vmatprep.mubr.bf16.mxu0 %v7070_v5  ;;  %v7166_v4 = vld [vmem:[%s8016_s5 + $0x78] ss:$28 sps:$4 sm:$0xff]   ;;  %v7167_v5 = vld [vmem:[%s8016_s5 + $0x88] ss:$28 sps:$4 sm:$0xff]  }
 0x16a   : > { %3174 = vmatmul.mubr.bf16.gmra.mrb[140].mxu1 %v7072_v6  ;;  %4024 = vmatmul.mubr.bf16.gmra.mrb[140].mxu0 %v7073_v7  ;;  %v7168_v6 = vld [vmem:[%s8016_s5 + $0xb4] ss:$28 sps:$4 sm:$0xff]  }
 0x16b   : > { %3181 = vmatprep.mubr.bf16.mxu1 %v7074_v8  ;;  %4031 = vmatprep.mubr.bf16.mxu0 %v7076_v9  ;;  %v7170_v7 = vld [vmem:[%s8016_s5 + $0xb0] ss:$28 sps:$4 sm:$0xff]   ;;  %v7171_v8 = vld [vmem:[%s8016_s5 + $0xc0] ss:$28 sps:$4 sm:$0xff]  }
 0x16c   : > { %v7172_v9 = vld [vmem:[%s8016_s5 + $0xec] ss:$28 sps:$4 sm:$0xff]  }
 0x172   : > { %3182 = vmatmul.mubr.bf16.gmra.mrb[144].mxu1 %v7078_v10  ;;  %4032 = vmatmul.mubr.bf16.gmra.mrb[144].mxu0 %v7079_v11  ;;  %v7174_v10 = vld [vmem:[%s8016_s5 + $0xe8] ss:$28 sps:$4 sm:$0xff]   ;;  %v7175_v11 = vld [vmem:[%s8016_s5 + $0xf8] ss:$28 sps:$4 sm:$0xff]  }
 0x173   : > { %3189 = vmatprep.mubr.bf16.mxu1 %v7080_v12  ;;  %4039 = vmatprep.mubr.bf16.mxu0 %v7083_v13  ;;  %v7176_v12 = vld [vmem:[%s8016_s5 + $0x124] ss:$28 sps:$4 sm:$0xff]  }
 0x174   : > { %v7178_v13 = vld [vmem:[%s8016_s5 + $0x120] ss:$28 sps:$4 sm:$0xff]  }
 0x17a   : > { %3190 = vmatmul.mubr.bf16.gmra.mrb[148].mxu1 %v7085_v14  ;;  %4040 = vmatmul.mubr.bf16.gmra.mrb[148].mxu0 %v7086_v15  ;;  %v7179_v14 = vld [vmem:[%s8016_s5 + $0x130] ss:$28 sps:$4 sm:$0xff]   ;;  %v7180_v15 = vld [vmem:[%s8016_s5 + $0x15c] ss:$28 sps:$4 sm:$0xff]  }
 0x17b   : > { %3197 = vmatprep.mubr.bf16.mxu1 %v7087_v16  ;;  %4047 = vmatprep.mubr.bf16.mxu0 %v7089_v17  ;;  %v7182_v16 = vld [vmem:[%s8016_s5 + $0x158] ss:$28 sps:$4 sm:$0xff]   ;;  %v7183_v17 = vld [vmem:[%s8016_s5 + $0x168] ss:$28 sps:$4 sm:$0xff]  }
 0x182   : > { %3198 = vmatmul.mubr.bf16.gmra.mrb[152].mxu1 %v7091_v18  ;;  %4048 = vmatmul.mubr.bf16.gmra.mrb[152].mxu0 %v7092_v19  ;;  %v7184_v18 = vld [vmem:[%s8016_s5 + $0x194] ss:$28 sps:$4 sm:$0xff]  }
 0x183   : > { %3205 = vmatprep.mubr.bf16.mxu1 %v7093_v20  ;;  %4055 = vmatprep.mubr.bf16.mxu0 %v7095_v21  ;;  %v7186_v19 = vld [vmem:[%s8016_s5 + $0x190] ss:$28 sps:$4 sm:$0xff]   ;;  %v7187_v20 = vld [vmem:[%s8016_s5 + $0x1a0] ss:$28 sps:$4 sm:$0xff]  }
 0x184   : > { %v7188_v21 = vld [vmem:[%s8016_s5 + $0x1cc] ss:$28 sps:$4 sm:$0xff]  }
 0x18a   : > { %3206 = vmatmul.mubr.bf16.gmra.mrb[156].mxu1 %v7097_v22  ;;  %4056 = vmatmul.mubr.bf16.gmra.mrb[156].mxu0 %v7098_v23  ;;  %v7190_v22 = vld [vmem:[%s8016_s5 + $0x1c8] ss:$28 sps:$4 sm:$0xff]   ;;  %v7191_v23 = vld [vmem:[%s8016_s5 + $0x1d8] ss:$28 sps:$4 sm:$0xff]  }
 0x18b   : > { %3213 = vmatprep.mubr.bf16.mxu1 %v7099_v24  ;;  %4063 = vmatprep.mubr.bf16.mxu0 %v7101_v25  ;;  %v7192_v24 = vld [vmem:[%s8016_s5 + $0x204] ss:$28 sps:$4 sm:$0xff]  }
 0x18c   : > { %v7194_v25 = vld [vmem:[%s8016_s5 + $0x200] ss:$28 sps:$4 sm:$0xff]  }
 0x192   : > { %3214 = vmatmul.mubr.bf16.gmra.mrb[160].mxu1 %v7103_v26  ;;  %4064 = vmatmul.mubr.bf16.gmra.mrb[160].mxu0 %v7105_v27  ;;  %v7195_v26 = vld [vmem:[%s8016_s5 + $0x210] ss:$28 sps:$4 sm:$0xff]   ;;  %v7196_v27 = vld [vmem:[%s8016_s5 + $0x23c] ss:$28 sps:$4 sm:$0xff]  }
 0x193   : > { %3221 = vmatprep.mubr.bf16.mxu1 %v7106_v28  ;;  %4071 = vmatprep.mubr.bf16.mxu0 %v7108_v29  ;;  %v7198_v28 = vld [vmem:[%s8016_s5 + $0x238] ss:$28 sps:$4 sm:$0xff]   ;;  %v7199_v29 = vld [vmem:[%s8016_s5 + $0x248] ss:$28 sps:$4 sm:$0xff]  }
 0x19a   : > { %3222 = vmatmul.mubr.bf16.gmra.mrb[164].mxu1 %v7110_v30  ;;  %4072 = vmatmul.mubr.bf16.gmra.mrb[164].mxu0 %v7111_v31  ;;  %v7200_v30 = vld [vmem:[%s8016_s5 + $0x274] ss:$28 sps:$4 sm:$0xff]  }
 0x19b   : > { %3229 = vmatprep.mubr.bf16.mxu1 %v7112_v32  ;;  %4079 = vmatprep.mubr.bf16.mxu0 %v7114_v33  ;;  %v7202_v31 = vld [vmem:[%s8016_s5 + $0x270] ss:$28 sps:$4 sm:$0xff]   ;;  %v7203_v32 = vld [vmem:[%s8016_s5 + $0x280] ss:$28 sps:$4 sm:$0xff]  }
 0x19c   : > { %v7204_v33 = vld [vmem:[%s8016_s5 + $0x2ac] ss:$28 sps:$4 sm:$0xff]  }
 0x1a2   : > { %3230 = vmatmul.mubr.bf16.gmra.mrb[168].mxu1 %v7116_v34  ;;  %4080 = vmatmul.mubr.bf16.gmra.mrb[168].mxu0 %v7117_v35  ;;  %v7206_v34 = vld [vmem:[%s8016_s5 + $0x2a8] ss:$28 sps:$4 sm:$0xff]   ;;  %v7207_v35 = vld [vmem:[%s8016_s5 + $0x2b8] ss:$28 sps:$4 sm:$0xff]  }
 0x1a3   : > { %3237 = vmatprep.mubr.bf16.mxu1 %v7118_v36  ;;  %4087 = vmatprep.mubr.bf16.mxu0 %v7120_v37  ;;  %v7208_v36 = vld [vmem:[%s8016_s5 + $0x2e4] ss:$28 sps:$4 sm:$0xff]  }
 0x1a4   : > { %v7210_v37 = vld [vmem:[%s8016_s5 + $0x2e0] ss:$28 sps:$4 sm:$0xff]  }
 0x1aa   : > { %3238 = vmatmul.mubr.bf16.gmra.mrb[172].mxu1 %v7122_v38  ;;  %4088 = vmatmul.mubr.bf16.gmra.mrb[172].mxu0 %v7124_v39  ;;  %v7211_v38 = vld [vmem:[%s8016_s5 + $0x2f0] ss:$28 sps:$4 sm:$0xff]   ;;  %v7212_v39 = vld [vmem:[%s8016_s5 + $0x31c] ss:$28 sps:$4 sm:$0xff]  }
 0x1ab   : > { %3245 = vmatprep.mubr.bf16.mxu1 %v7125_v41  ;;  %4095 = vmatprep.mubr.bf16.mxu0 %v7127_v42  ;;  %v7214_v41 = vld [vmem:[%s8016_s5 + $0x318] ss:$28 sps:$4 sm:$0xff]   ;;  %v7215_v42 = vld [vmem:[%s8016_s5 + $0x328] ss:$28 sps:$4 sm:$0xff]  }
 0x1b2   : > { %3246 = vmatmul.mubr.bf16.gmra.mrb[176].mxu1 %v7129_v43  ;;  %4096 = vmatmul.mubr.bf16.gmra.mrb[176].mxu0 %v7130_v44  ;;  %v7216_v43 = vld [vmem:[%s8016_s5 + $0x354] ss:$28 sps:$4 sm:$0xff]  }
 0x1b3   : > { %3253 = vmatprep.mubr.bf16.mxu1 %v7131_v45  ;;  %4103 = vmatprep.mubr.bf16.mxu0 %v7133_v46  ;;  %v7218_v44 = vld [vmem:[%s8016_s5 + $0x350] ss:$28 sps:$4 sm:$0xff]   ;;  %v7219_v45 = vld [vmem:[%s8016_s5 + $0x360] ss:$28 sps:$4 sm:$0xff]  }
 0x1b4   : > { %v7220_v46 = vld [vmem:[%s8016_s5 + $0x38c] ss:$28 sps:$4 sm:$0xff]  }
 0x1ba   : > { %3254 = vmatmul.mubr.bf16.gmra.mrb[180].mxu1 %v7135_v47  ;;  %4104 = vmatmul.mubr.bf16.gmra.mrb[180].mxu0 %v7136_v48  ;;  %v7222_v47 = vld [vmem:[%s8016_s5 + $0x388] ss:$28 sps:$4 sm:$0xff]   ;;  %v7223_v48 = vld [vmem:[%s8016_s5 + $0x398] ss:$28 sps:$4 sm:$0xff]  }
 0x1bb   : > { %3261 = vmatprep.mubr.bf16.mxu1 %v7137_v1  ;;  %4111 = vmatprep.mubr.bf16.mxu0 %v7139_v49  ;;  %v7224_v1 = vld [vmem:[%s8016_s5 + $0x3c4] ss:$28 sps:$4 sm:$0xff]  }
 0x1bc   : > { %v7226_v49 = vld [vmem:[%s8016_s5 + $0x3c0] ss:$28 sps:$4 sm:$0xff]  }
 0x1c2   : > { %3262 = vmatmul.mubr.bf16.gmra.mrb[184].mxu1 %v7141_v50  ;;  %4112 = vmatmul.mubr.bf16.gmra.mrb[184].mxu0 %v7142_v51  ;;  %v7227_v50 = vld [vmem:[%s8016_s5 + $0x3d0] ss:$28 sps:$4 sm:$0xff]   ;;  %v7228_v51 = vld [vmem:[%s8016_s5 + $0x3fc] ss:$28 sps:$4 sm:$0xff]  }
 0x1c3   : > { %3269 = vmatprep.mubr.bf16.mxu1 %v7144_v52  ;;  %4119 = vmatprep.mubr.bf16.mxu0 %v7146_v53  ;;  %v7230_v52 = vld [vmem:[%s8016_s5 + $0x3f8] ss:$28 sps:$4 sm:$0xff]   ;;  %v7231_v53 = vld [vmem:[%s8016_s5 + $0x408] ss:$28 sps:$4 sm:$0xff]  }
 0x1ca   : > { %3270 = vmatmul.mubr.bf16.gmra.mrb[188].mxu1 %v7148_v54  ;;  %4120 = vmatmul.mubr.bf16.gmra.mrb[188].mxu0 %v7149_v55  ;;  %v7232_v54 = vld [vmem:[%s8016_s5 + $0x434] ss:$28 sps:$4 sm:$0xff]  }
 0x1cb   : > { %3277 = vmatprep.mubr.bf16.mxu1 %v7150_v56  ;;  %4127 = vmatprep.mubr.bf16.mxu0 %v7152_v57  ;;  %v7234_v55 = vld [vmem:[%s8016_s5 + $0x430] ss:$28 sps:$4 sm:$0xff]   ;;  %v7235_v56 = vld [vmem:[%s8016_s5 + $0x440] ss:$28 sps:$4 sm:$0xff]  }
 0x1cc   : > { %v7236_v57 = vld [vmem:[%s8016_s5 + $0x46c] ss:$28 sps:$4 sm:$0xff]  }
 0x1d2   : > { %3278 = vmatmul.mubr.bf16.gmra.mrb[192].mxu1 %v7154_v58  ;;  %4128 = vmatmul.mubr.bf16.gmra.mrb[192].mxu0 %v7155_v59  ;;  %v7238_v58 = vld [vmem:[%s8016_s5 + $0x468] ss:$28 sps:$4 sm:$0xff]   ;;  %v7239_v59 = vld [vmem:[%s8016_s5 + $0x478] ss:$28 sps:$4 sm:$0xff]  }
 0x1d3   : > { %3318 = vmatprep.mubr.bf16.mxu1 %v7158_v60  ;;  %5949 = vmatprep.mubr.msk.bf16.mxu0 %vm7844_vm1, %v7843_v40  ;;  %v7240_v60 = vld [vmem:[%s8016_s5 + $0x4a4] ss:$28 sps:$4 sm:$0xff]  }
 0x1da   : > { %3319 = vmatmul.mubr.bf16.vlgmr.msra.gmra.mrb[0].mxu1 %v7156_v61  ;;  %5950 = vmatmul.mubr.msk.bf16.vlgmr.msra.gmra.mrb[0].mxu0 %vm2709_vm2, %v7159_v62  ;;  %v7242_v61 = vld [vmem:[%s8016_s5 + $0x4a0] ss:$28 sps:$4 sm:$0xff]   ;;  %v7243_v62 = vld [vmem:[%s8016_s5 + $0x4b0] ss:$28 sps:$4 sm:$0xff]  }
 0x1db   : > { %3326 = vmatprep.mubr.bf16.mxu1 %v7160_v63  ;;  %5953 = vmatprep.mubr.msk.bf16.mxu0 %vm7844_vm1, %v7843_v40  ;;  %v7244_v63 = vld [vmem:[%s8016_s5 + $0x4dc] ss:$28 sps:$4 sm:$0xff]  }
 0x1e2   : > { %3327 = vmatmul.mubr.bf16.gmra.mrb[4].mxu1 %v7162_v0  ;;  %5954 = vmatmul.mubr.msk.bf16.gmra.mrb[4].mxu0 %vm2709_vm2, %v7163_v2  ;;  %v7246_v0 = vld [vmem:[%s8016_s5 + $0x4d8] ss:$28 sps:$4 sm:$0xff]   ;;  %v7247_v2 = vld [vmem:[%s8016_s5 + $0x4e8] ss:$28 sps:$4 sm:$0xff]  }
 0x1e3   : > { %3334 = vmatprep.mubr.bf16.mxu1 %v7164_v3  ;;  %5957 = vmatprep.mubr.msk.bf16.mxu0 %vm7844_vm1, %v7843_v40  ;;  %v7248_v3 = vld [vmem:[%s8016_s5 + $0x514] ss:$28 sps:$4 sm:$0xff]  }
 0x1ea   : > { %3335 = vmatmul.mubr.bf16.gmra.mrb[8].mxu1 %v7166_v4  ;;  %5958 = vmatmul.mubr.msk.bf16.gmra.mrb[8].mxu0 %vm2709_vm2, %v7167_v5  ;;  %v7250_v4 = vld [vmem:[%s8016_s5 + $0x510] ss:$28 sps:$4 sm:$0xff]   ;;  %v7251_v5 = vld [vmem:[%s8016_s5 + $0x520] ss:$28 sps:$4 sm:$0xff]  }
 0x1eb   : > { %3342 = vmatprep.mubr.bf16.mxu1 %v7168_v6  ;;  %5961 = vmatprep.mubr.msk.bf16.mxu0 %vm7844_vm1, %v7843_v40  ;;  %v7252_v6 = vld [vmem:[%s8016_s5 + $0x54c] ss:$28 sps:$4 sm:$0xff]  }
 0x1f2   : > { %3343 = vmatmul.mubr.bf16.gmra.mrb[12].mxu1 %v7170_v7  ;;  %5962 = vmatmul.mubr.msk.bf16.gmra.mrb[12].mxu0 %vm2709_vm2, %v7171_v8  ;;  %v7254_v7 = vld [vmem:[%s8016_s5 + $0x548] ss:$28 sps:$4 sm:$0xff]   ;;  %v7255_v8 = vld [vmem:[%s8016_s5 + $0x558] ss:$28 sps:$4 sm:$0xff]  }
 0x1f3   : > { %3350 = vmatprep.mubr.bf16.mxu1 %v7172_v9  ;;  %5965 = vmatprep.mubr.msk.bf16.mxu0 %vm7844_vm1, %v7843_v40  ;;  %v7256_v9 = vld [vmem:[%s8016_s5 + $0x584] ss:$28 sps:$4 sm:$0xff]  }
 0x1fa   : > { %3351 = vmatmul.mubr.bf16.gmra.mrb[16].mxu1 %v7174_v10  ;;  %5966 = vmatmul.mubr.msk.bf16.gmra.mrb[16].mxu0 %vm2709_vm2, %v7175_v11  ;;  %v7258_v10 = vld [vmem:[%s8016_s5 + $0x580] ss:$28 sps:$4 sm:$0xff]   ;;  %v7259_v11 = vld [vmem:[%s8016_s5 + $0x590] ss:$28 sps:$4 sm:$0xff]  }
 0x1fb   : > { %3358 = vmatprep.mubr.bf16.mxu1 %v7176_v12  ;;  %5969 = vmatprep.mubr.msk.bf16.mxu0 %vm7844_vm1, %v7843_v40  ;;  %v7260_v12 = vld [vmem:[%s8016_s5 + $0x5bc] ss:$28 sps:$4 sm:$0xff]  }
 0x202   : > { %3359 = vmatmul.mubr.bf16.gmra.mrb[20].mxu1 %v7178_v13  ;;  %5970 = vmatmul.mubr.msk.bf16.gmra.mrb[20].mxu0 %vm2709_vm2, %v7179_v14  ;;  %v7262_v13 = vld [vmem:[%s8016_s5 + $0x5b8] ss:$28 sps:$4 sm:$0xff]   ;;  %v7263_v14 = vld [vmem:[%s8016_s5 + $0x5c8] ss:$28 sps:$4 sm:$0xff]  }
 0x203   : > { %3366 = vmatprep.mubr.bf16.mxu1 %v7180_v15  ;;  %5973 = vmatprep.mubr.msk.bf16.mxu0 %vm7844_vm1, %v7843_v40  ;;  %v7264_v15 = vld [vmem:[%s8016_s5 + $0x5f4] ss:$28 sps:$4 sm:$0xff]  }
 0x20a   : > { %3367 = vmatmul.mubr.bf16.gmra.mrb[24].mxu1 %v7182_v16  ;;  %5974 = vmatmul.mubr.msk.bf16.gmra.mrb[24].mxu0 %vm2709_vm2, %v7183_v17  ;;  %v8509_v16 = vld [vmem:[%s8919_s2] ss:$0 sm:$0xff] }
 0x20b   : > { %3374 = vmatprep.mubr.bf16.mxu1 %v7184_v18  ;;  %5977 = vmatprep.mubr.msk.bf16.mxu0 %vm7844_vm1, %v7843_v40 }
 0x212   : > { %3375 = vmatmul.mubr.bf16.gmra.mrb[28].mxu1 %v7186_v19  ;;  %5978 = vmatmul.mubr.msk.bf16.gmra.mrb[28].mxu0 %vm2709_vm2, %v7187_v20 }
 0x213   : > { %3382 = vmatprep.mubr.bf16.mxu1 %v7188_v21  ;;  %5981 = vmatprep.mubr.msk.bf16.mxu0 %vm7844_vm1, %v7843_v40  ;;  %v7266_v21 = vld [vmem:[%s8016_s5 + $0x5f0] ss:$28 sps:$4 sm:$0xff]  }
 0x21a   : > { %3383 = vmatmul.mubr.bf16.gmra.mrb[32].mxu1 %v7190_v22  ;;  %5982 = vmatmul.mubr.msk.bf16.gmra.mrb[32].mxu0 %vm2709_vm2, %v7191_v23 }
 0x21b   : > { %3390 = vmatprep.mubr.bf16.mxu1 %v7192_v24  ;;  %5985 = vmatprep.mubr.msk.bf16.mxu0 %vm7844_vm1, %v7843_v40  ;;  %v7267_v24 = vld [vmem:[%s8016_s5 + $0x600] ss:$28 sps:$4 sm:$0xff]  }
 0x222   : > { %3391 = vmatmul.mubr.bf16.gmra.mrb[36].mxu1 %v7194_v25  ;;  %5986 = vmatmul.mubr.msk.bf16.gmra.mrb[36].mxu0 %vm2709_vm2, %v7195_v26  ;;  %v7268_v25 = vld [vmem:[%s8016_s5 + $0x62c] ss:$28 sps:$4 sm:$0xff]  }
 0x223   : > { %3398 = vmatprep.mubr.bf16.mxu1 %v7196_v27  ;;  %5989 = vmatprep.mubr.msk.bf16.mxu0 %vm7844_vm1, %v7843_v40 }
 0x22a   : > { %3399 = vmatmul.mubr.bf16.gmra.mrb[40].mxu1 %v7198_v28  ;;  %5990 = vmatmul.mubr.msk.bf16.gmra.mrb[40].mxu0 %vm2709_vm2, %v7199_v29 }
 0x22b   : > { %3406 = vmatprep.mubr.bf16.mxu1 %v7200_v30  ;;  %5993 = vmatprep.mubr.msk.bf16.mxu0 %vm7844_vm1, %v7843_v40 }
 0x232   : > { %3407 = vmatmul.mubr.bf16.gmra.mrb[44].mxu1 %v7202_v31  ;;  %5994 = vmatmul.mubr.msk.bf16.gmra.mrb[44].mxu0 %vm2709_vm2, %v7203_v32 }
 0x233   : > { %3414 = vmatprep.mubr.bf16.mxu1 %v7204_v33  ;;  %5997 = vmatprep.mubr.msk.bf16.mxu0 %vm7844_vm1, %v7843_v40 }
 0x23a   : > { %3415 = vmatmul.mubr.bf16.gmra.mrb[48].mxu1 %v7206_v34  ;;  %5998 = vmatmul.mubr.msk.bf16.gmra.mrb[48].mxu0 %vm2709_vm2, %v7207_v35 }
 0x23b   : > { %3422 = vmatprep.mubr.bf16.mxu1 %v7208_v36  ;;  %6001 = vmatprep.mubr.msk.bf16.mxu0 %vm7844_vm1, %v7843_v40 }
 0x242   : > { %3423 = vmatmul.mubr.bf16.gmra.mrb[52].mxu1 %v7210_v37  ;;  %6002 = vmatmul.mubr.msk.bf16.gmra.mrb[52].mxu0 %vm2709_vm2, %v7211_v38  ;;  %v7270_v38 = vld [vmem:[%s8016_s5 + $0x628] ss:$28 sps:$4 sm:$0xff]  }
 0x243   : > { %3430 = vmatprep.mubr.bf16.mxu1 %v7212_v39  ;;  %6005 = vmatprep.mubr.msk.bf16.mxu0 %vm7844_vm1, %v7843_v40 }
 0x24a   : > { %3431 = vmatmul.mubr.bf16.gmra.mrb[56].mxu1 %v7214_v41  ;;  %6006 = vmatmul.mubr.msk.bf16.gmra.mrb[56].mxu0 %vm2709_vm2, %v7215_v42  ;;  %v7271_v42 = vld [vmem:[%s8016_s5 + $0x638] ss:$28 sps:$4 sm:$0xff]  }
 0x24b   : > { %3438 = vmatprep.mubr.bf16.mxu1 %v7216_v43  ;;  %6009 = vmatprep.mubr.msk.bf16.mxu0 %vm7844_vm1, %v7843_v40  ;;  %v7272_v43 = vld [vmem:[%s8016_s5 + $0x664] ss:$28 sps:$4 sm:$0xff]  }
 0x252   : > { %3439 = vmatmul.mubr.bf16.gmra.mrb[60].mxu1 %v7218_v44  ;;  %6010 = vmatmul.mubr.msk.bf16.gmra.mrb[60].mxu0 %vm2709_vm2, %v7219_v45 }
 0x253   : > { %3446 = vmatprep.mubr.bf16.mxu1 %v7220_v46  ;;  %6013 = vmatprep.mubr.msk.bf16.mxu0 %vm7844_vm1, %v7843_v40 }
 0x25a   : > { %3447 = vmatmul.mubr.bf16.gmra.mrb[64].mxu1 %v7222_v47  ;;  %6014 = vmatmul.mubr.msk.bf16.gmra.mrb[64].mxu0 %vm2709_vm2, %v7223_v48 }
 0x25b   : > { %3454 = vmatprep.mubr.bf16.mxu1 %v7224_v1  ;;  %6017 = vmatprep.mubr.msk.bf16.mxu0 %vm7844_vm1, %v7843_v40 }
 0x262   : > { %3455 = vmatmul.mubr.bf16.gmra.mrb[68].mxu1 %v7226_v49  ;;  %6018 = vmatmul.mubr.msk.bf16.gmra.mrb[68].mxu0 %vm2709_vm2, %v7227_v50 }
 0x263   : > { %3462 = vmatprep.mubr.bf16.mxu1 %v7228_v51  ;;  %6021 = vmatprep.mubr.msk.bf16.mxu0 %vm7844_vm1, %v7843_v40 }
 0x26a   : > { %3463 = vmatmul.mubr.bf16.gmra.mrb[72].mxu1 %v7230_v52  ;;  %6022 = vmatmul.mubr.msk.bf16.gmra.mrb[72].mxu0 %vm2709_vm2, %v7231_v53 }
 0x26b   : > { %3470 = vmatprep.mubr.bf16.mxu1 %v7232_v54  ;;  %6025 = vmatprep.mubr.msk.bf16.mxu0 %vm7844_vm1, %v7843_v40 }
 0x272   : > { %3471 = vmatmul.mubr.bf16.gmra.mrb[76].mxu1 %v7234_v55  ;;  %6026 = vmatmul.mubr.msk.bf16.gmra.mrb[76].mxu0 %vm2709_vm2, %v7235_v56  ;;  %v7274_v56 = vld [vmem:[%s8016_s5 + $0x660] ss:$28 sps:$4 sm:$0xff]  }
 0x273   : > { %3478 = vmatprep.mubr.bf16.mxu1 %v7236_v57  ;;  %6029 = vmatprep.mubr.msk.bf16.mxu0 %vm7844_vm1, %v7843_v40  ;;  %v7275_v57 = vld [vmem:[%s8016_s5 + $0x670] ss:$28 sps:$4 sm:$0xff]  }
 0x27a   : > { %3479 = vmatmul.mubr.bf16.gmra.mrb[80].mxu1 %v7238_v58  ;;  %6030 = vmatmul.mubr.msk.bf16.gmra.mrb[80].mxu0 %vm2709_vm2, %v7239_v59 }
 0x27b   : > { %3486 = vmatprep.mubr.bf16.mxu1 %v7240_v60  ;;  %6033 = vmatprep.mubr.msk.bf16.mxu0 %vm7844_vm1, %v7843_v40 }
 0x282   : > { %3487 = vmatmul.mubr.bf16.gmra.mrb[84].mxu1 %v7242_v61  ;;  %6034 = vmatmul.mubr.msk.bf16.gmra.mrb[84].mxu0 %vm2709_vm2, %v7243_v62  ;;  %v7276_v61 = vld [vmem:[%s8016_s5 + $0x69c] ss:$28 sps:$4 sm:$0xff]  }
 0x283   : > { %3494 = vmatprep.mubr.bf16.mxu1 %v7244_v63  ;;  %6037 = vmatprep.mubr.msk.bf16.mxu0 %vm7844_vm1, %v7843_v40 }
 0x28a   : > { %3495 = vmatmul.mubr.bf16.gmra.mrb[88].mxu1 %v7246_v0  ;;  %6038 = vmatmul.mubr.msk.bf16.gmra.mrb[88].mxu0 %vm2709_vm2, %v7247_v2 }
 0x28b   : > { %3502 = vmatprep.mubr.bf16.mxu1 %v7248_v3  ;;  %6041 = vmatprep.mubr.msk.bf16.mxu0 %vm7844_vm1, %v7843_v40 }
 0x292   : > { %3503 = vmatmul.mubr.bf16.gmra.mrb[92].mxu1 %v7250_v4  ;;  %6042 = vmatmul.mubr.msk.bf16.gmra.mrb[92].mxu0 %vm2709_vm2, %v7251_v5 }
 0x293   : > { %3510 = vmatprep.mubr.bf16.mxu1 %v7252_v6  ;;  %6045 = vmatprep.mubr.msk.bf16.mxu0 %vm7844_vm1, %v7843_v40 }
 0x29a   : > { %3511 = vmatmul.mubr.bf16.gmra.mrb[96].mxu1 %v7254_v7  ;;  %6046 = vmatmul.mubr.msk.bf16.gmra.mrb[96].mxu0 %vm2709_vm2, %v7255_v8 }
 0x29b   : > { %3518 = vmatprep.mubr.bf16.mxu1 %v7256_v9  ;;  %6049 = vmatprep.mubr.msk.bf16.mxu0 %vm7844_vm1, %v7843_v40 }
 0x2a2   : > { %3519 = vmatmul.mubr.bf16.gmra.mrb[100].mxu1 %v7258_v10  ;;  %6050 = vmatmul.mubr.msk.bf16.gmra.mrb[100].mxu0 %vm2709_vm2, %v7259_v11 }
 0x2a3   : > { %3526 = vmatprep.mubr.bf16.mxu1 %v7260_v12  ;;  %6053 = vmatprep.mubr.msk.bf16.mxu0 %vm7844_vm1, %v7843_v40 }
 0x2aa   : > { %3527 = vmatmul.mubr.bf16.gmra.mrb[104].mxu1 %v7262_v13  ;;  %6054 = vmatmul.mubr.msk.bf16.gmra.mrb[104].mxu0 %vm2709_vm2, %v7263_v14  ;;  %v7278_v14 = vld [vmem:[%s8016_s5 + $0x698] ss:$28 sps:$4 sm:$0xff]  }
 0x2ab   : > { %3534 = vmatprep.mubr.bf16.mxu1 %v7264_v15  ;;  %6057 = vmatprep.mubr.msk.bf16.mxu0 %vm7844_vm1, %v7843_v40  ;;  %v7279_v15 = vld [vmem:[%s8016_s5 + $0x6a8] ss:$28 sps:$4 sm:$0xff]  }
 0x2ad   : > { %v3320_v17 = vpop.f32.mrb[0].mxu1  ;;  %v4170_v19 = vpop.f32.mrb[0].mxu0 }
 0x2ae   : > { %v6145_v18 = vadd.f32 %v8509_v16, %v3320_v17  ;;  %v3322_v20 = vpop.f32.mrb[1].mxu1  ;;  %v5951_v22 = vpop.f32.mrb[1].mxu0 }
 0x2af   : > { %v3323_v23 = vpop.f32.mrb[2].mxu1  ;;  %v4173_v28 = vpop.f32.mrb[2].mxu0  ;;  %v7280_v20 = vld [vmem:[%s8016_s5 + $0x6d4] ss:$28 sps:$4 sm:$0xff]  }
 0x2b0   : > { %v6146_v26 = vadd.f32 %v6145_v18, %v4170_v19  ;;  %v6147_v27 = vadd.f32 %v8509_v16, %v3323_v23  ;;  %v3325_v29 = vpop.f32.mrb[3].mxu1  ;;  %v5952_v30 = vpop.f32.mrb[3].mxu0 }
 0x2b2   : > { %v5796_v31 = vmul.f32 -1.442695, %v6146_v26  ;;  %v6148_v32 = vadd.f32 %v6147_v27, %v4173_v28  ;;  %3535 = vmatmul.mubr.bf16.gmra.mrb[108].mxu1 %v7266_v21  ;;  %6058 = vmatmul.mubr.msk.bf16.gmra.mrb[108].mxu0 %vm2709_vm2, %v7267_v24 }
 0x2b3   : > { %3542 = vmatprep.mubr.bf16.mxu1 %v7268_v25  ;;  %6061 = vmatprep.mubr.msk.bf16.mxu0 %vm7844_vm1, %v7843_v40 }
 0x2b4   : > { %7352 = vpow2.f32 %v5796_v31  ;;  %v5797_v33 = vmul.f32 -1.442695, %v6148_v32 }
 0x2b5   : > { %v3328_v34 = vpop.f32.mrb[4].mxu1  ;;  %v4178_v36 = vpop.f32.mrb[4].mxu0 }
 0x2b6   : > { %7354 = vpow2.f32 %v5797_v33  ;;  %v6149_v35 = vadd.f32 %v8509_v16, %v3328_v34  ;;  %v3330_v37 = vpop.f32.mrb[5].mxu1  ;;  %v5955_v39 = vpop.f32.mrb[5].mxu0 }
 0x2b7   : > { %v3331_v41 = vpop.f32.mrb[6].mxu1  ;;  %v4181_v46 = vpop.f32.mrb[6].mxu0  ;;  %v7283_v39 = vld [vmem:[%s8016_s5 + $0x6e0] ss:$28 sps:$4 sm:$0xff]  }
 0x2b8   : > { %v6150_v44 = vadd.f32 %v6149_v35, %v4178_v36  ;;  %v6151_v45 = vadd.f32 %v8509_v16, %v3331_v41  ;;  %v3333_v47 = vpop.f32.mrb[7].mxu1  ;;  %v5956_v48 = vpop.f32.mrb[7].mxu0 }
 0x2ba   : > { %v5798_v1 = vmul.f32 -1.442695, %v6150_v44  ;;  %v6152_v49 = vadd.f32 %v6151_v45, %v4181_v46  ;;  %3543 = vmatmul.mubr.bf16.gmra.mrb[112].mxu1 %v7270_v38  ;;  %6062 = vmatmul.mubr.msk.bf16.gmra.mrb[112].mxu0 %vm2709_vm2, %v7271_v42  ;;  %v7282_v38 = vld [vmem:[%s8016_s5 + $0x6d0] ss:$28 sps:$4 sm:$0xff]  }
 0x2bb   : > { %3550 = vmatprep.mubr.bf16.mxu1 %v7272_v43  ;;  %6065 = vmatprep.mubr.msk.bf16.mxu0 %vm7844_vm1, %v7843_v40  ;;  %v7284_v44 = vld [vmem:[%s8016_s5 + $0x70c] ss:$28 sps:$4 sm:$0xff]  }
 0x2bc   : > { %7356 = vpow2.f32 %v5798_v1  ;;  %v5799_v50 = vmul.f32 -1.442695, %v6152_v49 }
 0x2bd   : > { %v3336_v51 = vpop.f32.mrb[8].mxu1  ;;  %v4186_v54 = vpop.f32.mrb[8].mxu0 }
 0x2be   : > { %v7353_v52 = vpop.eup %7352  ;;  %7358 = vpow2.f32 %v5799_v50  ;;  %v6153_v53 = vadd.f32 %v8509_v16, %v3336_v51  ;;  %v3338_v55 = vpop.f32.mrb[9].mxu1 }
 0x2bf   : > { %v4855_v58 = vadd.f32 1.0, %v7353_v52  ;;  %v5959_v59 = vpop.f32.mrb[9].mxu0  ;;  %v3339_v60 = vpop.f32.mrb[10].mxu1 }
 0x2c0   : > { %v7355_v62 = vpop.eup %7354  ;;  %v6154_v63 = vadd.f32 %v6153_v53, %v4186_v54  ;;  %v6155_v0 = vadd.f32 %v8509_v16, %v3339_v60  ;;  %v4189_v2 = vpop.f32.mrb[10].mxu0 }
 0x2c1   : > { %v3341_v3 = vpop.f32.mrb[11].mxu1  ;;  %7360 = vrcp.f32 %v4855_v58  ;;  %v4856_v4 = vadd.f32 1.0, %v7355_v62  ;;  %v5960_v5 = vpop.f32.mrb[11].mxu0  ;;  %v7287_v62 = vld [vmem:[%s8016_s5 + $0x718] ss:$28 sps:$4 sm:$0xff]  }
 0x2c2   : > { %v5800_v6 = vmul.f32 -1.442695, %v6154_v63  ;;  %v6156_v7 = vadd.f32 %v6155_v0, %v4189_v2  ;;  %3551 = vmatmul.mubr.bf16.gmra.mrb[116].mxu1 %v7274_v56  ;;  %6066 = vmatmul.mubr.msk.bf16.gmra.mrb[116].mxu0 %vm2709_vm2, %v7275_v57  ;;  %v7288_v3 = vld [vmem:[%s8016_s5 + $0x744] ss:$28 sps:$4 sm:$0xff]  }
 0x2c3   : > { %7362 = vrcp.f32 %v4856_v4  ;;  %3558 = vmatprep.mubr.bf16.mxu1 %v7276_v61  ;;  %6069 = vmatprep.mubr.msk.bf16.mxu0 %vm7844_vm1, %v7843_v40  ;;  %v7286_v61 = vld [vmem:[%s8016_s5 + $0x708] ss:$28 sps:$4 sm:$0xff]  }
 0x2c4   : > { %7364 = vpow2.f32 %v5800_v6  ;;  %v5801_v8 = vmul.f32 -1.442695, %v6156_v7 }
 0x2c5   : > { %v3344_v9 = vpop.f32.mrb[12].mxu1  ;;  %v4194_v12 = vpop.f32.mrb[12].mxu0 }
 0x2c6   : > { %v7357_v10 = vpop.eup %7356  ;;  %7366 = vpow2.f32 %v5801_v8  ;;  %v6157_v11 = vadd.f32 %v8509_v16, %v3344_v9  ;;  %v3346_v13 = vpop.f32.mrb[13].mxu1 }
 0x2c7   : > { %v4857_v17 = vadd.f32 1.0, %v7357_v10  ;;  %v5963_v18 = vpop.f32.mrb[13].mxu0  ;;  %v3347_v19 = vpop.f32.mrb[14].mxu1 }
 0x2c8   : > { %v7359_v21 = vpop.eup %7358  ;;  %v6158_v22 = vadd.f32 %v6157_v11, %v4194_v12  ;;  %v6159_v23 = vadd.f32 %v8509_v16, %v3347_v19  ;;  %v4197_v24 = vpop.f32.mrb[14].mxu0 }
 0x2c9   : > { %v3349_v25 = vpop.f32.mrb[15].mxu1  ;;  %7368 = vrcp.f32 %v4857_v17  ;;  %v4858_v26 = vadd.f32 1.0, %v7359_v21  ;;  %v5964_v27 = vpop.f32.mrb[15].mxu0 }
 0x2ca   : > { %v5802_v28 = vmul.f32 -1.442695, %v6158_v22  ;;  %v6160_v29 = vadd.f32 %v6159_v23, %v4197_v24  ;;  %3559 = vmatmul.mubr.bf16.gmra.mrb[120].mxu1 %v7278_v14  ;;  %6070 = vmatmul.mubr.msk.bf16.gmra.mrb[120].mxu0 %vm2709_vm2, %v7279_v15  ;;  %v7290_v22 = vld [vmem:[%s8016_s5 + $0x740] ss:$28 sps:$4 sm:$0xff]   ;;  %v7291_v23 = vld [vmem:[%s8016_s5 + $0x750] ss:$28 sps:$4 sm:$0xff]  }
 0x2cb   : > { %v7361_v30 = vpop.eup %7360  ;;  %7370 = vrcp.f32 %v4858_v26  ;;  %3566 = vmatprep.mubr.bf16.mxu1 %v7280_v20  ;;  %6073 = vmatprep.mubr.msk.bf16.mxu0 %vm7844_vm1, %v7843_v40  ;;  %v7292_v27 = vld [vmem:[%s8016_s5 + $0x77c] ss:$28 sps:$4 sm:$0xff]  }
 0x2cc   : > { %5149 = vst [vmem:[%s8546_s8] sm:$0xff] %v7361_v30  ;;  %7372 = vpow2.f32 %v5802_v28  ;;  %v5803_v31 = vmul.f32 -1.442695, %v6160_v29 }
 0x2cd   : > { %v7363_v32 = vpop.eup %7362  ;;  %v3352_v33 = vpop.f32.mrb[16].mxu1 }
 0x2ce   : > { %v7365_v34 = vpop.eup %7364  ;;  %5150 = vst [vmem:[%s8546_s8 + $0x8] sm:$0xff] %v7363_v32  ;;  %7374 = vpow2.f32 %v5803_v31  ;;  %v6161_v35 = vadd.f32 %v8509_v16, %v3352_v33  ;;  %v4202_v36 = vpop.f32.mrb[16].mxu0 }
 0x2cf   : > { %v3354_v37 = vpop.f32.mrb[17].mxu1  ;;  %v4859_v41 = vadd.f32 1.0, %v7365_v34  ;;  %v5967_v42 = vpop.f32.mrb[17].mxu0 }
 0x2d0   : > { %v3355_v43 = vpop.f32.mrb[18].mxu1  ;;  %v7367_v45 = vpop.eup %7366  ;;  %v6162_v46 = vadd.f32 %v6161_v35, %v4202_v36 }
 0x2d1   : > { %v6163_v47 = vadd.f32 %v8509_v16, %v3355_v43  ;;  %v4205_v48 = vpop.f32.mrb[18].mxu0  ;;  %v3357_v1 = vpop.f32.mrb[19].mxu1  ;;  %7376 = vrcp.f32 %v4859_v41  ;;  %v4860_v49 = vadd.f32 1.0, %v7367_v45 }
 0x2d2   : > { %v5968_v50 = vpop.f32.mrb[19].mxu0  ;;  %v5804_v51 = vmul.f32 -1.442695, %v6162_v46  ;;  %3567 = vmatmul.mubr.bf16.gmra.mrb[124].mxu1 %v7282_v38  ;;  %6074 = vmatmul.mubr.msk.bf16.gmra.mrb[124].mxu0 %vm2709_vm2, %v7283_v39  ;;  %v7294_v46 = vld [vmem:[%s8016_s5 + $0x778] ss:$28 sps:$4 sm:$0xff]  }
 0x2d3   : > { %v6164_v52 = vadd.f32 %v6163_v47, %v4205_v48  ;;  %v7369_v53 = vpop.eup %7368  ;;  %7378 = vrcp.f32 %v4860_v49  ;;  %3574 = vmatprep.mubr.bf16.mxu1 %v7284_v44  ;;  %6077 = vmatprep.mubr.msk.bf16.mxu0 %vm7844_vm1, %v7843_v40  ;;  %v7295_v47 = vld [vmem:[%s8016_s5 + $0x788] ss:$28 sps:$4 sm:$0xff]   ;;  %v7296_v50 = vld [vmem:[%s8016_s5 + $0x7b4] ss:$28 sps:$4 sm:$0xff]  }
 0x2d4   : > { %5151 = vst [vmem:[%s8546_s8 + $0x10] sm:$0xff] %v7369_v53  ;;  %7380 = vpow2.f32 %v5804_v51 }
 0x2d5   : > { %v5805_v54 = vmul.f32 -1.442695, %v6164_v52  ;;  %v7371_v55 = vpop.eup %7370  ;;  %v3360_v56 = vpop.f32.mrb[20].mxu1 }
 0x2d6   : > { %v7373_v57 = vpop.eup %7372  ;;  %5152 = vst [vmem:[%s8546_s8 + $0x18] sm:$0xff] %v7371_v55  ;;  %v6165_v58 = vadd.f32 %v8509_v16, %v3360_v56  ;;  %v4210_v59 = vpop.f32.mrb[20].mxu0 }
 0x2d7   : > { %7382 = vpow2.f32 %v5805_v54  ;;  %v3362_v60 = vpop.f32.mrb[21].mxu1  ;;  %v4861_v63 = vadd.f32 1.0, %v7373_v57  ;;  %v5971_v0 = vpop.f32.mrb[21].mxu0 }
 0x2d8   : > { %v3363_v2 = vpop.f32.mrb[22].mxu1  ;;  %v7375_v4 = vpop.eup %7374  ;;  %v6166_v5 = vadd.f32 %v6165_v58, %v4210_v59 }
 0x2d9   : > { %v6167_v6 = vadd.f32 %v8509_v16, %v3363_v2  ;;  %v4213_v7 = vpop.f32.mrb[22].mxu0  ;;  %v3365_v8 = vpop.f32.mrb[23].mxu1  ;;  %7384 = vrcp.f32 %v4861_v63  ;;  %v4862_v9 = vadd.f32 1.0, %v7375_v4 }
 0x2da   : > { %v5972_v10 = vpop.f32.mrb[23].mxu0  ;;  %v5806_v11 = vmul.f32 -1.442695, %v6166_v5  ;;  %3575 = vmatmul.mubr.bf16.gmra.mrb[128].mxu1 %v7286_v61  ;;  %6078 = vmatmul.mubr.msk.bf16.gmra.mrb[128].mxu0 %vm2709_vm2, %v7287_v62  ;;  %v7298_v5 = vld [vmem:[%s8016_s5 + $0x7b0] ss:$28 sps:$4 sm:$0xff]  }
 0x2db   : > { %v6168_v12 = vadd.f32 %v6167_v6, %v4213_v7  ;;  %v7377_v13 = vpop.eup %7376  ;;  %7386 = vrcp.f32 %v4862_v9  ;;  %3582 = vmatprep.mubr.bf16.mxu1 %v7288_v3  ;;  %6081 = vmatprep.mubr.msk.bf16.mxu0 %vm7844_vm1, %v7843_v40  ;;  %v7299_v6 = vld [vmem:[%s8016_s5 + $0x7c0] ss:$28 sps:$4 sm:$0xff]   ;;  %v7300_v10 = vld [vmem:[%s8016_s5 + $0x7ec] ss:$28 sps:$4 sm:$0xff]  }
 0x2dc   : > { %5153 = vst [vmem:[%s8546_s8 + $0x20] sm:$0xff] %v7377_v13  ;;  %7388 = vpow2.f32 %v5806_v11 }
 0x2dd   : > { %v5807_v14 = vmul.f32 -1.442695, %v6168_v12  ;;  %v7379_v15 = vpop.eup %7378  ;;  %v3368_v17 = vpop.f32.mrb[24].mxu1 }
 0x2de   : > { %v7381_v18 = vpop.eup %7380  ;;  %5154 = vst [vmem:[%s8546_s8 + $0x28] sm:$0xff] %v7379_v15  ;;  %v6169_v19 = vadd.f32 %v8509_v16, %v3368_v17  ;;  %v4218_v20 = vpop.f32.mrb[24].mxu0 }
 0x2df   : > { %7390 = vpow2.f32 %v5807_v14  ;;  %v3370_v21 = vpop.f32.mrb[25].mxu1  ;;  %v4863_v24 = vadd.f32 1.0, %v7381_v18  ;;  %v5975_v25 = vpop.f32.mrb[25].mxu0 }
 0x2e0   : > { %v3371_v26 = vpop.f32.mrb[26].mxu1  ;;  %v6170_v29 = vadd.f32 %v6169_v19, %v4218_v20  ;;  %v4221_v31 = vpop.f32.mrb[26].mxu0 }
 0x2e1   : > { %v7383_v28 = vpop.eup %7382  ;;  %v6171_v30 = vadd.f32 %v8509_v16, %v3371_v26  ;;  %v3373_v32 = vpop.f32.mrb[27].mxu1  ;;  %7392 = vrcp.f32 %v4863_v24 }
 0x2e2   : > { %v4864_v33 = vadd.f32 1.0, %v7383_v28  ;;  %v5976_v34 = vpop.f32.mrb[27].mxu0  ;;  %v5808_v35 = vmul.f32 -1.442695, %v6170_v29  ;;  %3583 = vmatmul.mubr.bf16.gmra.mrb[132].mxu1 %v7290_v22  ;;  %6082 = vmatmul.mubr.msk.bf16.gmra.mrb[132].mxu0 %vm2709_vm2, %v7291_v23  ;;  %v7302_v29 = vld [vmem:[%s8016_s5 + $0x7e8] ss:$28 sps:$4 sm:$0xff]  }
 0x2e3   : > { %v6172_v36 = vadd.f32 %v6171_v30, %v4221_v31  ;;  %v7385_v37 = vpop.eup %7384  ;;  %3590 = vmatprep.mubr.bf16.mxu1 %v7292_v27  ;;  %6085 = vmatprep.mubr.msk.bf16.mxu0 %vm7844_vm1, %v7843_v40  ;;  %v7303_v30 = vld [vmem:[%s8016_s5 + $0x7f8] ss:$28 sps:$4 sm:$0xff]   ;;  %v7304_v34 = vld [vmem:[%s8016_s5 + $0x824] ss:$28 sps:$4 sm:$0xff]  }
 0x2e4   : > { %7394 = vrcp.f32 %v4864_v33  ;;  %5155 = vst [vmem:[%s8546_s8 + $0x30] sm:$0xff] %v7385_v37 }
 0x2e5   : > { %7396 = vpow2.f32 %v5808_v35  ;;  %v5809_v38 = vmul.f32 -1.442695, %v6172_v36  ;;  %v7387_v39 = vpop.eup %7386  ;;  %v3376_v41 = vpop.f32.mrb[28].mxu1 }
 0x2e6   : > { %v7389_v42 = vpop.eup %7388  ;;  %5156 = vst [vmem:[%s8546_s8 + $0x38] sm:$0xff] %v7387_v39  ;;  %v6173_v43 = vadd.f32 %v8509_v16, %v3376_v41  ;;  %v4226_v44 = vpop.f32.mrb[28].mxu0 }
 0x2e7   : > { %7398 = vpow2.f32 %v5809_v38  ;;  %v3378_v45 = vpop.f32.mrb[29].mxu1  ;;  %v4865_v48 = vadd.f32 1.0, %v7389_v42  ;;  %v5979_v1 = vpop.f32.mrb[29].mxu0 }
 0x2e8   : > { %v3379_v49 = vpop.f32.mrb[30].mxu1  ;;  %v6174_v52 = vadd.f32 %v6173_v43, %v4226_v44  ;;  %v4229_v54 = vpop.f32.mrb[30].mxu0 }
 0x2e9   : > { %v7391_v51 = vpop.eup %7390  ;;  %v6175_v53 = vadd.f32 %v8509_v16, %v3379_v49  ;;  %v3381_v55 = vpop.f32.mrb[31].mxu1  ;;  %7400 = vrcp.f32 %v4865_v48 }
 0x2ea   : > { %v4866_v56 = vadd.f32 1.0, %v7391_v51  ;;  %v5980_v57 = vpop.f32.mrb[31].mxu0  ;;  %v5810_v58 = vmul.f32 -1.442695, %v6174_v52  ;;  %3591 = vmatmul.mubr.bf16.gmra.mrb[136].mxu1 %v7294_v46  ;;  %6086 = vmatmul.mubr.msk.bf16.gmra.mrb[136].mxu0 %vm2709_vm2, %v7295_v47  ;;  %v7306_v52 = vld [vmem:[%s8016_s5 + $0x820] ss:$28 sps:$4 sm:$0xff]  }
 0x2eb   : > { %v6176_v59 = vadd.f32 %v6175_v53, %v4229_v54  ;;  %v7393_v60 = vpop.eup %7392  ;;  %3598 = vmatprep.mubr.bf16.mxu1 %v7296_v50  ;;  %6089 = vmatprep.mubr.msk.bf16.mxu0 %vm7844_vm1, %v7843_v40  ;;  %v7307_v53 = vld [vmem:[%s8016_s5 + $0x830] ss:$28 sps:$4 sm:$0xff]   ;;  %v7308_v57 = vld [vmem:[%s8016_s5 + $0x85c] ss:$28 sps:$4 sm:$0xff]  }
 0x2ec   : > { %7402 = vrcp.f32 %v4866_v56  ;;  %5157 = vst [vmem:[%s8546_s8 + $0x40] sm:$0xff] %v7393_v60 }
 0x2ed   : > { %7404 = vpow2.f32 %v5810_v58  ;;  %v5811_v61 = vmul.f32 -1.442695, %v6176_v59  ;;  %v3384_v63 = vpop.f32.mrb[32].mxu1  ;;  %v4234_v3 = vpop.f32.mrb[32].mxu0 }
 0x2ee   : > { %v7395_v62 = vpop.eup %7394  ;;  %v6177_v2 = vadd.f32 %v8509_v16, %v3384_v63  ;;  %v3386_v4 = vpop.f32.mrb[33].mxu1 }
 0x2ef   : > { %v7397_v0 = vpop.eup %7396  ;;  %5158 = vst [vmem:[%s8546_s8 + $0x48] sm:$0xff] %v7395_v62  ;;  %7406 = vpow2.f32 %v5811_v61  ;;  %v5983_v8 = vpop.f32.mrb[33].mxu0 }
 0x2f0   : > { %v4867_v7 = vadd.f32 1.0, %v7397_v0  ;;  %v3387_v9 = vpop.f32.mrb[34].mxu1  ;;  %v6178_v12 = vadd.f32 %v6177_v2, %v4234_v3  ;;  %v4237_v14 = vpop.f32.mrb[34].mxu0 }
 0x2f1   : > { %v7399_v11 = vpop.eup %7398  ;;  %v6179_v13 = vadd.f32 %v8509_v16, %v3387_v9  ;;  %v3389_v15 = vpop.f32.mrb[35].mxu1 }
 0x2f2   : > { %7408 = vrcp.f32 %v4867_v7  ;;  %v4868_v17 = vadd.f32 1.0, %v7399_v11  ;;  %v5984_v18 = vpop.f32.mrb[35].mxu0  ;;  %v5812_v19 = vmul.f32 -1.442695, %v6178_v12  ;;  %3599 = vmatmul.mubr.bf16.gmra.mrb[140].mxu1 %v7298_v5  ;;  %6090 = vmatmul.mubr.msk.bf16.gmra.mrb[140].mxu0 %vm2709_vm2, %v7299_v6  ;;  %v7310_v12 = vld [vmem:[%s8016_s5 + $0x858] ss:$28 sps:$4 sm:$0xff]  }
 0x2f3   : > { %v6180_v20 = vadd.f32 %v6179_v13, %v4237_v14  ;;  %v7401_v21 = vpop.eup %7400  ;;  %3606 = vmatprep.mubr.bf16.mxu1 %v7300_v10  ;;  %6093 = vmatprep.mubr.msk.bf16.mxu0 %vm7844_vm1, %v7843_v40  ;;  %v7311_v13 = vld [vmem:[%s8016_s5 + $0x868] ss:$28 sps:$4 sm:$0xff]   ;;  %v7312_v18 = vld [vmem:[%s8016_s5 + $0x894] ss:$28 sps:$4 sm:$0xff]  }
 0x2f4   : > { %7410 = vrcp.f32 %v4868_v17  ;;  %5159 = vst [vmem:[%s8546_s8 + $0x50] sm:$0xff] %v7401_v21 }
 0x2f5   : > { %7412 = vpow2.f32 %v5812_v19  ;;  %v5813_v22 = vmul.f32 -1.442695, %v6180_v20  ;;  %v3392_v24 = vpop.f32.mrb[36].mxu1  ;;  %v4242_v27 = vpop.f32.mrb[36].mxu0 }
 0x2f6   : > { %v7403_v23 = vpop.eup %7402  ;;  %v6181_v26 = vadd.f32 %v8509_v16, %v3392_v24  ;;  %v3394_v28 = vpop.f32.mrb[37].mxu1 }
 0x2f7   : > { %v7405_v25 = vpop.eup %7404  ;;  %5160 = vst [vmem:[%s8546_s8 + $0x58] sm:$0xff] %v7403_v23  ;;  %7414 = vpow2.f32 %v5813_v22  ;;  %v5987_v32 = vpop.f32.mrb[37].mxu0 }
 0x2f8   : > { %v4869_v31 = vadd.f32 1.0, %v7405_v25  ;;  %v3395_v33 = vpop.f32.mrb[38].mxu1  ;;  %v6182_v36 = vadd.f32 %v6181_v26, %v4242_v27  ;;  %v4245_v38 = vpop.f32.mrb[38].mxu0 }
 0x2f9   : > { %v7407_v35 = vpop.eup %7406  ;;  %v6183_v37 = vadd.f32 %v8509_v16, %v3395_v33  ;;  %v3397_v39 = vpop.f32.mrb[39].mxu1 }
 0x2fa   : > { %7416 = vrcp.f32 %v4869_v31  ;;  %v4870_v41 = vadd.f32 1.0, %v7407_v35  ;;  %v5988_v42 = vpop.f32.mrb[39].mxu0  ;;  %v5814_v43 = vmul.f32 -1.442695, %v6182_v36  ;;  %3607 = vmatmul.mubr.bf16.gmra.mrb[144].mxu1 %v7302_v29  ;;  %6094 = vmatmul.mubr.msk.bf16.gmra.mrb[144].mxu0 %vm2709_vm2, %v7303_v30  ;;  %v7314_v36 = vld [vmem:[%s8016_s5 + $0x890] ss:$28 sps:$4 sm:$0xff]  }
 0x2fb   : > { %v6184_v44 = vadd.f32 %v6183_v37, %v4245_v38  ;;  %3614 = vmatprep.mubr.bf16.mxu1 %v7304_v34  ;;  %6097 = vmatprep.mubr.msk.bf16.mxu0 %vm7844_vm1, %v7843_v40  ;;  %v7315_v37 = vld [vmem:[%s8016_s5 + $0x8a0] ss:$28 sps:$4 sm:$0xff]   ;;  %v7316_v42 = vld [vmem:[%s8016_s5 + $0x8cc] ss:$28 sps:$4 sm:$0xff]  }
 0x2fc   : > { %v7409_v45 = vpop.eup %7408  ;;  %7418 = vrcp.f32 %v4870_v41 }
 0x2fd   : > { %5161 = vst [vmem:[%s8546_s8 + $0x60] sm:$0xff] %v7409_v45  ;;  %7420 = vpow2.f32 %v5814_v43  ;;  %v5815_v46 = vmul.f32 -1.442695, %v6184_v44  ;;  %v3400_v48 = vpop.f32.mrb[40].mxu1  ;;  %v4250_v50 = vpop.f32.mrb[40].mxu0 }
 0x2fe   : > { %v7411_v47 = vpop.eup %7410  ;;  %v6185_v49 = vadd.f32 %v8509_v16, %v3400_v48  ;;  %v3402_v51 = vpop.f32.mrb[41].mxu1 }
 0x2ff   : > { %v7413_v1 = vpop.eup %7412  ;;  %5162 = vst [vmem:[%s8546_s8 + $0x68] sm:$0xff] %v7411_v47  ;;  %7422 = vpow2.f32 %v5815_v46  ;;  %v5991_v55 = vpop.f32.mrb[41].mxu0 }
 0x300   : > { %v4871_v54 = vadd.f32 1.0, %v7413_v1  ;;  %v3403_v56 = vpop.f32.mrb[42].mxu1  ;;  %v6186_v59 = vadd.f32 %v6185_v49, %v4250_v50  ;;  %v4253_v61 = vpop.f32.mrb[42].mxu0 }
 0x301   : > { %v7415_v58 = vpop.eup %7414  ;;  %v6187_v60 = vadd.f32 %v8509_v16, %v3403_v56  ;;  %v3405_v62 = vpop.f32.mrb[43].mxu1 }
 0x302   : > { %7424 = vrcp.f32 %v4871_v54  ;;  %v4872_v63 = vadd.f32 1.0, %v7415_v58  ;;  %v5992_v0 = vpop.f32.mrb[43].mxu0  ;;  %v5816_v2 = vmul.f32 -1.442695, %v6186_v59  ;;  %3615 = vmatmul.mubr.bf16.gmra.mrb[148].mxu1 %v7306_v52  ;;  %6098 = vmatmul.mubr.msk.bf16.gmra.mrb[148].mxu0 %vm2709_vm2, %v7307_v53  ;;  %v7318_v59 = vld [vmem:[%s8016_s5 + $0x8c8] ss:$28 sps:$4 sm:$0xff]  }
 0x303   : > { %v6188_v3 = vadd.f32 %v6187_v60, %v4253_v61  ;;  %3622 = vmatprep.mubr.bf16.mxu1 %v7308_v57  ;;  %6101 = vmatprep.mubr.msk.bf16.mxu0 %vm7844_vm1, %v7843_v40  ;;  %v7319_v60 = vld [vmem:[%s8016_s5 + $0x8d8] ss:$28 sps:$4 sm:$0xff]   ;;  %v7320_v0 = vld [vmem:[%s8016_s5 + $0x904] ss:$28 sps:$4 sm:$0xff]  }
 0x304   : > { %v7417_v4 = vpop.eup %7416  ;;  %7426 = vrcp.f32 %v4872_v63 }
 0x305   : > { %5163 = vst [vmem:[%s8546_s8 + $0x70] sm:$0xff] %v7417_v4  ;;  %7428 = vpow2.f32 %v5816_v2  ;;  %v5817_v5 = vmul.f32 -1.442695, %v6188_v3  ;;  %v3408_v7 = vpop.f32.mrb[44].mxu1  ;;  %v4258_v10 = vpop.f32.mrb[44].mxu0 }
 0x306   : > { %v7419_v6 = vpop.eup %7418  ;;  %v6189_v9 = vadd.f32 %v8509_v16, %v3408_v7  ;;  %v3410_v11 = vpop.f32.mrb[45].mxu1 }
 0x307   : > { %v7421_v8 = vpop.eup %7420  ;;  %5164 = vst [vmem:[%s8546_s8 + $0x78] sm:$0xff] %v7419_v6  ;;  %7430 = vpow2.f32 %v5817_v5  ;;  %v5995_v15 = vpop.f32.mrb[45].mxu0 }
 0x308   : > { %v4873_v14 = vadd.f32 1.0, %v7421_v8  ;;  %v3411_v17 = vpop.f32.mrb[46].mxu1  ;;  %v6190_v20 = vadd.f32 %v6189_v9, %v4258_v10  ;;  %v4261_v22 = vpop.f32.mrb[46].mxu0 }
 0x309   : > { %v7423_v19 = vpop.eup %7422  ;;  %v6191_v21 = vadd.f32 %v8509_v16, %v3411_v17  ;;  %v3413_v23 = vpop.f32.mrb[47].mxu1 }
 0x30a   : > { %7432 = vrcp.f32 %v4873_v14  ;;  %v4874_v24 = vadd.f32 1.0, %v7423_v19  ;;  %v5996_v25 = vpop.f32.mrb[47].mxu0  ;;  %v5818_v26 = vmul.f32 -1.442695, %v6190_v20  ;;  %3623 = vmatmul.mubr.bf16.gmra.mrb[152].mxu1 %v7310_v12  ;;  %6102 = vmatmul.mubr.msk.bf16.gmra.mrb[152].mxu0 %vm2709_vm2, %v7311_v13  ;;  %v7322_v20 = vld [vmem:[%s8016_s5 + $0x900] ss:$28 sps:$4 sm:$0xff]  }
 0x30b   : > { %v6192_v27 = vadd.f32 %v6191_v21, %v4261_v22  ;;  %3630 = vmatprep.mubr.bf16.mxu1 %v7312_v18  ;;  %6105 = vmatprep.mubr.msk.bf16.mxu0 %vm7844_vm1, %v7843_v40  ;;  %v7323_v21 = vld [vmem:[%s8016_s5 + $0x910] ss:$28 sps:$4 sm:$0xff]   ;;  %v7324_v25 = vld [vmem:[%s8016_s5 + $0x93c] ss:$28 sps:$4 sm:$0xff]  }
 0x30c   : > { %v7425_v28 = vpop.eup %7424  ;;  %7434 = vrcp.f32 %v4874_v24 }
 0x30d   : > { %5165 = vst [vmem:[%s8546_s8 + $0x80] sm:$0xff] %v7425_v28  ;;  %7436 = vpow2.f32 %v5818_v26  ;;  %v5819_v29 = vmul.f32 -1.442695, %v6192_v27  ;;  %v3416_v31 = vpop.f32.mrb[48].mxu1  ;;  %v4266_v34 = vpop.f32.mrb[48].mxu0 }
 0x30e   : > { %v7427_v30 = vpop.eup %7426  ;;  %v6193_v33 = vadd.f32 %v8509_v16, %v3416_v31  ;;  %v3418_v35 = vpop.f32.mrb[49].mxu1 }
 0x30f   : > { %v7429_v32 = vpop.eup %7428  ;;  %5166 = vst [vmem:[%s8546_s8 + $0x88] sm:$0xff] %v7427_v30  ;;  %7438 = vpow2.f32 %v5819_v29  ;;  %v5999_v39 = vpop.f32.mrb[49].mxu0 }
 0x310   : > { %v4875_v38 = vadd.f32 1.0, %v7429_v32  ;;  %v3419_v41 = vpop.f32.mrb[50].mxu1  ;;  %v6194_v44 = vadd.f32 %v6193_v33, %v4266_v34  ;;  %v4269_v46 = vpop.f32.mrb[50].mxu0 }
 0x311   : > { %v7431_v43 = vpop.eup %7430  ;;  %v6195_v45 = vadd.f32 %v8509_v16, %v3419_v41  ;;  %v3421_v47 = vpop.f32.mrb[51].mxu1 }
 0x312   : > { %7440 = vrcp.f32 %v4875_v38  ;;  %v4876_v48 = vadd.f32 1.0, %v7431_v43  ;;  %v6000_v1 = vpop.f32.mrb[51].mxu0  ;;  %v5820_v49 = vmul.f32 -1.442695, %v6194_v44  ;;  %3631 = vmatmul.mubr.bf16.gmra.mrb[156].mxu1 %v7314_v36  ;;  %6106 = vmatmul.mubr.msk.bf16.gmra.mrb[156].mxu0 %vm2709_vm2, %v7315_v37  ;;  %v7326_v44 = vld [vmem:[%s8016_s5 + $0x938] ss:$28 sps:$4 sm:$0xff]  }
 0x313   : > { %v6196_v50 = vadd.f32 %v6195_v45, %v4269_v46  ;;  %3638 = vmatprep.mubr.bf16.mxu1 %v7316_v42  ;;  %6109 = vmatprep.mubr.msk.bf16.mxu0 %vm7844_vm1, %v7843_v40  ;;  %v7327_v45 = vld [vmem:[%s8016_s5 + $0x948] ss:$28 sps:$4 sm:$0xff]   ;;  %v7328_v1 = vld [vmem:[%s8016_s5 + $0x974] ss:$28 sps:$4 sm:$0xff]  }
 0x314   : > { %v7433_v51 = vpop.eup %7432  ;;  %7442 = vrcp.f32 %v4876_v48 }
 0x315   : > { %5167 = vst [vmem:[%s8546_s8 + $0x90] sm:$0xff] %v7433_v51  ;;  %7444 = vpow2.f32 %v5820_v49  ;;  %v5821_v52 = vmul.f32 -1.442695, %v6196_v50  ;;  %v3424_v54 = vpop.f32.mrb[52].mxu1  ;;  %v4274_v57 = vpop.f32.mrb[52].mxu0 }
 0x316   : > { %v7435_v53 = vpop.eup %7434  ;;  %v6197_v56 = vadd.f32 %v8509_v16, %v3424_v54  ;;  %v3426_v58 = vpop.f32.mrb[53].mxu1 }
 0x317   : > { %v7437_v55 = vpop.eup %7436  ;;  %5168 = vst [vmem:[%s8546_s8 + $0x98] sm:$0xff] %v7435_v53  ;;  %7446 = vpow2.f32 %v5821_v52  ;;  %v6003_v62 = vpop.f32.mrb[53].mxu0 }
 0x318   : > { %v4877_v61 = vadd.f32 1.0, %v7437_v55  ;;  %v3427_v63 = vpop.f32.mrb[54].mxu1  ;;  %v6198_v3 = vadd.f32 %v6197_v56, %v4274_v57  ;;  %v4277_v5 = vpop.f32.mrb[54].mxu0  ;;  %v8675_v62 = vld [vmem:[%s8919_s2] ss:$0 sm:$0xff] }
 0x319   : > { %v7439_v2 = vpop.eup %7438  ;;  %v6199_v4 = vadd.f32 %v8509_v16, %v3427_v63  ;;  %v3429_v6 = vpop.f32.mrb[55].mxu1 }
 0x31a   : > { %7448 = vrcp.f32 %v4877_v61  ;;  %v4878_v7 = vadd.f32 1.0, %v7439_v2  ;;  %v6004_v8 = vpop.f32.mrb[55].mxu0  ;;  %v5822_v9 = vmul.f32 -1.442695, %v6198_v3  ;;  %3639 = vmatmul.mubr.bf16.gmra.mrb[160].mxu1 %v7318_v59  ;;  %6110 = vmatmul.mubr.msk.bf16.gmra.mrb[160].mxu0 %vm2709_vm2, %v7319_v60  ;;  %v7330_v3 = vld [vmem:[%s8016_s5 + $0x970] ss:$28 sps:$4 sm:$0xff]  }
 0x31b   : > { %v6200_v10 = vadd.f32 %v6199_v4, %v4277_v5  ;;  %3646 = vmatprep.mubr.bf16.mxu1 %v7320_v0  ;;  %6113 = vmatprep.mubr.msk.bf16.mxu0 %vm7844_vm1, %v7843_v40  ;;  %v7331_v4 = vld [vmem:[%s8016_s5 + $0x980] ss:$28 sps:$4 sm:$0xff]   ;;  %v7332_v8 = vld [vmem:[%s8016_s5 + $0x9ac] ss:$28 sps:$4 sm:$0xff]  }
 0x31c   : > { %v7441_v11 = vpop.eup %7440  ;;  %7450 = vrcp.f32 %v4878_v7 }
 0x31d   : > { %5169 = vst [vmem:[%s8546_s8 + $0xa0] sm:$0xff] %v7441_v11  ;;  %7452 = vpow2.f32 %v5822_v9  ;;  %v5823_v12 = vmul.f32 -1.442695, %v6200_v10  ;;  %v3432_v14 = vpop.f32.mrb[56].mxu1  ;;  %v4282_v18 = vpop.f32.mrb[56].mxu0 }
 0x31e   : > { %v7443_v13 = vpop.eup %7442  ;;  %v6201_v17 = vadd.f32 %v8509_v16, %v3432_v14  ;;  %v3434_v19 = vpop.f32.mrb[57].mxu1 }
 0x31f   : > { %v7445_v15 = vpop.eup %7444  ;;  %5170 = vst [vmem:[%s8546_s8 + $0xa8] sm:$0xff] %v7443_v13  ;;  %7454 = vpow2.f32 %v5823_v12  ;;  %v6007_v23 = vpop.f32.mrb[57].mxu0 }
 0x320   : > { %v4879_v22 = vadd.f32 1.0, %v7445_v15  ;;  %v3435_v24 = vpop.f32.mrb[58].mxu1  ;;  %v6202_v27 = vadd.f32 %v6201_v17, %v4282_v18  ;;  %v4285_v29 = vpop.f32.mrb[58].mxu0 }
 0x321   : > { %v7447_v26 = vpop.eup %7446  ;;  %v6203_v28 = vadd.f32 %v8509_v16, %v3435_v24  ;;  %v3437_v30 = vpop.f32.mrb[59].mxu1 }
 0x322   : > { %7456 = vrcp.f32 %v4879_v22  ;;  %v4880_v31 = vadd.f32 1.0, %v7447_v26  ;;  %v6008_v32 = vpop.f32.mrb[59].mxu0  ;;  %v5824_v33 = vmul.f32 -1.442695, %v6202_v27  ;;  %3647 = vmatmul.mubr.bf16.gmra.mrb[164].mxu1 %v7322_v20  ;;  %6114 = vmatmul.mubr.msk.bf16.gmra.mrb[164].mxu0 %vm2709_vm2, %v7323_v21  ;;  %v7334_v27 = vld [vmem:[%s8016_s5 + $0x9a8] ss:$28 sps:$4 sm:$0xff]  }
 0x323   : > { %v6204_v34 = vadd.f32 %v6203_v28, %v4285_v29  ;;  %3654 = vmatprep.mubr.bf16.mxu1 %v7324_v25  ;;  %6117 = vmatprep.mubr.msk.bf16.mxu0 %vm7844_vm1, %v7843_v40  ;;  %v7335_v28 = vld [vmem:[%s8016_s5 + $0x9b8] ss:$28 sps:$4 sm:$0xff]   ;;  %v7336_v32 = vld [vmem:[%s8016_s5 + $0x9e4] ss:$28 sps:$4 sm:$0xff]  }
 0x324   : > { %v7449_v35 = vpop.eup %7448  ;;  %7458 = vrcp.f32 %v4880_v31 }
 0x325   : > { %5171 = vst [vmem:[%s8546_s8 + $0xb0] sm:$0xff] %v7449_v35  ;;  %7460 = vpow2.f32 %v5824_v33  ;;  %v5825_v36 = vmul.f32 -1.442695, %v6204_v34  ;;  %v3440_v38 = vpop.f32.mrb[60].mxu1  ;;  %v4290_v42 = vpop.f32.mrb[60].mxu0 }
 0x326   : > { %v7451_v37 = vpop.eup %7450  ;;  %v6205_v41 = vadd.f32 %v8509_v16, %v3440_v38  ;;  %v3442_v43 = vpop.f32.mrb[61].mxu1 }
 0x327   : > { %v7453_v39 = vpop.eup %7452  ;;  %5172 = vst [vmem:[%s8546_s8 + $0xb8] sm:$0xff] %v7451_v37  ;;  %7462 = vpow2.f32 %v5825_v36  ;;  %v6011_v47 = vpop.f32.mrb[61].mxu0 }
 0x328   : > { %v4881_v46 = vadd.f32 1.0, %v7453_v39  ;;  %v3443_v48 = vpop.f32.mrb[62].mxu1  ;;  %v6206_v50 = vadd.f32 %v6205_v41, %v4290_v42  ;;  %v4293_v52 = vpop.f32.mrb[62].mxu0 }
 0x329   : > { %v7455_v49 = vpop.eup %7454  ;;  %v6207_v51 = vadd.f32 %v8509_v16, %v3443_v48  ;;  %v3445_v53 = vpop.f32.mrb[63].mxu1 }
 0x32a   : > { %7464 = vrcp.f32 %v4881_v46  ;;  %v4882_v54 = vadd.f32 1.0, %v7455_v49  ;;  %v6012_v55 = vpop.f32.mrb[63].mxu0  ;;  %v5826_v56 = vmul.f32 -1.442695, %v6206_v50  ;;  %3655 = vmatmul.mubr.bf16.gmra.mrb[168].mxu1 %v7326_v44  ;;  %6118 = vmatmul.mubr.msk.bf16.gmra.mrb[168].mxu0 %vm2709_vm2, %v7327_v45  ;;  %v7338_v50 = vld [vmem:[%s8016_s5 + $0x9e0] ss:$28 sps:$4 sm:$0xff]  }
 0x32b   : > { %v6208_v57 = vadd.f32 %v6207_v51, %v4293_v52  ;;  %3662 = vmatprep.mubr.bf16.mxu1 %v7328_v1  ;;  %6121 = vmatprep.mubr.msk.bf16.mxu0 %vm7844_vm1, %v7843_v40  ;;  %v7339_v51 = vld [vmem:[%s8016_s5 + $0x9f0] ss:$28 sps:$4 sm:$0xff]   ;;  %v7340_v55 = vld [vmem:[%s8016_s5 + $0xa1c] ss:$28 sps:$4 sm:$0xff]  }
 0x32c   : > { %v7457_v58 = vpop.eup %7456  ;;  %7466 = vrcp.f32 %v4882_v54 }
 0x32d   : > { %5173 = vst [vmem:[%s8546_s8 + $0xc0] sm:$0xff] %v7457_v58  ;;  %7468 = vpow2.f32 %v5826_v56  ;;  %v5827_v59 = vmul.f32 -1.442695, %v6208_v57  ;;  %v3448_v60 = vpop.f32.mrb[64].mxu1  ;;  %v4298_v0 = vpop.f32.mrb[64].mxu0 }
 0x32e   : > { %v7459_v16 = vpop.eup %7458  ;;  %v6209_v63 = vadd.f32 %v8675_v62, %v3448_v60  ;;  %v3450_v2 = vpop.f32.mrb[65].mxu1 }
 0x32f   : > { %v7461_v61 = vpop.eup %7460  ;;  %5174 = vst [vmem:[%s8546_s8 + $0xc8] sm:$0xff] %v7459_v16  ;;  %7470 = vpow2.f32 %v5827_v59  ;;  %v6015_v6 = vpop.f32.mrb[65].mxu0 }
 0x330   : > { %v4883_v5 = vadd.f32 1.0, %v7461_v61  ;;  %v3451_v7 = vpop.f32.mrb[66].mxu1  ;;  %v6210_v10 = vadd.f32 %v6209_v63, %v4298_v0  ;;  %v4301_v12 = vpop.f32.mrb[66].mxu0 }
 0x331   : > { %v7463_v9 = vpop.eup %7462  ;;  %v6211_v11 = vadd.f32 %v8675_v62, %v3451_v7  ;;  %v3453_v13 = vpop.f32.mrb[67].mxu1 }
 0x332   : > { %7472 = vrcp.f32 %v4883_v5  ;;  %v4884_v14 = vadd.f32 1.0, %v7463_v9  ;;  %v6016_v15 = vpop.f32.mrb[67].mxu0  ;;  %v5828_v17 = vmul.f32 -1.442695, %v6210_v10  ;;  %3663 = vmatmul.mubr.bf16.gmra.mrb[172].mxu1 %v7330_v3  ;;  %6122 = vmatmul.mubr.msk.bf16.gmra.mrb[172].mxu0 %vm2709_vm2, %v7331_v4  ;;  %v7342_v10 = vld [vmem:[%s8016_s5 + $0xa18] ss:$28 sps:$4 sm:$0xff]  }
 0x333   : > { %v6212_v18 = vadd.f32 %v6211_v11, %v4301_v12  ;;  %3670 = vmatprep.mubr.bf16.mxu1 %v7332_v8  ;;  %6125 = vmatprep.mubr.msk.bf16.mxu0 %vm7844_vm1, %v7843_v40  ;;  %v7343_v11 = vld [vmem:[%s8016_s5 + $0xa28] ss:$28 sps:$4 sm:$0xff]   ;;  %v7344_v15 = vld [vmem:[%s8016_s5 + $0xa54] ss:$28 sps:$4 sm:$0xff]  }
 0x334   : > { %v7465_v19 = vpop.eup %7464  ;;  %7474 = vrcp.f32 %v4884_v14 }
 0x335   : > { %5175 = vst [vmem:[%s8546_s8 + $0xd0] sm:$0xff] %v7465_v19  ;;  %7476 = vpow2.f32 %v5828_v17  ;;  %v5829_v20 = vmul.f32 -1.442695, %v6212_v18  ;;  %v3456_v22 = vpop.f32.mrb[68].mxu1  ;;  %v4306_v25 = vpop.f32.mrb[68].mxu0 }
 0x336   : > { %v7467_v21 = vpop.eup %7466  ;;  %v6213_v24 = vadd.f32 %v8675_v62, %v3456_v22  ;;  %v3458_v26 = vpop.f32.mrb[69].mxu1 }
 0x337   : > { %v7469_v23 = vpop.eup %7468  ;;  %5176 = vst [vmem:[%s8546_s8 + $0xd8] sm:$0xff] %v7467_v21  ;;  %7478 = vpow2.f32 %v5829_v20  ;;  %v6019_v30 = vpop.f32.mrb[69].mxu0 }
 0x338   : > { %v4885_v29 = vadd.f32 1.0, %v7469_v23  ;;  %v3459_v31 = vpop.f32.mrb[70].mxu1  ;;  %v6214_v34 = vadd.f32 %v6213_v24, %v4306_v25  ;;  %v4309_v36 = vpop.f32.mrb[70].mxu0 }
 0x339   : > { %v7471_v33 = vpop.eup %7470  ;;  %v6215_v35 = vadd.f32 %v8675_v62, %v3459_v31  ;;  %v3461_v37 = vpop.f32.mrb[71].mxu1 }
 0x33a   : > { %7480 = vrcp.f32 %v4885_v29  ;;  %v4886_v38 = vadd.f32 1.0, %v7471_v33  ;;  %v6020_v39 = vpop.f32.mrb[71].mxu0  ;;  %v5830_v41 = vmul.f32 -1.442695, %v6214_v34  ;;  %3671 = vmatmul.mubr.bf16.gmra.mrb[176].mxu1 %v7334_v27  ;;  %6126 = vmatmul.mubr.msk.bf16.gmra.mrb[176].mxu0 %vm2709_vm2, %v7335_v28  ;;  %v7346_v34 = vld [vmem:[%s8016_s5 + $0xa50] ss:$28 sps:$4 sm:$0xff]  }
 0x33b   : > { %v6216_v42 = vadd.f32 %v6215_v35, %v4309_v36  ;;  %3678 = vmatprep.mubr.bf16.mxu1 %v7336_v32  ;;  %6129 = vmatprep.mubr.msk.bf16.mxu0 %vm7844_vm1, %v7843_v40  ;;  %v7347_v35 = vld [vmem:[%s8016_s5 + $0xa60] ss:$28 sps:$4 sm:$0xff]   ;;  %v7348_v39 = vld [vmem:[%s8016_s5 + $0xa8c] ss:$28 sps:$4 sm:$0xff]  }
 0x33c   : > { %v7473_v43 = vpop.eup %7472  ;;  %7482 = vrcp.f32 %v4886_v38 }
 0x33d   : > { %5177 = vst [vmem:[%s8546_s8 + $0xe0] sm:$0xff] %v7473_v43  ;;  %7484 = vpow2.f32 %v5830_v41  ;;  %v5831_v44 = vmul.f32 -1.442695, %v6216_v42  ;;  %v3464_v46 = vpop.f32.mrb[72].mxu1  ;;  %v4314_v1 = vpop.f32.mrb[72].mxu0 }
 0x33e   : > { %v7475_v45 = vpop.eup %7474  ;;  %v6217_v48 = vadd.f32 %v8675_v62, %v3464_v46  ;;  %v3466_v49 = vpop.f32.mrb[73].mxu1 }
 0x33f   : > { %v7477_v47 = vpop.eup %7476  ;;  %5178 = vst [vmem:[%s8546_s8 + $0xe8] sm:$0xff] %v7475_v45  ;;  %7486 = vpow2.f32 %v5831_v44  ;;  %v6023_v53 = vpop.f32.mrb[73].mxu0 }
 0x340   : > { %v4887_v52 = vadd.f32 1.0, %v7477_v47  ;;  %v3467_v54 = vpop.f32.mrb[74].mxu1  ;;  %v6218_v57 = vadd.f32 %v6217_v48, %v4314_v1  ;;  %v4317_v59 = vpop.f32.mrb[74].mxu0 }
 0x341   : > { %v7479_v56 = vpop.eup %7478  ;;  %v6219_v58 = vadd.f32 %v8675_v62, %v3467_v54  ;;  %v3469_v16 = vpop.f32.mrb[75].mxu1 }
 0x342   : > { %7488 = vrcp.f32 %v4887_v52  ;;  %v4888_v60 = vadd.f32 1.0, %v7479_v56  ;;  %v6024_v61 = vpop.f32.mrb[75].mxu0  ;;  %v5832_v63 = vmul.f32 -1.442695, %v6218_v57  ;;  %3679 = vmatmul.mubr.bf16.gmra.mrb[180].mxu1 %v7338_v50  ;;  %6130 = vmatmul.mubr.msk.bf16.gmra.mrb[180].mxu0 %vm2709_vm2, %v7339_v51  ;;  %v7350_v57 = vld [vmem:[%s8016_s5 + $0xa88] ss:$28 sps:$4 sm:$0xff]  }
 0x343   : > { %v6220_v0 = vadd.f32 %v6219_v58, %v4317_v59  ;;  %3686 = vmatprep.mubr.bf16.mxu1 %v7340_v55  ;;  %6133 = vmatprep.mubr.msk.bf16.mxu0 %vm7844_vm1, %v7843_v40 }
 0x344   : > { %v7481_v2 = vpop.eup %7480  ;;  %7490 = vrcp.f32 %v4888_v60  ;;  %v7351_v60 = vld [vmem:[%s8016_s5 + $0xa98] ss:$28 sps:$4 sm:$0xff]  }
 0x345   : > { %5179 = vst [vmem:[%s8546_s8 + $0xf0] sm:$0xff] %v7481_v2  ;;  %7492 = vpow2.f32 %v5832_v63  ;;  %v5833_v3 = vmul.f32 -1.442695, %v6220_v0  ;;  %v3472_v5 = vpop.f32.mrb[76].mxu1  ;;  %v4322_v8 = vpop.f32.mrb[76].mxu0 }
 0x346   : > { %v7483_v4 = vpop.eup %7482  ;;  %v6221_v7 = vadd.f32 %v8675_v62, %v3472_v5  ;;  %v3474_v9 = vpop.f32.mrb[77].mxu1 }
 0x347   : > { %v7485_v6 = vpop.eup %7484  ;;  %5180 = vst [vmem:[%s8546_s8 + $0xf8] sm:$0xff] %v7483_v4  ;;  %7494 = vpow2.f32 %v5833_v3  ;;  %v6027_v13 = vpop.f32.mrb[77].mxu0 }
 0x348   : > { %v4889_v12 = vadd.f32 1.0, %v7485_v6  ;;  %v3475_v14 = vpop.f32.mrb[78].mxu1  ;;  %v6222_v18 = vadd.f32 %v6221_v7, %v4322_v8  ;;  %v4325_v20 = vpop.f32.mrb[78].mxu0 }
 0x349   : > { %v7487_v17 = vpop.eup %7486  ;;  %v6223_v19 = vadd.f32 %v8675_v62, %v3475_v14  ;;  %v3477_v21 = vpop.f32.mrb[79].mxu1 }
 0x34a   : > { %7496 = vrcp.f32 %v4889_v12  ;;  %v4890_v22 = vadd.f32 1.0, %v7487_v17  ;;  %v6028_v23 = vpop.f32.mrb[79].mxu0  ;;  %v5834_v24 = vmul.f32 -1.442695, %v6222_v18  ;;  %3687 = vmatmul.mubr.bf16.gmra.mrb[184].mxu1 %v7342_v10  ;;  %6134 = vmatmul.mubr.msk.bf16.gmra.mrb[184].mxu0 %vm2709_vm2, %v7343_v11 }
 0x34b   : > { %v6224_v25 = vadd.f32 %v6223_v19, %v4325_v20  ;;  %3694 = vmatprep.mubr.bf16.mxu1 %v7344_v15  ;;  %6137 = vmatprep.mubr.msk.bf16.mxu0 %vm7844_vm1, %v7843_v40 }
 0x34c   : > { %v7489_v26 = vpop.eup %7488  ;;  %7498 = vrcp.f32 %v4890_v22 }
 0x34d   : > { %5181 = vst [vmem:[%s8546_s8 + $0x100] sm:$0xff] %v7489_v26  ;;  %7500 = vpow2.f32 %v5834_v24  ;;  %v5835_v27 = vmul.f32 -1.442695, %v6224_v25  ;;  %v3480_v29 = vpop.f32.mrb[80].mxu1  ;;  %v4330_v32 = vpop.f32.mrb[80].mxu0 }
 0x34e   : > { %v7491_v28 = vpop.eup %7490  ;;  %v6225_v31 = vadd.f32 %v8675_v62, %v3480_v29  ;;  %v3482_v33 = vpop.f32.mrb[81].mxu1 }
 0x34f   : > { %v7493_v30 = vpop.eup %7492  ;;  %5182 = vst [vmem:[%s8546_s8 + $0x108] sm:$0xff] %v7491_v28  ;;  %7502 = vpow2.f32 %v5835_v27  ;;  %v6031_v37 = vpop.f32.mrb[81].mxu0 }
 0x350   : > { %v4891_v36 = vadd.f32 1.0, %v7493_v30  ;;  %v3483_v38 = vpop.f32.mrb[82].mxu1  ;;  %v6226_v42 = vadd.f32 %v6225_v31, %v4330_v32  ;;  %v4333_v44 = vpop.f32.mrb[82].mxu0 }
 0x351   : > { %v7495_v41 = vpop.eup %7494  ;;  %v6227_v43 = vadd.f32 %v8675_v62, %v3483_v38  ;;  %v3485_v45 = vpop.f32.mrb[83].mxu1 }
 0x352   : > { %7504 = vrcp.f32 %v4891_v36  ;;  %v4892_v46 = vadd.f32 1.0, %v7495_v41  ;;  %v6032_v47 = vpop.f32.mrb[83].mxu0  ;;  %v5836_v48 = vmul.f32 -1.442695, %v6226_v42  ;;  %3695 = vmatmul.mubr.bf16.gmra.mrb[188].mxu1 %v7346_v34  ;;  %6138 = vmatmul.mubr.msk.bf16.gmra.mrb[188].mxu0 %vm2709_vm2, %v7347_v35 }
 0x353   : > { %v6228_v1 = vadd.f32 %v6227_v43, %v4333_v44  ;;  %3702 = vmatprep.mubr.bf16.mxu1 %v7348_v39  ;;  %6141 = vmatprep.mubr.msk.bf16.mxu0 %vm7844_vm1, %v7843_v40 }
 0x354   : > { %v7497_v49 = vpop.eup %7496  ;;  %7506 = vrcp.f32 %v4892_v46 }
 0x355   : > { %5183 = vst [vmem:[%s8546_s8 + $0x110] sm:$0xff] %v7497_v49  ;;  %7508 = vpow2.f32 %v5836_v48  ;;  %v5837_v50 = vmul.f32 -1.442695, %v6228_v1  ;;  %v3488_v52 = vpop.f32.mrb[84].mxu1  ;;  %v4338_v55 = vpop.f32.mrb[84].mxu0 }
 0x356   : > { %v7499_v51 = vpop.eup %7498  ;;  %v6229_v54 = vadd.f32 %v8675_v62, %v3488_v52  ;;  %v3490_v56 = vpop.f32.mrb[85].mxu1 }
 0x357   : > { %v7501_v53 = vpop.eup %7500  ;;  %5184 = vst [vmem:[%s8546_s8 + $0x118] sm:$0xff] %v7499_v51  ;;  %7510 = vpow2.f32 %v5837_v50  ;;  %v6035_v59 = vpop.f32.mrb[85].mxu0 }
 0x358   : > { %v4893_v58 = vadd.f32 1.0, %v7501_v53  ;;  %v3491_v16 = vpop.f32.mrb[86].mxu1  ;;  %v6230_v63 = vadd.f32 %v6229_v54, %v4338_v55  ;;  %v4341_v40 = vpop.f32.mrb[86].mxu0 }
 0x359   : > { %v7503_v61 = vpop.eup %7502  ;;  %v6231_v0 = vadd.f32 %v8675_v62, %v3491_v16  ;;  %v3493_v2 = vpop.f32.mrb[87].mxu1 }
 0x35a   : > { %7512 = vrcp.f32 %v4893_v58  ;;  %v4894_v3 = vadd.f32 1.0, %v7503_v61  ;;  %v6036_v4 = vpop.f32.mrb[87].mxu0  ;;  %v5838_v5 = vmul.f32 -1.442695, %v6230_v63  ;;  %3703 = vmatmul.mubr.bf16.gmra.mrb[192].mxu1 %v7350_v57  ;;  %6142 = vmatmul.mubr.msk.bf16.gmra.mrb[192].mxu0 %vm2709_vm2, %v7351_v60 }
 0x35b   : > { %v6232_v6 = vadd.f32 %v6231_v0, %v4341_v40 }
 0x35c   : > { %v7505_v7 = vpop.eup %7504  ;;  %7514 = vrcp.f32 %v4894_v3 }
 0x35d   : > { %5185 = vst [vmem:[%s8546_s8 + $0x120] sm:$0xff] %v7505_v7  ;;  %7516 = vpow2.f32 %v5838_v5  ;;  %v5839_v8 = vmul.f32 -1.442695, %v6232_v6  ;;  %v3496_v10 = vpop.f32.mrb[88].mxu1  ;;  %v4346_v13 = vpop.f32.mrb[88].mxu0 }
 0x35e   : > { %v7507_v9 = vpop.eup %7506  ;;  %v6233_v12 = vadd.f32 %v8675_v62, %v3496_v10  ;;  %v3498_v14 = vpop.f32.mrb[89].mxu1 }
 0x35f   : > { %v7509_v11 = vpop.eup %7508  ;;  %5186 = vst [vmem:[%s8546_s8 + $0x128] sm:$0xff] %v7507_v9  ;;  %7518 = vpow2.f32 %v5839_v8  ;;  %v6039_v17 = vpop.f32.mrb[89].mxu0 }
 0x360   : > { %v4895_v15 = vadd.f32 1.0, %v7509_v11  ;;  %v3499_v18 = vpop.f32.mrb[90].mxu1  ;;  %v6234_v20 = vadd.f32 %v6233_v12, %v4346_v13  ;;  %v4349_v22 = vpop.f32.mrb[90].mxu0 }
 0x361   : > { %v7511_v19 = vpop.eup %7510  ;;  %v6235_v21 = vadd.f32 %v8675_v62, %v3499_v18  ;;  %v3501_v23 = vpop.f32.mrb[91].mxu1 }
 0x362   : > { %7520 = vrcp.f32 %v4895_v15  ;;  %v4896_v24 = vadd.f32 1.0, %v7511_v19  ;;  %v6040_v25 = vpop.f32.mrb[91].mxu0  ;;  %v5840_v26 = vmul.f32 -1.442695, %v6234_v20 }
 0x363   : > { %v6236_v27 = vadd.f32 %v6235_v21, %v4349_v22 }
 0x364   : > { %v7513_v28 = vpop.eup %7512  ;;  %7522 = vrcp.f32 %v4896_v24 }
 0x365   : > { %5187 = vst [vmem:[%s8546_s8 + $0x130] sm:$0xff] %v7513_v28  ;;  %7524 = vpow2.f32 %v5840_v26  ;;  %v5841_v29 = vmul.f32 -1.442695, %v6236_v27  ;;  %v3504_v31 = vpop.f32.mrb[92].mxu1  ;;  %v4354_v34 = vpop.f32.mrb[92].mxu0 }
 0x366   : > { %v7515_v30 = vpop.eup %7514  ;;  %v6237_v33 = vadd.f32 %v8675_v62, %v3504_v31  ;;  %v3506_v35 = vpop.f32.mrb[93].mxu1 }
 0x367   : > { %v7517_v32 = vpop.eup %7516  ;;  %5188 = vst [vmem:[%s8546_s8 + $0x138] sm:$0xff] %v7515_v30  ;;  %7526 = vpow2.f32 %v5841_v29  ;;  %v6043_v37 = vpop.f32.mrb[93].mxu0 }
 0x368   : > { %v4897_v36 = vadd.f32 1.0, %v7517_v32  ;;  %v3507_v38 = vpop.f32.mrb[94].mxu1  ;;  %v6238_v41 = vadd.f32 %v6237_v33, %v4354_v34  ;;  %v4357_v43 = vpop.f32.mrb[94].mxu0 }
 0x369   : > { %v7519_v39 = vpop.eup %7518  ;;  %v6239_v42 = vadd.f32 %v8675_v62, %v3507_v38  ;;  %v3509_v44 = vpop.f32.mrb[95].mxu1 }
 0x36a   : > { %7528 = vrcp.f32 %v4897_v36  ;;  %v4898_v45 = vadd.f32 1.0, %v7519_v39  ;;  %v6044_v46 = vpop.f32.mrb[95].mxu0  ;;  %v5842_v47 = vmul.f32 -1.442695, %v6238_v41 }
 0x36b   : > { %v6240_v48 = vadd.f32 %v6239_v42, %v4357_v43 }
 0x36c   : > { %v7521_v1 = vpop.eup %7520  ;;  %7530 = vrcp.f32 %v4898_v45 }
 0x36d   : > { %5189 = vst [vmem:[%s8546_s8 + $0x140] sm:$0xff] %v7521_v1  ;;  %7532 = vpow2.f32 %v5842_v47  ;;  %v5843_v49 = vmul.f32 -1.442695, %v6240_v48  ;;  %v3512_v51 = vpop.f32.mrb[96].mxu1  ;;  %v4362_v54 = vpop.f32.mrb[96].mxu0 }
 0x36e   : > { %v7523_v50 = vpop.eup %7522  ;;  %v6241_v53 = vadd.f32 %v8675_v62, %v3512_v51  ;;  %v3514_v55 = vpop.f32.mrb[97].mxu1 }
 0x36f   : > { %v7525_v52 = vpop.eup %7524  ;;  %5190 = vst [vmem:[%s8546_s8 + $0x148] sm:$0xff] %v7523_v50  ;;  %7534 = vpow2.f32 %v5843_v49  ;;  %v6047_v57 = vpop.f32.mrb[97].mxu0 }
 0x370   : > { %v4899_v56 = vadd.f32 1.0, %v7525_v52  ;;  %v3515_v58 = vpop.f32.mrb[98].mxu1  ;;  %v6242_v16 = vadd.f32 %v6241_v53, %v4362_v54  ;;  %v4365_v61 = vpop.f32.mrb[98].mxu0 }
 0x371   : > { %v7527_v59 = vpop.eup %7526  ;;  %v6243_v60 = vadd.f32 %v8675_v62, %v3515_v58  ;;  %v3517_v63 = vpop.f32.mrb[99].mxu1 }
 0x372   : > { %7536 = vrcp.f32 %v4899_v56  ;;  %v4900_v0 = vadd.f32 1.0, %v7527_v59  ;;  %v6048_v40 = vpop.f32.mrb[99].mxu0  ;;  %v5844_v2 = vmul.f32 -1.442695, %v6242_v16 }
 0x373   : > { %v6244_v3 = vadd.f32 %v6243_v60, %v4365_v61 }
 0x374   : > { %v7529_v4 = vpop.eup %7528  ;;  %7538 = vrcp.f32 %v4900_v0 }
 0x375   : > { %5191 = vst [vmem:[%s8546_s8 + $0x150] sm:$0xff] %v7529_v4  ;;  %7540 = vpow2.f32 %v5844_v2  ;;  %v5845_v5 = vmul.f32 -1.442695, %v6244_v3  ;;  %v3520_v7 = vpop.f32.mrb[100].mxu1  ;;  %v4370_v10 = vpop.f32.mrb[100].mxu0 }
 0x376   : > { %v7531_v6 = vpop.eup %7530  ;;  %v6245_v9 = vadd.f32 %v8675_v62, %v3520_v7  ;;  %v3522_v11 = vpop.f32.mrb[101].mxu1 }
 0x377   : > { %v7533_v8 = vpop.eup %7532  ;;  %5192 = vst [vmem:[%s8546_s8 + $0x158] sm:$0xff] %v7531_v6  ;;  %7542 = vpow2.f32 %v5845_v5  ;;  %v6051_v13 = vpop.f32.mrb[101].mxu0 }
 0x378   : > { %v4901_v12 = vadd.f32 1.0, %v7533_v8  ;;  %v3523_v14 = vpop.f32.mrb[102].mxu1  ;;  %v6246_v17 = vadd.f32 %v6245_v9, %v4370_v10  ;;  %v4373_v19 = vpop.f32.mrb[102].mxu0 }
 0x379   : > { %v7535_v15 = vpop.eup %7534  ;;  %v6247_v18 = vadd.f32 %v8675_v62, %v3523_v14  ;;  %v3525_v20 = vpop.f32.mrb[103].mxu1 }
 0x37a   : > { %7544 = vrcp.f32 %v4901_v12  ;;  %v4902_v21 = vadd.f32 1.0, %v7535_v15  ;;  %v6052_v22 = vpop.f32.mrb[103].mxu0  ;;  %v5846_v23 = vmul.f32 -1.442695, %v6246_v17 }
 0x37b   : > { %v6248_v24 = vadd.f32 %v6247_v18, %v4373_v19 }
 0x37c   : > { %v7537_v25 = vpop.eup %7536  ;;  %7546 = vrcp.f32 %v4902_v21 }
 0x37d   : > { %5193 = vst [vmem:[%s8546_s8 + $0x160] sm:$0xff] %v7537_v25  ;;  %7548 = vpow2.f32 %v5846_v23  ;;  %v5847_v26 = vmul.f32 -1.442695, %v6248_v24  ;;  %v3528_v28 = vpop.f32.mrb[104].mxu1  ;;  %v4378_v31 = vpop.f32.mrb[104].mxu0 }
 0x37e   : > { %v7539_v27 = vpop.eup %7538  ;;  %v6249_v30 = vadd.f32 %v8675_v62, %v3528_v28  ;;  %v3530_v32 = vpop.f32.mrb[105].mxu1 }
 0x37f   : > { %v7541_v29 = vpop.eup %7540  ;;  %5194 = vst [vmem:[%s8546_s8 + $0x168] sm:$0xff] %v7539_v27  ;;  %7550 = vpow2.f32 %v5847_v26  ;;  %v6055_v34 = vpop.f32.mrb[105].mxu0 }
 0x380   : > { %v4903_v33 = vadd.f32 1.0, %v7541_v29  ;;  %v3531_v35 = vpop.f32.mrb[106].mxu1  ;;  %v6250_v37 = vadd.f32 %v6249_v30, %v4378_v31  ;;  %v4381_v39 = vpop.f32.mrb[106].mxu0 }
 0x381   : > { %v7543_v36 = vpop.eup %7542  ;;  %v6251_v38 = vadd.f32 %v8675_v62, %v3531_v35  ;;  %v3533_v41 = vpop.f32.mrb[107].mxu1 }
 0x382   : > { %7552 = vrcp.f32 %v4903_v33  ;;  %v4904_v42 = vadd.f32 1.0, %v7543_v36  ;;  %v6056_v43 = vpop.f32.mrb[107].mxu0  ;;  %v5848_v44 = vmul.f32 -1.442695, %v6250_v37 }
 0x383   : > { %v6252_v45 = vadd.f32 %v6251_v38, %v4381_v39 }
 0x384   : > { %v7545_v46 = vpop.eup %7544  ;;  %7554 = vrcp.f32 %v4904_v42 }
 0x385   : > { %5195 = vst [vmem:[%s8546_s8 + $0x170] sm:$0xff] %v7545_v46  ;;  %7556 = vpow2.f32 %v5848_v44  ;;  %v5849_v47 = vmul.f32 -1.442695, %v6252_v45  ;;  %v3536_v1 = vpop.f32.mrb[108].mxu1  ;;  %v4386_v51 = vpop.f32.mrb[108].mxu0 }
 0x386   : > { %v7547_v48 = vpop.eup %7546  ;;  %v6253_v50 = vadd.f32 %v8675_v62, %v3536_v1  ;;  %v3538_v52 = vpop.f32.mrb[109].mxu1 }
 0x387   : > { %v7549_v49 = vpop.eup %7548  ;;  %5196 = vst [vmem:[%s8546_s8 + $0x178] sm:$0xff] %v7547_v48  ;;  %7558 = vpow2.f32 %v5849_v47  ;;  %v6059_v54 = vpop.f32.mrb[109].mxu0 }
 0x388   : > { %v4905_v53 = vadd.f32 1.0, %v7549_v49  ;;  %v3539_v55 = vpop.f32.mrb[110].mxu1  ;;  %v6254_v57 = vadd.f32 %v6253_v50, %v4386_v51  ;;  %v4389_v59 = vpop.f32.mrb[110].mxu0 }
 0x389   : > { %v7551_v56 = vpop.eup %7550  ;;  %v6255_v58 = vadd.f32 %v8675_v62, %v3539_v55  ;;  %v3541_v16 = vpop.f32.mrb[111].mxu1 }
 0x38a   : > { %7560 = vrcp.f32 %v4905_v53  ;;  %v4906_v60 = vadd.f32 1.0, %v7551_v56  ;;  %v6060_v61 = vpop.f32.mrb[111].mxu0  ;;  %v5850_v63 = vmul.f32 -1.442695, %v6254_v57 }
 0x38b   : > { %v6256_v0 = vadd.f32 %v6255_v58, %v4389_v59 }
 0x38c   : > { %v7553_v40 = vpop.eup %7552  ;;  %7562 = vrcp.f32 %v4906_v60 }
 0x38d   : > { %5197 = vst [vmem:[%s8546_s8 + $0x180] sm:$0xff] %v7553_v40  ;;  %7564 = vpow2.f32 %v5850_v63  ;;  %v5851_v2 = vmul.f32 -1.442695, %v6256_v0  ;;  %v3544_v4 = vpop.f32.mrb[112].mxu1  ;;  %v4394_v7 = vpop.f32.mrb[112].mxu0 }
 0x38e   : > { %v7555_v3 = vpop.eup %7554  ;;  %v6257_v6 = vadd.f32 %v8675_v62, %v3544_v4  ;;  %v3546_v8 = vpop.f32.mrb[113].mxu1 }
 0x38f   : > { %v7557_v5 = vpop.eup %7556  ;;  %5198 = vst [vmem:[%s8546_s8 + $0x188] sm:$0xff] %v7555_v3  ;;  %7566 = vpow2.f32 %v5851_v2  ;;  %v6063_v10 = vpop.f32.mrb[113].mxu0 }
 0x390   : > { %v4907_v9 = vadd.f32 1.0, %v7557_v5  ;;  %v3547_v11 = vpop.f32.mrb[114].mxu1  ;;  %v6258_v13 = vadd.f32 %v6257_v6, %v4394_v7  ;;  %v4397_v15 = vpop.f32.mrb[114].mxu0 }
 0x391   : > { %v7559_v12 = vpop.eup %7558  ;;  %v6259_v14 = vadd.f32 %v8675_v62, %v3547_v11  ;;  %v3549_v17 = vpop.f32.mrb[115].mxu1 }
 0x392   : > { %7568 = vrcp.f32 %v4907_v9  ;;  %v4908_v18 = vadd.f32 1.0, %v7559_v12  ;;  %v6064_v19 = vpop.f32.mrb[115].mxu0  ;;  %v5852_v20 = vmul.f32 -1.442695, %v6258_v13 }
 0x393   : > { %v6260_v21 = vadd.f32 %v6259_v14, %v4397_v15 }
 0x394   : > { %v7561_v22 = vpop.eup %7560  ;;  %7570 = vrcp.f32 %v4908_v18 }
 0x395   : > { %5199 = vst [vmem:[%s8546_s8 + $0x190] sm:$0xff] %v7561_v22  ;;  %7572 = vpow2.f32 %v5852_v20  ;;  %v5853_v23 = vmul.f32 -1.442695, %v6260_v21  ;;  %v3552_v25 = vpop.f32.mrb[116].mxu1  ;;  %v4402_v28 = vpop.f32.mrb[116].mxu0 }
 0x396   : > { %v7563_v24 = vpop.eup %7562  ;;  %v6261_v27 = vadd.f32 %v8675_v62, %v3552_v25  ;;  %v3554_v29 = vpop.f32.mrb[117].mxu1 }
 0x397   : > { %v7565_v26 = vpop.eup %7564  ;;  %5200 = vst [vmem:[%s8546_s8 + $0x198] sm:$0xff] %v7563_v24  ;;  %7574 = vpow2.f32 %v5853_v23  ;;  %v6067_v31 = vpop.f32.mrb[117].mxu0 }
 0x398   : > { %v4909_v30 = vadd.f32 1.0, %v7565_v26  ;;  %v3555_v32 = vpop.f32.mrb[118].mxu1  ;;  %v6262_v34 = vadd.f32 %v6261_v27, %v4402_v28  ;;  %v4405_v36 = vpop.f32.mrb[118].mxu0 }
 0x399   : > { %v7567_v33 = vpop.eup %7566  ;;  %v6263_v35 = vadd.f32 %v8675_v62, %v3555_v32  ;;  %v3557_v37 = vpop.f32.mrb[119].mxu1 }
 0x39a   : > { %7576 = vrcp.f32 %v4909_v30  ;;  %v4910_v38 = vadd.f32 1.0, %v7567_v33  ;;  %v6068_v39 = vpop.f32.mrb[119].mxu0  ;;  %v5854_v41 = vmul.f32 -1.442695, %v6262_v34 }
 0x39b   : > { %v6264_v42 = vadd.f32 %v6263_v35, %v4405_v36 }
 0x39c   : > { %v7569_v43 = vpop.eup %7568  ;;  %7578 = vrcp.f32 %v4910_v38 }
 0x39d   : > { %5201 = vst [vmem:[%s8546_s8 + $0x1a0] sm:$0xff] %v7569_v43  ;;  %7580 = vpow2.f32 %v5854_v41  ;;  %v5855_v44 = vmul.f32 -1.442695, %v6264_v42  ;;  %v3560_v46 = vpop.f32.mrb[120].mxu1  ;;  %v4410_v1 = vpop.f32.mrb[120].mxu0 }
 0x39e   : > { %v7571_v45 = vpop.eup %7570  ;;  %v6265_v48 = vadd.f32 %v8675_v62, %v3560_v46  ;;  %v3562_v49 = vpop.f32.mrb[121].mxu1 }
 0x39f   : > { %v7573_v47 = vpop.eup %7572  ;;  %5202 = vst [vmem:[%s8546_s8 + $0x1a8] sm:$0xff] %v7571_v45  ;;  %7582 = vpow2.f32 %v5855_v44  ;;  %v6071_v51 = vpop.f32.mrb[121].mxu0 }
 0x3a0   : > { %v4911_v50 = vadd.f32 1.0, %v7573_v47  ;;  %v3563_v52 = vpop.f32.mrb[122].mxu1  ;;  %v6266_v54 = vadd.f32 %v6265_v48, %v4410_v1  ;;  %v4413_v56 = vpop.f32.mrb[122].mxu0 }
 0x3a1   : > { %v7575_v53 = vpop.eup %7574  ;;  %v6267_v55 = vadd.f32 %v8675_v62, %v3563_v52  ;;  %v3565_v57 = vpop.f32.mrb[123].mxu1 }
 0x3a2   : > { %7584 = vrcp.f32 %v4911_v50  ;;  %v4912_v58 = vadd.f32 1.0, %v7575_v53  ;;  %v6072_v59 = vpop.f32.mrb[123].mxu0  ;;  %v5856_v16 = vmul.f32 -1.442695, %v6266_v54 }
 0x3a3   : > { %v6268_v60 = vadd.f32 %v6267_v55, %v4413_v56 }
 0x3a4   : > { %v7577_v61 = vpop.eup %7576  ;;  %7586 = vrcp.f32 %v4912_v58 }
 0x3a5   : > { %5203 = vst [vmem:[%s8546_s8 + $0x1b0] sm:$0xff] %v7577_v61  ;;  %7588 = vpow2.f32 %v5856_v16  ;;  %v5857_v63 = vmul.f32 -1.442695, %v6268_v60  ;;  %v3568_v40 = vpop.f32.mrb[124].mxu1  ;;  %v4418_v4 = vpop.f32.mrb[124].mxu0 }
 0x3a6   : > { %v7579_v0 = vpop.eup %7578  ;;  %v6269_v3 = vadd.f32 %v8675_v62, %v3568_v40  ;;  %v3570_v5 = vpop.f32.mrb[125].mxu1 }
 0x3a7   : > { %v7581_v2 = vpop.eup %7580  ;;  %5204 = vst [vmem:[%s8546_s8 + $0x1b8] sm:$0xff] %v7579_v0  ;;  %7590 = vpow2.f32 %v5857_v63  ;;  %v6075_v7 = vpop.f32.mrb[125].mxu0 }
 0x3a8   : > { %v4913_v6 = vadd.f32 1.0, %v7581_v2  ;;  %v3571_v8 = vpop.f32.mrb[126].mxu1  ;;  %v6270_v10 = vadd.f32 %v6269_v3, %v4418_v4  ;;  %v4421_v12 = vpop.f32.mrb[126].mxu0 }
 0x3a9   : > { %v7583_v9 = vpop.eup %7582  ;;  %v6271_v11 = vadd.f32 %v8675_v62, %v3571_v8  ;;  %v3573_v13 = vpop.f32.mrb[127].mxu1  ;;  %v8786_v8 = vld [vmem:[%s8919_s2] ss:$0 sm:$0xff] }
 0x3aa   : > { %7592 = vrcp.f32 %v4913_v6  ;;  %v4914_v14 = vadd.f32 1.0, %v7583_v9  ;;  %v6076_v15 = vpop.f32.mrb[127].mxu0  ;;  %v5858_v17 = vmul.f32 -1.442695, %v6270_v10 }
 0x3ab   : > { %v6272_v18 = vadd.f32 %v6271_v11, %v4421_v12 }
 0x3ac   : > { %v7585_v19 = vpop.eup %7584  ;;  %7594 = vrcp.f32 %v4914_v14 }
 0x3ad   : > { %5205 = vst [vmem:[%s8546_s8 + $0x1c0] sm:$0xff] %v7585_v19  ;;  %7596 = vpow2.f32 %v5858_v17  ;;  %v5859_v20 = vmul.f32 -1.442695, %v6272_v18  ;;  %v3576_v22 = vpop.f32.mrb[128].mxu1  ;;  %v4426_v25 = vpop.f32.mrb[128].mxu0 }
 0x3ae   : > { %v7587_v21 = vpop.eup %7586  ;;  %v6273_v24 = vadd.f32 %v8675_v62, %v3576_v22  ;;  %v3578_v26 = vpop.f32.mrb[129].mxu1 }
 0x3af   : > { %v7589_v23 = vpop.eup %7588  ;;  %5206 = vst [vmem:[%s8546_s8 + $0x1c8] sm:$0xff] %v7587_v21  ;;  %7598 = vpow2.f32 %v5859_v20  ;;  %v6079_v28 = vpop.f32.mrb[129].mxu0 }
 0x3b0   : > { %v4915_v27 = vadd.f32 1.0, %v7589_v23  ;;  %v3579_v29 = vpop.f32.mrb[130].mxu1  ;;  %v6274_v31 = vadd.f32 %v6273_v24, %v4426_v25  ;;  %v4429_v33 = vpop.f32.mrb[130].mxu0 }
 0x3b1   : > { %v7591_v30 = vpop.eup %7590  ;;  %v6275_v32 = vadd.f32 %v8675_v62, %v3579_v29  ;;  %v3581_v34 = vpop.f32.mrb[131].mxu1 }
 0x3b2   : > { %7600 = vrcp.f32 %v4915_v27  ;;  %v4916_v35 = vadd.f32 1.0, %v7591_v30  ;;  %v6080_v36 = vpop.f32.mrb[131].mxu0  ;;  %v5860_v37 = vmul.f32 -1.442695, %v6274_v31 }
 0x3b3   : > { %v6276_v38 = vadd.f32 %v6275_v32, %v4429_v33 }
 0x3b4   : > { %v7593_v39 = vpop.eup %7592  ;;  %7602 = vrcp.f32 %v4916_v35 }
 0x3b5   : > { %5207 = vst [vmem:[%s8546_s8 + $0x1d0] sm:$0xff] %v7593_v39  ;;  %7604 = vpow2.f32 %v5860_v37  ;;  %v5861_v41 = vmul.f32 -1.442695, %v6276_v38  ;;  %v3584_v43 = vpop.f32.mrb[132].mxu1  ;;  %v4434_v46 = vpop.f32.mrb[132].mxu0 }
 0x3b6   : > { %v7595_v42 = vpop.eup %7594  ;;  %v6277_v45 = vadd.f32 %v8675_v62, %v3584_v43  ;;  %v3586_v47 = vpop.f32.mrb[133].mxu1 }
 0x3b7   : > { %v7597_v44 = vpop.eup %7596  ;;  %5208 = vst [vmem:[%s8546_s8 + $0x1d8] sm:$0xff] %v7595_v42  ;;  %7606 = vpow2.f32 %v5861_v41  ;;  %v6083_v1 = vpop.f32.mrb[133].mxu0 }
 0x3b8   : > { %v4917_v48 = vadd.f32 1.0, %v7597_v44  ;;  %v3587_v49 = vpop.f32.mrb[134].mxu1  ;;  %v6278_v51 = vadd.f32 %v6277_v45, %v4434_v46  ;;  %v4437_v53 = vpop.f32.mrb[134].mxu0 }
 0x3b9   : > { %v7599_v50 = vpop.eup %7598  ;;  %v6279_v52 = vadd.f32 %v8675_v62, %v3587_v49  ;;  %v3589_v54 = vpop.f32.mrb[135].mxu1 }
 0x3ba   : > { %7608 = vrcp.f32 %v4917_v48  ;;  %v4918_v55 = vadd.f32 1.0, %v7599_v50  ;;  %v6084_v56 = vpop.f32.mrb[135].mxu0  ;;  %v5862_v57 = vmul.f32 -1.442695, %v6278_v51 }
 0x3bb   : > { %v6280_v58 = vadd.f32 %v6279_v52, %v4437_v53 }
 0x3bc   : > { %v7601_v59 = vpop.eup %7600  ;;  %7610 = vrcp.f32 %v4918_v55 }
 0x3bd   : > { %5209 = vst [vmem:[%s8546_s8 + $0x1e0] sm:$0xff] %v7601_v59  ;;  %7612 = vpow2.f32 %v5862_v57  ;;  %v5863_v16 = vmul.f32 -1.442695, %v6280_v58  ;;  %v3592_v61 = vpop.f32.mrb[136].mxu1  ;;  %v4442_v40 = vpop.f32.mrb[136].mxu0 }
 0x3be   : > { %v7603_v60 = vpop.eup %7602  ;;  %v6281_v0 = vadd.f32 %v8675_v62, %v3592_v61  ;;  %v3594_v2 = vpop.f32.mrb[137].mxu1 }
 0x3bf   : > { %v7605_v63 = vpop.eup %7604  ;;  %5210 = vst [vmem:[%s8546_s8 + $0x1e8] sm:$0xff] %v7603_v60  ;;  %7614 = vpow2.f32 %v5863_v16  ;;  %v6087_v4 = vpop.f32.mrb[137].mxu0 }
 0x3c0   : > { %v4919_v3 = vadd.f32 1.0, %v7605_v63  ;;  %v3595_v5 = vpop.f32.mrb[138].mxu1  ;;  %v6282_v7 = vadd.f32 %v6281_v0, %v4442_v40  ;;  %v4445_v10 = vpop.f32.mrb[138].mxu0 }
 0x3c1   : > { %v7607_v6 = vpop.eup %7606  ;;  %v6283_v9 = vadd.f32 %v8786_v8, %v3595_v5  ;;  %v3597_v11 = vpop.f32.mrb[139].mxu1 }
 0x3c2   : > { %7616 = vrcp.f32 %v4919_v3  ;;  %v4920_v62 = vadd.f32 1.0, %v7607_v6  ;;  %v6088_v12 = vpop.f32.mrb[139].mxu0  ;;  %v5864_v13 = vmul.f32 -1.442695, %v6282_v7 }
 0x3c3   : > { %v6284_v14 = vadd.f32 %v6283_v9, %v4445_v10 }
 0x3c4   : > { %v7609_v15 = vpop.eup %7608  ;;  %7618 = vrcp.f32 %v4920_v62 }
 0x3c5   : > { %5211 = vst [vmem:[%s8546_s8 + $0x1f0] sm:$0xff] %v7609_v15  ;;  %7620 = vpow2.f32 %v5864_v13  ;;  %v5865_v17 = vmul.f32 -1.442695, %v6284_v14  ;;  %v3600_v19 = vpop.f32.mrb[140].mxu1  ;;  %v4450_v22 = vpop.f32.mrb[140].mxu0 }
 0x3c6   : > { %v7611_v18 = vpop.eup %7610  ;;  %v6285_v21 = vadd.f32 %v8786_v8, %v3600_v19  ;;  %v3602_v23 = vpop.f32.mrb[141].mxu1 }
 0x3c7   : > { %v7613_v20 = vpop.eup %7612  ;;  %5212 = vst [vmem:[%s8546_s8 + $0x1f8] sm:$0xff] %v7611_v18  ;;  %7622 = vpow2.f32 %v5865_v17  ;;  %v6091_v25 = vpop.f32.mrb[141].mxu0 }
 0x3c8   : > { %v4921_v24 = vadd.f32 1.0, %v7613_v20  ;;  %v3603_v26 = vpop.f32.mrb[142].mxu1  ;;  %v6286_v28 = vadd.f32 %v6285_v21, %v4450_v22  ;;  %v4453_v30 = vpop.f32.mrb[142].mxu0 }
 0x3c9   : > { %v7615_v27 = vpop.eup %7614  ;;  %v6287_v29 = vadd.f32 %v8786_v8, %v3603_v26  ;;  %v3605_v31 = vpop.f32.mrb[143].mxu1 }
 0x3ca   : > { %7624 = vrcp.f32 %v4921_v24  ;;  %v4922_v32 = vadd.f32 1.0, %v7615_v27  ;;  %v6092_v33 = vpop.f32.mrb[143].mxu0  ;;  %v5866_v34 = vmul.f32 -1.442695, %v6286_v28 }
 0x3cb   : > { %v6288_v35 = vadd.f32 %v6287_v29, %v4453_v30 }
 0x3cc   : > { %v7617_v36 = vpop.eup %7616  ;;  %7626 = vrcp.f32 %v4922_v32 }
 0x3cd   : > { %5213 = vst [vmem:[%s8546_s8 + $0x200] sm:$0xff] %v7617_v36  ;;  %7628 = vpow2.f32 %v5866_v34  ;;  %v5867_v37 = vmul.f32 -1.442695, %v6288_v35  ;;  %v3608_v39 = vpop.f32.mrb[144].mxu1  ;;  %v4458_v43 = vpop.f32.mrb[144].mxu0 }
 0x3ce   : > { %v7619_v38 = vpop.eup %7618  ;;  %v6289_v42 = vadd.f32 %v8786_v8, %v3608_v39  ;;  %v3610_v44 = vpop.f32.mrb[145].mxu1 }
 0x3cf   : > { %v7621_v41 = vpop.eup %7620  ;;  %5214 = vst [vmem:[%s8546_s8 + $0x208] sm:$0xff] %v7619_v38  ;;  %7630 = vpow2.f32 %v5867_v37  ;;  %v6095_v46 = vpop.f32.mrb[145].mxu0 }
 0x3d0   : > { %v4923_v45 = vadd.f32 1.0, %v7621_v41  ;;  %v3611_v47 = vpop.f32.mrb[146].mxu1  ;;  %v6290_v1 = vadd.f32 %v6289_v42, %v4458_v43  ;;  %v4461_v50 = vpop.f32.mrb[146].mxu0 }
 0x3d1   : > { %v7623_v48 = vpop.eup %7622  ;;  %v6291_v49 = vadd.f32 %v8786_v8, %v3611_v47  ;;  %v3613_v51 = vpop.f32.mrb[147].mxu1 }
 0x3d2   : > { %7632 = vrcp.f32 %v4923_v45  ;;  %v4924_v52 = vadd.f32 1.0, %v7623_v48  ;;  %v6096_v53 = vpop.f32.mrb[147].mxu0  ;;  %v5868_v54 = vmul.f32 -1.442695, %v6290_v1 }
 0x3d3   : > { %v6292_v55 = vadd.f32 %v6291_v49, %v4461_v50 }
 0x3d4   : > { %v7625_v56 = vpop.eup %7624  ;;  %7634 = vrcp.f32 %v4924_v52 }
 0x3d5   : > { %5215 = vst [vmem:[%s8546_s8 + $0x210] sm:$0xff] %v7625_v56  ;;  %7636 = vpow2.f32 %v5868_v54  ;;  %v5869_v57 = vmul.f32 -1.442695, %v6292_v55  ;;  %v3616_v59 = vpop.f32.mrb[148].mxu1  ;;  %v4466_v61 = vpop.f32.mrb[148].mxu0 }
 0x3d6   : > { %v7627_v58 = vpop.eup %7626  ;;  %v6293_v60 = vadd.f32 %v8786_v8, %v3616_v59  ;;  %v3618_v63 = vpop.f32.mrb[149].mxu1 }
 0x3d7   : > { %v7629_v16 = vpop.eup %7628  ;;  %5216 = vst [vmem:[%s8546_s8 + $0x218] sm:$0xff] %v7627_v58  ;;  %7638 = vpow2.f32 %v5869_v57  ;;  %v6099_v40 = vpop.f32.mrb[149].mxu0 }
 0x3d8   : > { %v4925_v0 = vadd.f32 1.0, %v7629_v16  ;;  %v3619_v2 = vpop.f32.mrb[150].mxu1  ;;  %v6294_v4 = vadd.f32 %v6293_v60, %v4466_v61  ;;  %v4469_v6 = vpop.f32.mrb[150].mxu0 }
 0x3d9   : > { %v7631_v3 = vpop.eup %7630  ;;  %v6295_v5 = vadd.f32 %v8786_v8, %v3619_v2  ;;  %v3621_v7 = vpop.f32.mrb[151].mxu1 }
 0x3da   : > { %7640 = vrcp.f32 %v4925_v0  ;;  %v4926_v9 = vadd.f32 1.0, %v7631_v3  ;;  %v6100_v10 = vpop.f32.mrb[151].mxu0  ;;  %v5870_v11 = vmul.f32 -1.442695, %v6294_v4 }
 0x3db   : > { %v6296_v62 = vadd.f32 %v6295_v5, %v4469_v6 }
 0x3dc   : > { %v7633_v12 = vpop.eup %7632  ;;  %7642 = vrcp.f32 %v4926_v9 }
 0x3dd   : > { %5217 = vst [vmem:[%s8546_s8 + $0x220] sm:$0xff] %v7633_v12  ;;  %7644 = vpow2.f32 %v5870_v11  ;;  %v5871_v13 = vmul.f32 -1.442695, %v6296_v62  ;;  %v3624_v15 = vpop.f32.mrb[152].mxu1  ;;  %v4474_v19 = vpop.f32.mrb[152].mxu0 }
 0x3de   : > { %v7635_v14 = vpop.eup %7634  ;;  %v6297_v18 = vadd.f32 %v8786_v8, %v3624_v15  ;;  %v3626_v20 = vpop.f32.mrb[153].mxu1 }
 0x3df   : > { %v7637_v17 = vpop.eup %7636  ;;  %5218 = vst [vmem:[%s8546_s8 + $0x228] sm:$0xff] %v7635_v14  ;;  %7646 = vpow2.f32 %v5871_v13  ;;  %v6103_v22 = vpop.f32.mrb[153].mxu0 }
 0x3e0   : > { %v4927_v21 = vadd.f32 1.0, %v7637_v17  ;;  %v3627_v23 = vpop.f32.mrb[154].mxu1  ;;  %v6298_v25 = vadd.f32 %v6297_v18, %v4474_v19  ;;  %v4477_v27 = vpop.f32.mrb[154].mxu0 }
 0x3e1   : > { %v7639_v24 = vpop.eup %7638  ;;  %v6299_v26 = vadd.f32 %v8786_v8, %v3627_v23  ;;  %v3629_v28 = vpop.f32.mrb[155].mxu1 }
 0x3e2   : > { %7648 = vrcp.f32 %v4927_v21  ;;  %v4928_v29 = vadd.f32 1.0, %v7639_v24  ;;  %v6104_v30 = vpop.f32.mrb[155].mxu0  ;;  %v5872_v31 = vmul.f32 -1.442695, %v6298_v25 }
 0x3e3   : > { %v6300_v32 = vadd.f32 %v6299_v26, %v4477_v27 }
 0x3e4   : > { %v7641_v33 = vpop.eup %7640  ;;  %7650 = vrcp.f32 %v4928_v29 }
 0x3e5   : > { %5219 = vst [vmem:[%s8546_s8 + $0x230] sm:$0xff] %v7641_v33  ;;  %7652 = vpow2.f32 %v5872_v31  ;;  %v5873_v34 = vmul.f32 -1.442695, %v6300_v32  ;;  %v3632_v36 = vpop.f32.mrb[156].mxu1  ;;  %v4482_v39 = vpop.f32.mrb[156].mxu0 }
 0x3e6   : > { %v7643_v35 = vpop.eup %7642  ;;  %v6301_v38 = vadd.f32 %v8786_v8, %v3632_v36  ;;  %v3634_v41 = vpop.f32.mrb[157].mxu1 }
 0x3e7   : > { %v7645_v37 = vpop.eup %7644  ;;  %5220 = vst [vmem:[%s8546_s8 + $0x238] sm:$0xff] %v7643_v35  ;;  %7654 = vpow2.f32 %v5873_v34  ;;  %v6107_v43 = vpop.f32.mrb[157].mxu0 }
 0x3e8   : > { %v4929_v42 = vadd.f32 1.0, %v7645_v37  ;;  %v3635_v44 = vpop.f32.mrb[158].mxu1  ;;  %v6302_v46 = vadd.f32 %v6301_v38, %v4482_v39  ;;  %v4485_v48 = vpop.f32.mrb[158].mxu0 }
 0x3e9   : > { %v7647_v45 = vpop.eup %7646  ;;  %v6303_v47 = vadd.f32 %v8786_v8, %v3635_v44  ;;  %v3637_v1 = vpop.f32.mrb[159].mxu1 }
 0x3ea   : > { %7656 = vrcp.f32 %v4929_v42  ;;  %v4930_v49 = vadd.f32 1.0, %v7647_v45  ;;  %v6108_v50 = vpop.f32.mrb[159].mxu0  ;;  %v5874_v51 = vmul.f32 -1.442695, %v6302_v46 }
 0x3eb   : > { %v6304_v52 = vadd.f32 %v6303_v47, %v4485_v48 }
 0x3ec   : > { %v7649_v53 = vpop.eup %7648  ;;  %7658 = vrcp.f32 %v4930_v49 }
 0x3ed   : > { %5221 = vst [vmem:[%s8546_s8 + $0x240] sm:$0xff] %v7649_v53  ;;  %7660 = vpow2.f32 %v5874_v51  ;;  %v5875_v54 = vmul.f32 -1.442695, %v6304_v52  ;;  %v3640_v56 = vpop.f32.mrb[160].mxu1  ;;  %v4490_v59 = vpop.f32.mrb[160].mxu0 }
 0x3ee   : > { %v7651_v55 = vpop.eup %7650  ;;  %v6305_v58 = vadd.f32 %v8786_v8, %v3640_v56  ;;  %v3642_v16 = vpop.f32.mrb[161].mxu1 }
 0x3ef   : > { %v7653_v57 = vpop.eup %7652  ;;  %5222 = vst [vmem:[%s8546_s8 + $0x248] sm:$0xff] %v7651_v55  ;;  %7662 = vpow2.f32 %v5875_v54  ;;  %v6111_v61 = vpop.f32.mrb[161].mxu0 }
 0x3f0   : > { %v4931_v60 = vadd.f32 1.0, %v7653_v57  ;;  %v3643_v63 = vpop.f32.mrb[162].mxu1  ;;  %v6306_v40 = vadd.f32 %v6305_v58, %v4490_v59  ;;  %v4493_v3 = vpop.f32.mrb[162].mxu0 }
 0x3f1   : > { %v7655_v0 = vpop.eup %7654  ;;  %v6307_v2 = vadd.f32 %v8786_v8, %v3643_v63  ;;  %v3645_v4 = vpop.f32.mrb[163].mxu1 }
 0x3f2   : > { %7664 = vrcp.f32 %v4931_v60  ;;  %v4932_v5 = vadd.f32 1.0, %v7655_v0  ;;  %v6112_v6 = vpop.f32.mrb[163].mxu0  ;;  %v5876_v7 = vmul.f32 -1.442695, %v6306_v40 }
 0x3f3   : > { %v6308_v9 = vadd.f32 %v6307_v2, %v4493_v3 }
 0x3f4   : > { %v7657_v10 = vpop.eup %7656  ;;  %7666 = vrcp.f32 %v4932_v5 }
 0x3f5   : > { %5223 = vst [vmem:[%s8546_s8 + $0x250] sm:$0xff] %v7657_v10  ;;  %7668 = vpow2.f32 %v5876_v7  ;;  %v5877_v11 = vmul.f32 -1.442695, %v6308_v9  ;;  %v3648_v12 = vpop.f32.mrb[164].mxu1  ;;  %v4498_v15 = vpop.f32.mrb[164].mxu0 }
 0x3f6   : > { %v7659_v62 = vpop.eup %7658  ;;  %v6309_v14 = vadd.f32 %v8786_v8, %v3648_v12  ;;  %v3650_v17 = vpop.f32.mrb[165].mxu1 }
 0x3f7   : > { %v7661_v13 = vpop.eup %7660  ;;  %5224 = vst [vmem:[%s8546_s8 + $0x258] sm:$0xff] %v7659_v62  ;;  %7670 = vpow2.f32 %v5877_v11  ;;  %v6115_v19 = vpop.f32.mrb[165].mxu0 }
 0x3f8   : > { %v4933_v18 = vadd.f32 1.0, %v7661_v13  ;;  %v3651_v20 = vpop.f32.mrb[166].mxu1  ;;  %v6310_v22 = vadd.f32 %v6309_v14, %v4498_v15  ;;  %v4501_v24 = vpop.f32.mrb[166].mxu0 }
 0x3f9   : > { %v7663_v21 = vpop.eup %7662  ;;  %v6311_v23 = vadd.f32 %v8786_v8, %v3651_v20  ;;  %v3653_v25 = vpop.f32.mrb[167].mxu1 }
 0x3fa   : > { %7672 = vrcp.f32 %v4933_v18  ;;  %v4934_v26 = vadd.f32 1.0, %v7663_v21  ;;  %v6116_v27 = vpop.f32.mrb[167].mxu0  ;;  %v5878_v28 = vmul.f32 -1.442695, %v6310_v22 }
 0x3fb   : > { %v6312_v29 = vadd.f32 %v6311_v23, %v4501_v24 }
 0x3fc   : > { %v7665_v30 = vpop.eup %7664  ;;  %7674 = vrcp.f32 %v4934_v26 }
 0x3fd   : > { %5225 = vst [vmem:[%s8546_s8 + $0x260] sm:$0xff] %v7665_v30  ;;  %7676 = vpow2.f32 %v5878_v28  ;;  %v5879_v31 = vmul.f32 -1.442695, %v6312_v29  ;;  %v3656_v33 = vpop.f32.mrb[168].mxu1  ;;  %v4506_v36 = vpop.f32.mrb[168].mxu0 }
 0x3fe   : > { %v7667_v32 = vpop.eup %7666  ;;  %v6313_v35 = vadd.f32 %v8786_v8, %v3656_v33  ;;  %v3658_v37 = vpop.f32.mrb[169].mxu1 }
 0x3ff   : > { %v7669_v34 = vpop.eup %7668  ;;  %5226 = vst [vmem:[%s8546_s8 + $0x268] sm:$0xff] %v7667_v32  ;;  %7678 = vpow2.f32 %v5879_v31  ;;  %v6119_v39 = vpop.f32.mrb[169].mxu0 }
 0x400   : > { %v4935_v38 = vadd.f32 1.0, %v7669_v34  ;;  %v3659_v41 = vpop.f32.mrb[170].mxu1  ;;  %v6314_v43 = vadd.f32 %v6313_v35, %v4506_v36  ;;  %v4509_v45 = vpop.f32.mrb[170].mxu0 }
 0x401   : > { %v7671_v42 = vpop.eup %7670  ;;  %v6315_v44 = vadd.f32 %v8786_v8, %v3659_v41  ;;  %v3661_v46 = vpop.f32.mrb[171].mxu1 }
 0x402   : > { %7680 = vrcp.f32 %v4935_v38  ;;  %v4936_v47 = vadd.f32 1.0, %v7671_v42  ;;  %v6120_v48 = vpop.f32.mrb[171].mxu0  ;;  %v5880_v1 = vmul.f32 -1.442695, %v6314_v43 }
 0x403   : > { %v6316_v49 = vadd.f32 %v6315_v44, %v4509_v45 }
 0x404   : > { %v7673_v50 = vpop.eup %7672  ;;  %7682 = vrcp.f32 %v4936_v47 }
 0x405   : > { %5227 = vst [vmem:[%s8546_s8 + $0x270] sm:$0xff] %v7673_v50  ;;  %7684 = vpow2.f32 %v5880_v1  ;;  %v5881_v51 = vmul.f32 -1.442695, %v6316_v49  ;;  %v3664_v53 = vpop.f32.mrb[172].mxu1  ;;  %v4514_v56 = vpop.f32.mrb[172].mxu0 }
 0x406   : > { %v7675_v52 = vpop.eup %7674  ;;  %v6317_v55 = vadd.f32 %v8786_v8, %v3664_v53  ;;  %v3666_v57 = vpop.f32.mrb[173].mxu1 }
 0x407   : > { %v7677_v54 = vpop.eup %7676  ;;  %5228 = vst [vmem:[%s8546_s8 + $0x278] sm:$0xff] %v7675_v52  ;;  %7686 = vpow2.f32 %v5881_v51  ;;  %v6123_v59 = vpop.f32.mrb[173].mxu0 }
 0x408   : > { %v4937_v58 = vadd.f32 1.0, %v7677_v54  ;;  %v3667_v16 = vpop.f32.mrb[174].mxu1  ;;  %v6318_v61 = vadd.f32 %v6317_v55, %v4514_v56  ;;  %v4517_v0 = vpop.f32.mrb[174].mxu0 }
 0x409   : > { %v7679_v60 = vpop.eup %7678  ;;  %v6319_v63 = vadd.f32 %v8786_v8, %v3667_v16  ;;  %v3669_v40 = vpop.f32.mrb[175].mxu1 }
 0x40a   : > { %7688 = vrcp.f32 %v4937_v58  ;;  %v4938_v2 = vadd.f32 1.0, %v7679_v60  ;;  %v6124_v3 = vpop.f32.mrb[175].mxu0  ;;  %v5882_v4 = vmul.f32 -1.442695, %v6318_v61 }
 0x40b   : > { %v6320_v5 = vadd.f32 %v6319_v63, %v4517_v0 }
 0x40c   : > { %v7681_v6 = vpop.eup %7680  ;;  %7690 = vrcp.f32 %v4938_v2 }
 0x40d   : > { %5229 = vst [vmem:[%s8546_s8 + $0x280] sm:$0xff] %v7681_v6  ;;  %7692 = vpow2.f32 %v5882_v4  ;;  %v5883_v7 = vmul.f32 -1.442695, %v6320_v5  ;;  %v3672_v10 = vpop.f32.mrb[176].mxu1  ;;  %v4522_v12 = vpop.f32.mrb[176].mxu0 }
 0x40e   : > { %v7683_v9 = vpop.eup %7682  ;;  %v6321_v62 = vadd.f32 %v8786_v8, %v3672_v10  ;;  %v3674_v13 = vpop.f32.mrb[177].mxu1 }
 0x40f   : > { %v7685_v11 = vpop.eup %7684  ;;  %5230 = vst [vmem:[%s8546_s8 + $0x288] sm:$0xff] %v7683_v9  ;;  %7694 = vpow2.f32 %v5883_v7  ;;  %v6127_v15 = vpop.f32.mrb[177].mxu0 }
 0x410   : > { %v4939_v14 = vadd.f32 1.0, %v7685_v11  ;;  %v3675_v17 = vpop.f32.mrb[178].mxu1  ;;  %v6322_v19 = vadd.f32 %v6321_v62, %v4522_v12  ;;  %v4525_v21 = vpop.f32.mrb[178].mxu0 }
 0x411   : > { %v7687_v18 = vpop.eup %7686  ;;  %v6323_v20 = vadd.f32 %v8786_v8, %v3675_v17  ;;  %v3677_v22 = vpop.f32.mrb[179].mxu1 }
 0x412   : > { %7696 = vrcp.f32 %v4939_v14  ;;  %v4940_v23 = vadd.f32 1.0, %v7687_v18  ;;  %v6128_v24 = vpop.f32.mrb[179].mxu0  ;;  %v5884_v25 = vmul.f32 -1.442695, %v6322_v19 }
 0x413   : > { %v6324_v26 = vadd.f32 %v6323_v20, %v4525_v21 }
 0x414   : > { %v7689_v27 = vpop.eup %7688  ;;  %7698 = vrcp.f32 %v4940_v23 }
 0x415   : > { %5231 = vst [vmem:[%s8546_s8 + $0x290] sm:$0xff] %v7689_v27  ;;  %7700 = vpow2.f32 %v5884_v25  ;;  %v5885_v28 = vmul.f32 -1.442695, %v6324_v26  ;;  %v3680_v30 = vpop.f32.mrb[180].mxu1  ;;  %v4530_v33 = vpop.f32.mrb[180].mxu0 }
 0x416   : > { %v7691_v29 = vpop.eup %7690  ;;  %v6325_v32 = vadd.f32 %v8786_v8, %v3680_v30  ;;  %v3682_v34 = vpop.f32.mrb[181].mxu1 }
 0x417   : > { %v7693_v31 = vpop.eup %7692  ;;  %5232 = vst [vmem:[%s8546_s8 + $0x298] sm:$0xff] %v7691_v29  ;;  %7702 = vpow2.f32 %v5885_v28  ;;  %v6131_v36 = vpop.f32.mrb[181].mxu0 }
 0x418   : > { %v4941_v35 = vadd.f32 1.0, %v7693_v31  ;;  %v3683_v37 = vpop.f32.mrb[182].mxu1  ;;  %v6326_v39 = vadd.f32 %v6325_v32, %v4530_v33  ;;  %v4533_v42 = vpop.f32.mrb[182].mxu0 }
 0x419   : > { %v7695_v38 = vpop.eup %7694  ;;  %v6327_v41 = vadd.f32 %v8786_v8, %v3683_v37  ;;  %v3685_v43 = vpop.f32.mrb[183].mxu1 }
 0x41a   : > { %7704 = vrcp.f32 %v4941_v35  ;;  %v4942_v44 = vadd.f32 1.0, %v7695_v38  ;;  %v6132_v45 = vpop.f32.mrb[183].mxu0  ;;  %v5886_v46 = vmul.f32 -1.442695, %v6326_v39 }
 0x41b   : > { %v6328_v47 = vadd.f32 %v6327_v41, %v4533_v42 }
 0x41c   : > { %v7697_v48 = vpop.eup %7696  ;;  %7706 = vrcp.f32 %v4942_v44 }
 0x41d   : > { %5233 = vst [vmem:[%s8546_s8 + $0x2a0] sm:$0xff] %v7697_v48  ;;  %7708 = vpow2.f32 %v5886_v46  ;;  %v5887_v1 = vmul.f32 -1.442695, %v6328_v47  ;;  %v3688_v50 = vpop.f32.mrb[184].mxu1  ;;  %v4538_v53 = vpop.f32.mrb[184].mxu0 }
 0x41e   : > { %v7699_v49 = vpop.eup %7698  ;;  %v6329_v52 = vadd.f32 %v8786_v8, %v3688_v50  ;;  %v3690_v54 = vpop.f32.mrb[185].mxu1 }
 0x41f   : > { %v7701_v51 = vpop.eup %7700  ;;  %5234 = vst [vmem:[%s8546_s8 + $0x2a8] sm:$0xff] %v7699_v49  ;;  %7710 = vpow2.f32 %v5887_v1  ;;  %v6135_v56 = vpop.f32.mrb[185].mxu0 }
 0x420   : > { %v4943_v55 = vadd.f32 1.0, %v7701_v51  ;;  %v3691_v57 = vpop.f32.mrb[186].mxu1  ;;  %v6330_v59 = vadd.f32 %v6329_v52, %v4538_v53  ;;  %v4541_v60 = vpop.f32.mrb[186].mxu0 }
 0x421   : > { %v7703_v58 = vpop.eup %7702  ;;  %v6331_v16 = vadd.f32 %v8786_v8, %v3691_v57  ;;  %v3693_v61 = vpop.f32.mrb[187].mxu1 }
 0x422   : > { %7712 = vrcp.f32 %v4943_v55  ;;  %v4944_v63 = vadd.f32 1.0, %v7703_v58  ;;  %v6136_v0 = vpop.f32.mrb[187].mxu0  ;;  %v5888_v40 = vmul.f32 -1.442695, %v6330_v59 }
 0x423   : > { %v6332_v2 = vadd.f32 %v6331_v16, %v4541_v60 }
 0x424   : > { %v7705_v3 = vpop.eup %7704  ;;  %7714 = vrcp.f32 %v4944_v63 }
 0x425   : > { %5235 = vst [vmem:[%s8546_s8 + $0x2b0] sm:$0xff] %v7705_v3  ;;  %7716 = vpow2.f32 %v5888_v40  ;;  %v5889_v4 = vmul.f32 -1.442695, %v6332_v2  ;;  %v3696_v6 = vpop.f32.mrb[188].mxu1  ;;  %v4546_v10 = vpop.f32.mrb[188].mxu0 }
 0x426   : > { %v7707_v5 = vpop.eup %7706  ;;  %v6333_v9 = vadd.f32 %v8786_v8, %v3696_v6  ;;  %v3698_v11 = vpop.f32.mrb[189].mxu1 }
 0x427   : > { %v7709_v7 = vpop.eup %7708  ;;  %5236 = vst [vmem:[%s8546_s8 + $0x2b8] sm:$0xff] %v7707_v5  ;;  %7718 = vpow2.f32 %v5889_v4  ;;  %v6139_v12 = vpop.f32.mrb[189].mxu0 }
 0x428   : > { %v4945_v62 = vadd.f32 1.0, %v7709_v7  ;;  %v3699_v13 = vpop.f32.mrb[190].mxu1  ;;  %v6334_v15 = vadd.f32 %v6333_v9, %v4546_v10  ;;  %v4549_v18 = vpop.f32.mrb[190].mxu0 }
 0x429   : > { %v7711_v14 = vpop.eup %7710  ;;  %v6335_v17 = vadd.f32 %v8786_v8, %v3699_v13  ;;  %v3701_v19 = vpop.f32.mrb[191].mxu1 }
 0x42a   : > { %7720 = vrcp.f32 %v4945_v62  ;;  %v4946_v20 = vadd.f32 1.0, %v7711_v14  ;;  %v6140_v21 = vpop.f32.mrb[191].mxu0  ;;  %v5890_v22 = vmul.f32 -1.442695, %v6334_v15 }
 0x42b   : > { %v6336_v23 = vadd.f32 %v6335_v17, %v4549_v18 }
 0x42c   : > { %v7713_v24 = vpop.eup %7712  ;;  %7722 = vrcp.f32 %v4946_v20 }
 0x42d   : > { %5237 = vst [vmem:[%s8546_s8 + $0x2c0] sm:$0xff] %v7713_v24  ;;  %7724 = vpow2.f32 %v5890_v22  ;;  %v5891_v25 = vmul.f32 -1.442695, %v6336_v23  ;;  %v3704_v27 = vpop.f32.mrb[192].mxu1  ;;  %v4554_v30 = vpop.f32.mrb[192].mxu0 }
 0x42e   : > { %v7715_v26 = vpop.eup %7714  ;;  %v6337_v29 = vadd.f32 %v8786_v8, %v3704_v27  ;;  %v3706_v31 = vpop.f32.mrb[193].mxu1 }
 0x42f   : > { %v7717_v28 = vpop.eup %7716  ;;  %5238 = vst [vmem:[%s8546_s8 + $0x2c8] sm:$0xff] %v7715_v26  ;;  %7726 = vpow2.f32 %v5891_v25  ;;  %v6143_v33 = vpop.f32.mrb[193].mxu0 }
 0x430   : > { %v4947_v32 = vadd.f32 1.0, %v7717_v28  ;;  %v3707_v34 = vpop.f32.mrb[194].mxu1  ;;  %v6338_v36 = vadd.f32 %v6337_v29, %v4554_v30  ;;  %v4557_v38 = vpop.f32.mrb[194].mxu0 }
 0x431   : > { %v7719_v35 = vpop.eup %7718  ;;  %v6339_v37 = vadd.f32 %v8786_v8, %v3707_v34  ;;  %v3709_v39 = vpop.f32.mrb[195].mxu1 }
 0x432   : > { %7728 = vrcp.f32 %v4947_v32  ;;  %v4948_v41 = vadd.f32 1.0, %v7719_v35  ;;  %v6144_v42 = vpop.f32.mrb[195].mxu0  ;;  %v5892_v43 = vmul.f32 -1.442695, %v6338_v36 }
 0x433   : > { %v6340_v44 = vadd.f32 %v6339_v37, %v4557_v38 }
 0x434   : > { %v7721_v45 = vpop.eup %7720  ;;  %7730 = vrcp.f32 %v4948_v41 }
 0x435   : > { %5239 = vst [vmem:[%s8546_s8 + $0x2d0] sm:$0xff] %v7721_v45  ;;  %7732 = vpow2.f32 %v5892_v43  ;;  %v5893_v46 = vmul.f32 -1.442695, %v6340_v44 }
 0x436   : > { %v7723_v47 = vpop.eup %7722 }
 0x437   : > { %v7725_v48 = vpop.eup %7724  ;;  %5240 = vst [vmem:[%s8546_s8 + $0x2d8] sm:$0xff] %v7723_v47  ;;  %7734 = vpow2.f32 %v5893_v46 }
 0x438   : > { %v4949_v8 = vadd.f32 1.0, %v7725_v48 }
 0x439   : > { %v7727_v1 = vpop.eup %7726 }
 0x43a   : > { %7736 = vrcp.f32 %v4949_v8  ;;  %v4950_v49 = vadd.f32 1.0, %v7727_v1 }
 0x43c   : > { %v7729_v50 = vpop.eup %7728  ;;  %7738 = vrcp.f32 %v4950_v49 }
 0x43d   : > { %5241 = vst [vmem:[%s8546_s8 + $0x2e0] sm:$0xff] %v7729_v50 }
 0x43e   : > { %v7731_v51 = vpop.eup %7730 }
 0x43f   : > { %v7733_v52 = vpop.eup %7732  ;;  %5242 = vst [vmem:[%s8546_s8 + $0x2e8] sm:$0xff] %v7731_v51 }
 0x440   : > { %v4951_v53 = vadd.f32 1.0, %v7733_v52 }
 0x441   : > { %v7735_v54 = vpop.eup %7734 }
 0x442   : > { %7740 = vrcp.f32 %v4951_v53  ;;  %v4952_v55 = vadd.f32 1.0, %v7735_v54 }
 0x444   : > { %v7737_v56 = vpop.eup %7736  ;;  %7742 = vrcp.f32 %v4952_v55 }
 0x445   : > { %5243 = vst [vmem:[%s8546_s8 + $0x2f0] sm:$0xff] %v7737_v56 }
 0x446   : > { %v7739_v57 = vpop.eup %7738 }
 0x447   : > { %5244 = vst [vmem:[%s8546_s8 + $0x2f8] sm:$0xff] %v7739_v57 }
 0x44c   : > { %v7741_v58 = vpop.eup %7740 }
 0x44d   : > { %5245 = vst [vmem:[%s8546_s8 + $0x300] sm:$0xff] %v7741_v58 }
 0x44e   : > { %v7743_v59 = vpop.eup %7742 }
 0x44f   : > { %5246 = vst [vmem:[%s8546_s8 + $0x308] sm:$0xff] %v7743_v59 }
 0x450   : > { %7759 = shalt.err (!%p7756_p7)
}
 0x451   : > { %s7760_s15 = scalar_lea.hbm %s8857_s6, 12544  ;;  %s7764_s11 = scalar_lea.hbm %s8920_s3, 100352 }
 0x452   : > { %p7761_p9 = scmp.ne.s32.totalorder %s8857_s6, %s7760_s15  ;;  %p7765_p12 = scmp.lt.u32.totalorder %s8857_s6, %s8920_s3 }
 0x453   : > { %p7766_p13 = scmp.lt.u32.totalorder %s7764_s11, %s7760_s15  ;;  %p7768_p1 = scmp.lt.u32.totalorder %s7760_s15, %s8857_s6 }
 0x454   : > { %p7762_p10 = pnand %p7761_p9, %p7919_p3 }
 0x455   : > { %p7767_p0 = por %p7766_p13, %p7765_p12 }
 0x456   : > { %p7763_p11 = pneg %p7762_p10 }
 0x457   : > { %p7769_p2 = por %p7768_p1, %p7767_p0 }
 0x459   : > { %p7770_p4 = pnand %p7769_p2, %p7763_p11 }
 0x45b   : > { %7773 = shalt.err (!%p7770_p4)
}
 0x45c   : > { %s7846_s24 = smov 128   ;;  %s7847_s29 = smov 8  }
 0x45d   : > { %6737 = dma.vmem_to_hbm [thread:$0]  (%p7919_p3), %s8859_s27, 12544, %s8857_s6, %s8865_s16, %s7846_s24, %s7846_s24, %s7847_s29  }
 0x45e PF: > { %p6743_p5 = scmp.ge.s32.totalorder %s7840_s19, 2  ;;  %s5278_s4 = sand.u32 1, %s7812_s12  }
 0x45f   : > { %s5279_s28 = scalar_lea.sflag [#allocation3], %s5278_s4 }
 0x460   : > { %p6740_p6 = pnand %p6743_p5, %p7928_p8 }
 0x462   : > { %7807 = dma.done.wait (!%p6740_p6), %s5279_s28, 12544  }
 0x463   : > { %7809 = vsyncadd (!%p6740_p6), %s5279_s28, 4294954752  ;;  %s16_s19 = sadd.s32 1, %s7840_s19   ;;  %s8923_s12 = smov %s7816_s13 }
 0x464   : > { %p13_p7 = scmp.ge.s32.totalorder %s16_s19, 10   ;;  %s8924_s13 = smov %s7820_s14 }
 0x465   : > { %s8925_s14 = smov %s7937_s30  ;;  %s8926_s15 = smov %s7832_s17 }
 0x466   : > { %s8927_s16 = smov %s7836_s18  ;;  %s8928_s17 = smov %s8931_s22 }
 0x467   : > { %s8929_s18 = smov %s8935_s23  ;;  %15 = sbr.rel (!%p13_p7) target bundleno = 5 (0x5), region = 67 }
 0x46e   :  { %5284 = vsyncpa [#allocation3], 1 }
 0x46f   :  { %5286 = vsyncpa [#allocation3 + $0x1], 1 }

</bundles_post_ra>
